<compile_context>
chip_gen: v6e
topology: v6e:2x2x1
jax: 0.10.0
libtpu: 0.0.40
codegen_flags: <defaults>
</compile_context>

<pallas_src>
import math
import jax
import jax.numpy as jnp
from jax.experimental import pallas as pl
from jax.experimental.pallas import tpu as pltpu

SIGMA_DATA = 1.0  # sigma_data = 1 (module default); sigma > 0 assumed (log used).


def _silu(v):
    # x * sigmoid(x) written with exp only (EUP path, lowers everywhere).
    return v / (1.0 + jnp.exp(-v))


# ------------------------------ fused Pallas kernel ------------------------------

def _gc_fused_kernel(coef_ref, scale_ref, w_in_ref, w_out_ref, xp_ref,
                     d_ref, hpad_ref):
    """Fused forward for one batch element.

      coef_ref : SMEM (B*4,)   per batch: [c_in, c_skip, c_out, conv_out_bias]
      scale_ref: SMEM (B*F,)   conv_in bias + time-embedding scale per channel
      w_in_ref : SMEM (9*F,)   conv_in weights, tap-major (t = ky*3 + kx), Cin = 1
      w_out_ref: SMEM (9*F,)   conv_out weights, tap-major, Cout = 1
      xp_ref   : VMEM (H+2, W+2)  SAME-padded single-channel input image
      d_ref    : VMEM (H, W)      preconditioned output D_x
      hpad_ref : VMEM scratch (F, H+2, W+2)  SAME-padded hidden activations
    """
    b = pl.program_id(0)
    H, W = d_ref.shape
    F = hpad_ref.shape[0]

    c_in = coef_ref[4 * b + 0]
    c_skip = coef_ref[4 * b + 1]
    c_out = coef_ref[4 * b + 2]
    b_out = coef_ref[4 * b + 3]

    # 9 shifted windows of the padded input, loaded once from VMEM and reused for
    # every output channel (taps fused into the conv reduction; no HBM im2col).
    taps = [xp_ref[pl.ds(ky, H), pl.ds(kx, W)]
            for ky in range(3) for kx in range(3)]

    # conv_in + (bias + temb scale) + SiLU, written into the zero-padded scratch
    # so conv_out's SAME padding comes for free.  The full-buffer zero is one
    # vectorized store (~10 KiB); the interior is overwritten right below.
    hpad_ref[...] = jnp.zeros(hpad_ref.shape, hpad_ref.dtype)
    for f in range(F):
        acc = w_in_ref[0 * F + f] * taps[0]
        for t in range(1, 9):
            acc = acc + w_in_ref[t * F + f] * taps[t]
        # conv(c_in * x) == c_in * conv(x); conv_in bias + temb are folded in scale.
        v = _silu(c_in * acc + scale_ref[b * F + f])
        hpad_ref[f, pl.ds(1, H), pl.ds(1, W)] = v

    # conv_out (Cout == 1): 9 taps x F channels, scalar weights from SMEM.
    fx = jnp.zeros((H, W), jnp.float32)
    for t in range(9):
        ky, kx = t // 3, t % 3
        for f in range(F):
            fx = fx + w_out_ref[t * F + f] * hpad_ref[f, pl.ds(ky, H), pl.ds(kx, W)]
    fx = fx + b_out

    # EDM preconditioning epilogue fused here (no extra read/write of x or F_x).
    x_c = xp_ref[pl.ds(1, H), pl.ds(1, W)]
    d_ref[...] = c_skip * x_c + c_out * fx


# --------------------------- model params / time embedding ---------------------------

def init_model_params(key, img_channels=1, filters=8, emb_half=8, hidden=16):
    assert img_channels == 1, "stand-in model assumes img_channels == 1 (module default)"
    ks = jax.random.split(key, 6)
    s = 0.1
    return dict(
        fourier_freqs=jax.random.normal(ks[0], (emb_half,), jnp.float32) * 16.0,
        map0_w=jax.random.normal(ks[1], (2 * emb_half, hidden), jnp.float32) * s,
        map0_b=jnp.zeros((hidden,), jnp.float32),
        map1_w=jax.random.normal(ks[2], (hidden, hidden), jnp.float32) * s,
        map1_b=jnp.zeros((hidden,), jnp.float32),
        temb_w=jax.random.normal(ks[3], (hidden, filters), jnp.float32) * s,
        temb_b=jnp.zeros((filters,), jnp.float32),
        # Conv weights stored once in (9, Cout) tap-major layout; flattened to 1-D
        # at call time for the SMEM side inputs.
        conv_in_w=jax.random.normal(ks[4], (9, filters), jnp.float32) * s,
        conv_in_b=jnp.zeros((filters,), jnp.float32),
        conv_out_w=jax.random.normal(ks[5], (9, filters), jnp.float32) * s,
        conv_out_b=jnp.zeros((1,), jnp.float32),
    )


def _time_embedding_scale(params, c_noise):
    # Tiny Fourier-embedding MLP: plain JAX/XLA (B<=2 rows; padding these to
    # 128x128 Pallas matmuls is pure overhead).
    ang = 2.0 * math.pi * c_noise[:, None] * params["fourier_freqs"][None, :]
    emb = jnp.concatenate([jnp.cos(ang), jnp.sin(ang)], axis=-1)
    emb = _silu(emb @ params["map0_w"] + params["map0_b"])
    emb = _silu(emb @ params["map1_w"] + params["map1_b"])
    temb = emb @ params["temb_w"] + params["temb_b"]          # (B, F)
    return temb + params["conv_in_b"][None, :]                # fold conv_in bias


# ------------------------------ GCPrecond forward ------------------------------

def gc_precond_forward(params, x, sigma):
    """D_x = c_skip * x + c_out * model(c_in * x, log(sigma)/4); x is NCHW, C == 1."""
    x = x.astype(jnp.float32)
    B, C, H, W = x.shape
    assert C == 1, "stand-in model assumes img_channels == 1 (module default)"
    sigma = sigma.reshape(B).astype(jnp.float32)              # sigma > 0 assumed

    sig2 = sigma * sigma
    c_skip = SIGMA_DATA ** 2 / (sig2 + SIGMA_DATA ** 2)
    c_out = sigma * SIGMA_DATA * jax.lax.rsqrt(sig2 + SIGMA_DATA ** 2)
    c_in = jax.lax.rsqrt(SIGMA_DATA ** 2 + sig2)
    c_noise = jnp.log(sigma) / 4.0                            # plain JAX

    scale = _time_embedding_scale(params, c_noise)            # (B, F)
    F = scale.shape[1]

    # Flat 1-D SMEM side inputs (1-D SMEM pads only to next pow2 bytes; 2-D pads
    # to (8,128)-word tiles, which would waste ~8 KiB per array).
    coef = jnp.stack(
        [c_in, c_skip, c_out, jnp.broadcast_to(params["conv_out_b"], (B,))],
        axis=1).reshape(-1).astype(jnp.float32)               # (B*4,)
    scale_flat = scale.reshape(-1).astype(jnp.float32)        # (B*F,)
    w_in_flat = params["conv_in_w"].reshape(-1)               # (9*F,)
    w_out_flat = params["conv_out_w"].reshape(-1)             # (9*F,)

    xp = jnp.pad(x[:, 0], ((0, 0), (1, 1), (1, 1)))           # (B, H+2, W+2)

    d = pl.pallas_call(
        _gc_fused_kernel,
        out_shape=jax.ShapeDtypeStruct((B, H, W), jnp.float32),
        grid=(B,),
        in_specs=[
            pl.BlockSpec(memory_space=pltpu.MemorySpace.SMEM),   # coef  (B*4,)
            pl.BlockSpec(memory_space=pltpu.MemorySpace.SMEM),   # scale (B*F,)
            pl.BlockSpec(memory_space=pltpu.MemorySpace.SMEM),   # w_in  (9*F,)
            pl.BlockSpec(memory_space=pltpu.MemorySpace.SMEM),   # w_out (9*F,)
            pl.BlockSpec((None, H + 2, W + 2), lambda b: (b, 0, 0)),  # xp, per batch
        ],
        out_specs=pl.BlockSpec((None, H, W), lambda b: (b, 0, 0)),
        scratch_shapes=[pltpu.VMEM((F, H + 2, W + 2), jnp.float32)],
        compiler_params=pltpu.CompilerParams(
            dimension_semantics=("parallel",)),               # shard batch over v7x TCs
    )(coef, scale_flat, w_in_flat, w_out_flat, xp)

    return d.reshape(B, C, H, W)


# ------------------------------ pure-JAX reference ------------------------------

def _reference_forward(params, x, sigma):
    B, C, H, W = x.shape
    x = x.astype(jnp.float32)
    sigma = sigma.reshape(B).astype(jnp.float32)
    sig2 = sigma * sigma
    c_skip = SIGMA_DATA ** 2 / (sig2 + SIGMA_DATA ** 2)
    c_out = sigma * SIGMA_DATA / jnp.sqrt(sig2 + SIGMA_DATA ** 2)
    c_in = 1.0 / jnp.sqrt(SIGMA_DATA ** 2 + sig2)
    c_noise = jnp.log(sigma) / 4.0
    scale = _time_embedding_scale(params, c_noise)            # (B, F)
    F = scale.shape[1]

    x_in = c_in[:, None, None] * x[:, 0]                      # (B, H, W)
    xp = jnp.pad(x_in, ((0, 0), (1, 1), (1, 1)))
    w_in = params["conv_in_w"].reshape(3, 3, F)
    h = jnp.zeros((B, H, W, F), jnp.float32)
    for ky in range(3):
        for kx in range(3):
            h = h + xp[:, ky:ky + H, kx:kx + W][..., None] * w_in[ky, kx][None, None, None, :]
    h = _silu(h + scale[:, None, None, :])

    hp = jnp.pad(h, ((0, 0), (1, 1), (1, 1), (0, 0)))
    w_out = params["conv_out_w"].reshape(3, 3, F)
    fx = jnp.zeros((B, H, W), jnp.float32)
    for ky in range(3):
        for kx in range(3):
            fx = fx + jnp.sum(hp[:, ky:ky + H, kx:kx + W, :] * w_out[ky, kx][None, None, None, :],
                              axis=-1)
    fx = fx + params["conv_out_b"][0]
    d = c_skip[:, None, None] * x[:, 0] + c_out[:, None, None] * fx
    return d.reshape(B, C, H, W)


if __name__ == "__main__":
    B, C, H, W = 2, 1, 16, 16
    key = jax.random.PRNGKey(0)
    kx_, ks_ = jax.random.split(key)
    x = jax.random.normal(kx_, (B, C, H, W), jnp.float32)
    sigma = jax.random.uniform(ks_, (B,), jnp.float32, minval=0.02, maxval=5.0)

    params = init_model_params(jax.random.PRNGKey(42), img_channels=C,
                               filters=8, emb_half=8, hidden=16)

    fwd = jax.jit(gc_precond_forward)
    d_x = fwd(params, x, sigma)
    jax.block_until_ready(d_x)
    assert d_x.shape == (B, C, H, W) and d_x.dtype == jnp.float32

    ref = _reference_forward(params, x, sigma)
    err = float(jnp.max(jnp.abs(d_x - ref)))
    assert err < 1e-3, f"mismatch vs pure-JAX reference: max abs err {err}"
    print("KERNEL_OK")
</pallas_src>

<mosaic_0001>
module attributes {stable_mosaic.version = 11 : i64} {
  func.func @_gc_fused_kernel(%arg0: i32, %arg1: memref<8xf32, #tpu.memory_space<smem>>, %arg2: memref<16xf32, #tpu.memory_space<smem>>, %arg3: memref<72xf32, #tpu.memory_space<smem>>, %arg4: memref<72xf32, #tpu.memory_space<smem>>, %arg5: memref<1x18x18xf32, #tpu.memory_space<vmem>>, %arg6: memref<1x16x16xf32, #tpu.memory_space<vmem>>, %arg7: memref<8x18x18xf32, #tpu.memory_space<vmem>>) attributes {dimension_semantics = [#tpu.dimension_semantics<parallel>], iteration_bounds = array<i64: 2>, scalar_prefetch = 0 : i64, scratch_operands = 1 : i64, tpu.core_type = #tpu.core_type<tc>, window_params = [{transform_indices = @transform_0, window_bounds = array<i64: 8>}, {transform_indices = @transform_1, window_bounds = array<i64: 16>}, {transform_indices = @transform_2, window_bounds = array<i64: 72>}, {transform_indices = @transform_3, window_bounds = array<i64: 72>}, {transform_indices = @transform_4, window_bounds = array<i64: 1, 18, 18>}, {transform_indices = @transform_5, window_bounds = array<i64: 1, 16, 16>}]} {
    %c4_i32 = arith.constant 4 : i32
    %0 = arith.muli %c4_i32, %arg0 : i32
    %c0_i32 = arith.constant 0 : i32
    %1 = arith.addi %0, %c0_i32 : i32
    %2 = arith.index_cast %1 : i32 to index
    %3 = memref.load %arg1[%2] : memref<8xf32, #tpu.memory_space<smem>>
    %c4_i32_0 = arith.constant 4 : i32
    %4 = arith.muli %c4_i32_0, %arg0 : i32
    %c1_i32 = arith.constant 1 : i32
    %5 = arith.addi %4, %c1_i32 : i32
    %6 = arith.index_cast %5 : i32 to index
    %7 = memref.load %arg1[%6] : memref<8xf32, #tpu.memory_space<smem>>
    %c4_i32_1 = arith.constant 4 : i32
    %8 = arith.muli %c4_i32_1, %arg0 : i32
    %c2_i32 = arith.constant 2 : i32
    %9 = arith.addi %8, %c2_i32 : i32
    %10 = arith.index_cast %9 : i32 to index
    %11 = memref.load %arg1[%10] : memref<8xf32, #tpu.memory_space<smem>>
    %c4_i32_2 = arith.constant 4 : i32
    %12 = arith.muli %c4_i32_2, %arg0 : i32
    %c3_i32 = arith.constant 3 : i32
    %13 = arith.addi %12, %c3_i32 : i32
    %14 = arith.index_cast %13 : i32 to index
    %15 = memref.load %arg1[%14] : memref<8xf32, #tpu.memory_space<smem>>
    %c0 = arith.constant 0 : index
    %c0_3 = arith.constant 0 : index
    %c0_4 = arith.constant 0 : index
    %16 = vector.load %arg5[%c0, %c0_3, %c0_4] : memref<1x18x18xf32, #tpu.memory_space<vmem>>, vector<1x16x16xf32>
    %17 = vector.shape_cast %16 : vector<1x16x16xf32> to vector<16x16xf32>
    %c0_5 = arith.constant 0 : index
    %c0_6 = arith.constant 0 : index
    %c1 = arith.constant 1 : index
    %18 = vector.load %arg5[%c0_5, %c0_6, %c1] : memref<1x18x18xf32, #tpu.memory_space<vmem>>, vector<1x16x16xf32>
    %19 = vector.shape_cast %18 : vector<1x16x16xf32> to vector<16x16xf32>
    %c0_7 = arith.constant 0 : index
    %c0_8 = arith.constant 0 : index
    %c2 = arith.constant 2 : index
    %20 = vector.load %arg5[%c0_7, %c0_8, %c2] : memref<1x18x18xf32, #tpu.memory_space<vmem>>, vector<1x16x16xf32>
    %21 = vector.shape_cast %20 : vector<1x16x16xf32> to vector<16x16xf32>
    %c0_9 = arith.constant 0 : index
    %c1_10 = arith.constant 1 : index
    %c0_11 = arith.constant 0 : index
    %22 = vector.load %arg5[%c0_9, %c1_10, %c0_11] : memref<1x18x18xf32, #tpu.memory_space<vmem>>, vector<1x16x16xf32>
    %23 = vector.shape_cast %22 : vector<1x16x16xf32> to vector<16x16xf32>
    %c0_12 = arith.constant 0 : index
    %c1_13 = arith.constant 1 : index
    %c1_14 = arith.constant 1 : index
    %24 = vector.load %arg5[%c0_12, %c1_13, %c1_14] : memref<1x18x18xf32, #tpu.memory_space<vmem>>, vector<1x16x16xf32>
    %25 = vector.shape_cast %24 : vector<1x16x16xf32> to vector<16x16xf32>
    %c0_15 = arith.constant 0 : index
    %c1_16 = arith.constant 1 : index
    %c2_17 = arith.constant 2 : index
    %26 = vector.load %arg5[%c0_15, %c1_16, %c2_17] : memref<1x18x18xf32, #tpu.memory_space<vmem>>, vector<1x16x16xf32>
    %27 = vector.shape_cast %26 : vector<1x16x16xf32> to vector<16x16xf32>
    %c0_18 = arith.constant 0 : index
    %c2_19 = arith.constant 2 : index
    %c0_20 = arith.constant 0 : index
    %28 = vector.load %arg5[%c0_18, %c2_19, %c0_20] : memref<1x18x18xf32, #tpu.memory_space<vmem>>, vector<1x16x16xf32>
    %29 = vector.shape_cast %28 : vector<1x16x16xf32> to vector<16x16xf32>
    %c0_21 = arith.constant 0 : index
    %c2_22 = arith.constant 2 : index
    %c1_23 = arith.constant 1 : index
    %30 = vector.load %arg5[%c0_21, %c2_22, %c1_23] : memref<1x18x18xf32, #tpu.memory_space<vmem>>, vector<1x16x16xf32>
    %31 = vector.shape_cast %30 : vector<1x16x16xf32> to vector<16x16xf32>
    %c0_24 = arith.constant 0 : index
    %c2_25 = arith.constant 2 : index
    %c2_26 = arith.constant 2 : index
    %32 = vector.load %arg5[%c0_24, %c2_25, %c2_26] : memref<1x18x18xf32, #tpu.memory_space<vmem>>, vector<1x16x16xf32>
    %33 = vector.shape_cast %32 : vector<1x16x16xf32> to vector<16x16xf32>
    %cst = arith.constant 0.000000e+00 : f32
    %34 = vector.broadcast %cst : f32 to vector<8x18x18xf32>
    %c0_27 = arith.constant 0 : index
    %c0_28 = arith.constant 0 : index
    %c0_29 = arith.constant 0 : index
    %35 = vector.load %arg7[%c0_27, %c0_28, %c0_29] : memref<8x18x18xf32, #tpu.memory_space<vmem>>, vector<8x18x18xf32>
    tpu.vector_store %arg7[%c0_27, %c0_28, %c0_29], %34 {strides = array<i32>} : memref<8x18x18xf32, #tpu.memory_space<vmem>>, vector<8x18x18xf32>,
    %c0_30 = arith.constant 0 : index
    %36 = memref.load %arg3[%c0_30] : memref<72xf32, #tpu.memory_space<smem>>
    %37 = vector.broadcast %36 : f32 to vector<16x16xf32>
    %38 = arith.mulf %37, %17 : vector<16x16xf32>
    %c8 = arith.constant 8 : index
    %39 = memref.load %arg3[%c8] : memref<72xf32, #tpu.memory_space<smem>>
    %40 = vector.broadcast %39 : f32 to vector<16x16xf32>
    %41 = arith.mulf %40, %19 : vector<16x16xf32>
    %42 = arith.addf %38, %41 : vector<16x16xf32>
    %c16 = arith.constant 16 : index
    %43 = memref.load %arg3[%c16] : memref<72xf32, #tpu.memory_space<smem>>
    %44 = vector.broadcast %43 : f32 to vector<16x16xf32>
    %45 = arith.mulf %44, %21 : vector<16x16xf32>
    %46 = arith.addf %42, %45 : vector<16x16xf32>
    %c24 = arith.constant 24 : index
    %47 = memref.load %arg3[%c24] : memref<72xf32, #tpu.memory_space<smem>>
    %48 = vector.broadcast %47 : f32 to vector<16x16xf32>
    %49 = arith.mulf %48, %23 : vector<16x16xf32>
    %50 = arith.addf %46, %49 : vector<16x16xf32>
    %c32 = arith.constant 32 : index
    %51 = memref.load %arg3[%c32] : memref<72xf32, #tpu.memory_space<smem>>
    %52 = vector.broadcast %51 : f32 to vector<16x16xf32>
    %53 = arith.mulf %52, %25 : vector<16x16xf32>
    %54 = arith.addf %50, %53 : vector<16x16xf32>
    %c40 = arith.constant 40 : index
    %55 = memref.load %arg3[%c40] : memref<72xf32, #tpu.memory_space<smem>>
    %56 = vector.broadcast %55 : f32 to vector<16x16xf32>
    %57 = arith.mulf %56, %27 : vector<16x16xf32>
    %58 = arith.addf %54, %57 : vector<16x16xf32>
    %c48 = arith.constant 48 : index
    %59 = memref.load %arg3[%c48] : memref<72xf32, #tpu.memory_space<smem>>
    %60 = vector.broadcast %59 : f32 to vector<16x16xf32>
    %61 = arith.mulf %60, %29 : vector<16x16xf32>
    %62 = arith.addf %58, %61 : vector<16x16xf32>
    %c56 = arith.constant 56 : index
    %63 = memref.load %arg3[%c56] : memref<72xf32, #tpu.memory_space<smem>>
    %64 = vector.broadcast %63 : f32 to vector<16x16xf32>
    %65 = arith.mulf %64, %31 : vector<16x16xf32>
    %66 = arith.addf %62, %65 : vector<16x16xf32>
    %c64 = arith.constant 64 : index
    %67 = memref.load %arg3[%c64] : memref<72xf32, #tpu.memory_space<smem>>
    %68 = vector.broadcast %67 : f32 to vector<16x16xf32>
    %69 = arith.mulf %68, %33 : vector<16x16xf32>
    %70 = arith.addf %66, %69 : vector<16x16xf32>
    %71 = vector.broadcast %3 : f32 to vector<16x16xf32>
    %72 = arith.mulf %71, %70 : vector<16x16xf32>
    %c8_i32 = arith.constant 8 : i32
    %73 = arith.muli %arg0, %c8_i32 : i32
    %c0_i32_31 = arith.constant 0 : i32
    %74 = arith.addi %73, %c0_i32_31 : i32
    %75 = arith.index_cast %74 : i32 to index
    %76 = memref.load %arg2[%75] : memref<16xf32, #tpu.memory_space<smem>>
    %77 = vector.broadcast %76 : f32 to vector<16x16xf32>
    %78 = arith.addf %72, %77 : vector<16x16xf32>
    %cst_32 = arith.constant 0.000000e+00 : f32
    %79 = vector.broadcast %cst_32 : f32 to vector<16x16xf32>
    %80 = arith.subf %79, %78 : vector<16x16xf32>
    %81 = math.exp %80 : vector<16x16xf32>
    %cst_33 = arith.constant 1.000000e+00 : f32
    %82 = vector.broadcast %cst_33 : f32 to vector<16x16xf32>
    %83 = arith.addf %82, %81 : vector<16x16xf32>
    %84 = arith.divf %78, %83 : vector<16x16xf32>
    %c0_34 = arith.constant 0 : index
    %c1_35 = arith.constant 1 : index
    %c1_36 = arith.constant 1 : index
    %85 = vector.load %arg7[%c0_34, %c1_35, %c1_36] : memref<8x18x18xf32, #tpu.memory_space<vmem>>, vector<1x16x16xf32>
    %86 = vector.shape_cast %85 : vector<1x16x16xf32> to vector<16x16xf32>
    %87 = vector.shape_cast %84 : vector<16x16xf32> to vector<1x16x16xf32>
    tpu.vector_store %arg7[%c0_34, %c1_35, %c1_36], %87 {strides = array<i32>} : memref<8x18x18xf32, #tpu.memory_space<vmem>>, vector<1x16x16xf32>,
    %c1_37 = arith.constant 1 : index
    %88 = memref.load %arg3[%c1_37] : memref<72xf32, #tpu.memory_space<smem>>
    %89 = vector.broadcast %88 : f32 to vector<16x16xf32>
    %90 = arith.mulf %89, %17 : vector<16x16xf32>
    %c9 = arith.constant 9 : index
    %91 = memref.load %arg3[%c9] : memref<72xf32, #tpu.memory_space<smem>>
    %92 = vector.broadcast %91 : f32 to vector<16x16xf32>
    %93 = arith.mulf %92, %19 : vector<16x16xf32>
    %94 = arith.addf %90, %93 : vector<16x16xf32>
    %c17 = arith.constant 17 : index
    %95 = memref.load %arg3[%c17] : memref<72xf32, #tpu.memory_space<smem>>
    %96 = vector.broadcast %95 : f32 to vector<16x16xf32>
    %97 = arith.mulf %96, %21 : vector<16x16xf32>
    %98 = arith.addf %94, %97 : vector<16x16xf32>
    %c25 = arith.constant 25 : index
    %99 = memref.load %arg3[%c25] : memref<72xf32, #tpu.memory_space<smem>>
    %100 = vector.broadcast %99 : f32 to vector<16x16xf32>
    %101 = arith.mulf %100, %23 : vector<16x16xf32>
    %102 = arith.addf %98, %101 : vector<16x16xf32>
    %c33 = arith.constant 33 : index
    %103 = memref.load %arg3[%c33] : memref<72xf32, #tpu.memory_space<smem>>
    %104 = vector.broadcast %103 : f32 to vector<16x16xf32>
    %105 = arith.mulf %104, %25 : vector<16x16xf32>
    %106 = arith.addf %102, %105 : vector<16x16xf32>
    %c41 = arith.constant 41 : index
    %107 = memref.load %arg3[%c41] : memref<72xf32, #tpu.memory_space<smem>>
    %108 = vector.broadcast %107 : f32 to vector<16x16xf32>
    %109 = arith.mulf %108, %27 : vector<16x16xf32>
    %110 = arith.addf %106, %109 : vector<16x16xf32>
    %c49 = arith.constant 49 : index
    %111 = memref.load %arg3[%c49] : memref<72xf32, #tpu.memory_space<smem>>
    %112 = vector.broadcast %111 : f32 to vector<16x16xf32>
    %113 = arith.mulf %112, %29 : vector<16x16xf32>
    %114 = arith.addf %110, %113 : vector<16x16xf32>
    %c57 = arith.constant 57 : index
    %115 = memref.load %arg3[%c57] : memref<72xf32, #tpu.memory_space<smem>>
    %116 = vector.broadcast %115 : f32 to vector<16x16xf32>
    %117 = arith.mulf %116, %31 : vector<16x16xf32>
    %118 = arith.addf %114, %117 : vector<16x16xf32>
    %c65 = arith.constant 65 : index
    %119 = memref.load %arg3[%c65] : memref<72xf32, #tpu.memory_space<smem>>
    %120 = vector.broadcast %119 : f32 to vector<16x16xf32>
    %121 = arith.mulf %120, %33 : vector<16x16xf32>
    %122 = arith.addf %118, %121 : vector<16x16xf32>
    %123 = vector.broadcast %3 : f32 to vector<16x16xf32>
    %124 = arith.mulf %123, %122 : vector<16x16xf32>
    %c8_i32_38 = arith.constant 8 : i32
    %125 = arith.muli %arg0, %c8_i32_38 : i32
    %c1_i32_39 = arith.constant 1 : i32
    %126 = arith.addi %125, %c1_i32_39 : i32
    %127 = arith.index_cast %126 : i32 to index
    %128 = memref.load %arg2[%127] : memref<16xf32, #tpu.memory_space<smem>>
    %129 = vector.broadcast %128 : f32 to vector<16x16xf32>
    %130 = arith.addf %124, %129 : vector<16x16xf32>
    %cst_40 = arith.constant 0.000000e+00 : f32
    %131 = vector.broadcast %cst_40 : f32 to vector<16x16xf32>
    %132 = arith.subf %131, %130 : vector<16x16xf32>
    %133 = math.exp %132 : vector<16x16xf32>
    %cst_41 = arith.constant 1.000000e+00 : f32
    %134 = vector.broadcast %cst_41 : f32 to vector<16x16xf32>
    %135 = arith.addf %134, %133 : vector<16x16xf32>
    %136 = arith.divf %130, %135 : vector<16x16xf32>
    %c1_42 = arith.constant 1 : index
    %c1_43 = arith.constant 1 : index
    %c1_44 = arith.constant 1 : index
    %137 = vector.load %arg7[%c1_42, %c1_43, %c1_44] : memref<8x18x18xf32, #tpu.memory_space<vmem>>, vector<1x16x16xf32>
    %138 = vector.shape_cast %137 : vector<1x16x16xf32> to vector<16x16xf32>
    %139 = vector.shape_cast %136 : vector<16x16xf32> to vector<1x16x16xf32>
    tpu.vector_store %arg7[%c1_42, %c1_43, %c1_44], %139 {strides = array<i32>} : memref<8x18x18xf32, #tpu.memory_space<vmem>>, vector<1x16x16xf32>,
    %c2_45 = arith.constant 2 : index
    %140 = memref.load %arg3[%c2_45] : memref<72xf32, #tpu.memory_space<smem>>
    %141 = vector.broadcast %140 : f32 to vector<16x16xf32>
    %142 = arith.mulf %141, %17 : vector<16x16xf32>
    %c10 = arith.constant 10 : index
    %143 = memref.load %arg3[%c10] : memref<72xf32, #tpu.memory_space<smem>>
    %144 = vector.broadcast %143 : f32 to vector<16x16xf32>
    %145 = arith.mulf %144, %19 : vector<16x16xf32>
    %146 = arith.addf %142, %145 : vector<16x16xf32>
    %c18 = arith.constant 18 : index
    %147 = memref.load %arg3[%c18] : memref<72xf32, #tpu.memory_space<smem>>
    %148 = vector.broadcast %147 : f32 to vector<16x16xf32>
    %149 = arith.mulf %148, %21 : vector<16x16xf32>
    %150 = arith.addf %146, %149 : vector<16x16xf32>
    %c26 = arith.constant 26 : index
    %151 = memref.load %arg3[%c26] : memref<72xf32, #tpu.memory_space<smem>>
    %152 = vector.broadcast %151 : f32 to vector<16x16xf32>
    %153 = arith.mulf %152, %23 : vector<16x16xf32>
    %154 = arith.addf %150, %153 : vector<16x16xf32>
    %c34 = arith.constant 34 : index
    %155 = memref.load %arg3[%c34] : memref<72xf32, #tpu.memory_space<smem>>
    %156 = vector.broadcast %155 : f32 to vector<16x16xf32>
    %157 = arith.mulf %156, %25 : vector<16x16xf32>
    %158 = arith.addf %154, %157 : vector<16x16xf32>
    %c42 = arith.constant 42 : index
    %159 = memref.load %arg3[%c42] : memref<72xf32, #tpu.memory_space<smem>>
    %160 = vector.broadcast %159 : f32 to vector<16x16xf32>
    %161 = arith.mulf %160, %27 : vector<16x16xf32>
    %162 = arith.addf %158, %161 : vector<16x16xf32>
    %c50 = arith.constant 50 : index
    %163 = memref.load %arg3[%c50] : memref<72xf32, #tpu.memory_space<smem>>
    %164 = vector.broadcast %163 : f32 to vector<16x16xf32>
    %165 = arith.mulf %164, %29 : vector<16x16xf32>
    %166 = arith.addf %162, %165 : vector<16x16xf32>
    %c58 = arith.constant 58 : index
    %167 = memref.load %arg3[%c58] : memref<72xf32, #tpu.memory_space<smem>>
    %168 = vector.broadcast %167 : f32 to vector<16x16xf32>
    %169 = arith.mulf %168, %31 : vector<16x16xf32>
    %170 = arith.addf %166, %169 : vector<16x16xf32>
    %c66 = arith.constant 66 : index
    %171 = memref.load %arg3[%c66] : memref<72xf32, #tpu.memory_space<smem>>
    %172 = vector.broadcast %171 : f32 to vector<16x16xf32>
    %173 = arith.mulf %172, %33 : vector<16x16xf32>
    %174 = arith.addf %170, %173 : vector<16x16xf32>
    %175 = vector.broadcast %3 : f32 to vector<16x16xf32>
    %176 = arith.mulf %175, %174 : vector<16x16xf32>
    %c8_i32_46 = arith.constant 8 : i32
    %177 = arith.muli %arg0, %c8_i32_46 : i32
    %c2_i32_47 = arith.constant 2 : i32
    %178 = arith.addi %177, %c2_i32_47 : i32
    %179 = arith.index_cast %178 : i32 to index
    %180 = memref.load %arg2[%179] : memref<16xf32, #tpu.memory_space<smem>>
    %181 = vector.broadcast %180 : f32 to vector<16x16xf32>
    %182 = arith.addf %176, %181 : vector<16x16xf32>
    %cst_48 = arith.constant 0.000000e+00 : f32
    %183 = vector.broadcast %cst_48 : f32 to vector<16x16xf32>
    %184 = arith.subf %183, %182 : vector<16x16xf32>
    %185 = math.exp %184 : vector<16x16xf32>
    %cst_49 = arith.constant 1.000000e+00 : f32
    %186 = vector.broadcast %cst_49 : f32 to vector<16x16xf32>
    %187 = arith.addf %186, %185 : vector<16x16xf32>
    %188 = arith.divf %182, %187 : vector<16x16xf32>
    %c2_50 = arith.constant 2 : index
    %c1_51 = arith.constant 1 : index
    %c1_52 = arith.constant 1 : index
    %189 = vector.load %arg7[%c2_50, %c1_51, %c1_52] : memref<8x18x18xf32, #tpu.memory_space<vmem>>, vector<1x16x16xf32>
    %190 = vector.shape_cast %189 : vector<1x16x16xf32> to vector<16x16xf32>
    %191 = vector.shape_cast %188 : vector<16x16xf32> to vector<1x16x16xf32>
    tpu.vector_store %arg7[%c2_50, %c1_51, %c1_52], %191 {strides = array<i32>} : memref<8x18x18xf32, #tpu.memory_space<vmem>>, vector<1x16x16xf32>,
    %c3 = arith.constant 3 : index
    %192 = memref.load %arg3[%c3] : memref<72xf32, #tpu.memory_space<smem>>
    %193 = vector.broadcast %192 : f32 to vector<16x16xf32>
    %194 = arith.mulf %193, %17 : vector<16x16xf32>
    %c11 = arith.constant 11 : index
    %195 = memref.load %arg3[%c11] : memref<72xf32, #tpu.memory_space<smem>>
    %196 = vector.broadcast %195 : f32 to vector<16x16xf32>
    %197 = arith.mulf %196, %19 : vector<16x16xf32>
    %198 = arith.addf %194, %197 : vector<16x16xf32>
    %c19 = arith.constant 19 : index
    %199 = memref.load %arg3[%c19] : memref<72xf32, #tpu.memory_space<smem>>
    %200 = vector.broadcast %199 : f32 to vector<16x16xf32>
    %201 = arith.mulf %200, %21 : vector<16x16xf32>
    %202 = arith.addf %198, %201 : vector<16x16xf32>
    %c27 = arith.constant 27 : index
    %203 = memref.load %arg3[%c27] : memref<72xf32, #tpu.memory_space<smem>>
    %204 = vector.broadcast %203 : f32 to vector<16x16xf32>
    %205 = arith.mulf %204, %23 : vector<16x16xf32>
    %206 = arith.addf %202, %205 : vector<16x16xf32>
    %c35 = arith.constant 35 : index
    %207 = memref.load %arg3[%c35] : memref<72xf32, #tpu.memory_space<smem>>
    %208 = vector.broadcast %207 : f32 to vector<16x16xf32>
    %209 = arith.mulf %208, %25 : vector<16x16xf32>
    %210 = arith.addf %206, %209 : vector<16x16xf32>
    %c43 = arith.constant 43 : index
    %211 = memref.load %arg3[%c43] : memref<72xf32, #tpu.memory_space<smem>>
    %212 = vector.broadcast %211 : f32 to vector<16x16xf32>
    %213 = arith.mulf %212, %27 : vector<16x16xf32>
    %214 = arith.addf %210, %213 : vector<16x16xf32>
    %c51 = arith.constant 51 : index
    %215 = memref.load %arg3[%c51] : memref<72xf32, #tpu.memory_space<smem>>
    %216 = vector.broadcast %215 : f32 to vector<16x16xf32>
    %217 = arith.mulf %216, %29 : vector<16x16xf32>
    %218 = arith.addf %214, %217 : vector<16x16xf32>
    %c59 = arith.constant 59 : index
    %219 = memref.load %arg3[%c59] : memref<72xf32, #tpu.memory_space<smem>>
    %220 = vector.broadcast %219 : f32 to vector<16x16xf32>
    %221 = arith.mulf %220, %31 : vector<16x16xf32>
    %222 = arith.addf %218, %221 : vector<16x16xf32>
    %c67 = arith.constant 67 : index
    %223 = memref.load %arg3[%c67] : memref<72xf32, #tpu.memory_space<smem>>
    %224 = vector.broadcast %223 : f32 to vector<16x16xf32>
    %225 = arith.mulf %224, %33 : vector<16x16xf32>
    %226 = arith.addf %222, %225 : vector<16x16xf32>
    %227 = vector.broadcast %3 : f32 to vector<16x16xf32>
    %228 = arith.mulf %227, %226 : vector<16x16xf32>
    %c8_i32_53 = arith.constant 8 : i32
    %229 = arith.muli %arg0, %c8_i32_53 : i32
    %c3_i32_54 = arith.constant 3 : i32
    %230 = arith.addi %229, %c3_i32_54 : i32
    %231 = arith.index_cast %230 : i32 to index
    %232 = memref.load %arg2[%231] : memref<16xf32, #tpu.memory_space<smem>>
    %233 = vector.broadcast %232 : f32 to vector<16x16xf32>
    %234 = arith.addf %228, %233 : vector<16x16xf32>
    %cst_55 = arith.constant 0.000000e+00 : f32
    %235 = vector.broadcast %cst_55 : f32 to vector<16x16xf32>
    %236 = arith.subf %235, %234 : vector<16x16xf32>
    %237 = math.exp %236 : vector<16x16xf32>
    %cst_56 = arith.constant 1.000000e+00 : f32
    %238 = vector.broadcast %cst_56 : f32 to vector<16x16xf32>
    %239 = arith.addf %238, %237 : vector<16x16xf32>
    %240 = arith.divf %234, %239 : vector<16x16xf32>
    %c3_57 = arith.constant 3 : index
    %c1_58 = arith.constant 1 : index
    %c1_59 = arith.constant 1 : index
    %241 = vector.load %arg7[%c3_57, %c1_58, %c1_59] : memref<8x18x18xf32, #tpu.memory_space<vmem>>, vector<1x16x16xf32>
    %242 = vector.shape_cast %241 : vector<1x16x16xf32> to vector<16x16xf32>
    %243 = vector.shape_cast %240 : vector<16x16xf32> to vector<1x16x16xf32>
    tpu.vector_store %arg7[%c3_57, %c1_58, %c1_59], %243 {strides = array<i32>} : memref<8x18x18xf32, #tpu.memory_space<vmem>>, vector<1x16x16xf32>,
    %c4 = arith.constant 4 : index
    %244 = memref.load %arg3[%c4] : memref<72xf32, #tpu.memory_space<smem>>
    %245 = vector.broadcast %244 : f32 to vector<16x16xf32>
    %246 = arith.mulf %245, %17 : vector<16x16xf32>
    %c12 = arith.constant 12 : index
    %247 = memref.load %arg3[%c12] : memref<72xf32, #tpu.memory_space<smem>>
    %248 = vector.broadcast %247 : f32 to vector<16x16xf32>
    %249 = arith.mulf %248, %19 : vector<16x16xf32>
    %250 = arith.addf %246, %249 : vector<16x16xf32>
    %c20 = arith.constant 20 : index
    %251 = memref.load %arg3[%c20] : memref<72xf32, #tpu.memory_space<smem>>
    %252 = vector.broadcast %251 : f32 to vector<16x16xf32>
    %253 = arith.mulf %252, %21 : vector<16x16xf32>
    %254 = arith.addf %250, %253 : vector<16x16xf32>
    %c28 = arith.constant 28 : index
    %255 = memref.load %arg3[%c28] : memref<72xf32, #tpu.memory_space<smem>>
    %256 = vector.broadcast %255 : f32 to vector<16x16xf32>
    %257 = arith.mulf %256, %23 : vector<16x16xf32>
    %258 = arith.addf %254, %257 : vector<16x16xf32>
    %c36 = arith.constant 36 : index
    %259 = memref.load %arg3[%c36] : memref<72xf32, #tpu.memory_space<smem>>
    %260 = vector.broadcast %259 : f32 to vector<16x16xf32>
    %261 = arith.mulf %260, %25 : vector<16x16xf32>
    %262 = arith.addf %258, %261 : vector<16x16xf32>
    %c44 = arith.constant 44 : index
    %263 = memref.load %arg3[%c44] : memref<72xf32, #tpu.memory_space<smem>>
    %264 = vector.broadcast %263 : f32 to vector<16x16xf32>
    %265 = arith.mulf %264, %27 : vector<16x16xf32>
    %266 = arith.addf %262, %265 : vector<16x16xf32>
    %c52 = arith.constant 52 : index
    %267 = memref.load %arg3[%c52] : memref<72xf32, #tpu.memory_space<smem>>
    %268 = vector.broadcast %267 : f32 to vector<16x16xf32>
    %269 = arith.mulf %268, %29 : vector<16x16xf32>
    %270 = arith.addf %266, %269 : vector<16x16xf32>
    %c60 = arith.constant 60 : index
    %271 = memref.load %arg3[%c60] : memref<72xf32, #tpu.memory_space<smem>>
    %272 = vector.broadcast %271 : f32 to vector<16x16xf32>
    %273 = arith.mulf %272, %31 : vector<16x16xf32>
    %274 = arith.addf %270, %273 : vector<16x16xf32>
    %c68 = arith.constant 68 : index
    %275 = memref.load %arg3[%c68] : memref<72xf32, #tpu.memory_space<smem>>
    %276 = vector.broadcast %275 : f32 to vector<16x16xf32>
    %277 = arith.mulf %276, %33 : vector<16x16xf32>
    %278 = arith.addf %274, %277 : vector<16x16xf32>
    %279 = vector.broadcast %3 : f32 to vector<16x16xf32>
    %280 = arith.mulf %279, %278 : vector<16x16xf32>
    %c8_i32_60 = arith.constant 8 : i32
    %281 = arith.muli %arg0, %c8_i32_60 : i32
    %c4_i32_61 = arith.constant 4 : i32
    %282 = arith.addi %281, %c4_i32_61 : i32
    %283 = arith.index_cast %282 : i32 to index
    %284 = memref.load %arg2[%283] : memref<16xf32, #tpu.memory_space<smem>>
    %285 = vector.broadcast %284 : f32 to vector<16x16xf32>
    %286 = arith.addf %280, %285 : vector<16x16xf32>
    %cst_62 = arith.constant 0.000000e+00 : f32
    %287 = vector.broadcast %cst_62 : f32 to vector<16x16xf32>
    %288 = arith.subf %287, %286 : vector<16x16xf32>
    %289 = math.exp %288 : vector<16x16xf32>
    %cst_63 = arith.constant 1.000000e+00 : f32
    %290 = vector.broadcast %cst_63 : f32 to vector<16x16xf32>
    %291 = arith.addf %290, %289 : vector<16x16xf32>
    %292 = arith.divf %286, %291 : vector<16x16xf32>
    %c4_64 = arith.constant 4 : index
    %c1_65 = arith.constant 1 : index
    %c1_66 = arith.constant 1 : index
    %293 = vector.load %arg7[%c4_64, %c1_65, %c1_66] : memref<8x18x18xf32, #tpu.memory_space<vmem>>, vector<1x16x16xf32>
    %294 = vector.shape_cast %293 : vector<1x16x16xf32> to vector<16x16xf32>
    %295 = vector.shape_cast %292 : vector<16x16xf32> to vector<1x16x16xf32>
    tpu.vector_store %arg7[%c4_64, %c1_65, %c1_66], %295 {strides = array<i32>} : memref<8x18x18xf32, #tpu.memory_space<vmem>>, vector<1x16x16xf32>,
    %c5 = arith.constant 5 : index
    %296 = memref.load %arg3[%c5] : memref<72xf32, #tpu.memory_space<smem>>
    %297 = vector.broadcast %296 : f32 to vector<16x16xf32>
    %298 = arith.mulf %297, %17 : vector<16x16xf32>
    %c13 = arith.constant 13 : index
    %299 = memref.load %arg3[%c13] : memref<72xf32, #tpu.memory_space<smem>>
    %300 = vector.broadcast %299 : f32 to vector<16x16xf32>
    %301 = arith.mulf %300, %19 : vector<16x16xf32>
    %302 = arith.addf %298, %301 : vector<16x16xf32>
    %c21 = arith.constant 21 : index
    %303 = memref.load %arg3[%c21] : memref<72xf32, #tpu.memory_space<smem>>
    %304 = vector.broadcast %303 : f32 to vector<16x16xf32>
    %305 = arith.mulf %304, %21 : vector<16x16xf32>
    %306 = arith.addf %302, %305 : vector<16x16xf32>
    %c29 = arith.constant 29 : index
    %307 = memref.load %arg3[%c29] : memref<72xf32, #tpu.memory_space<smem>>
    %308 = vector.broadcast %307 : f32 to vector<16x16xf32>
    %309 = arith.mulf %308, %23 : vector<16x16xf32>
    %310 = arith.addf %306, %309 : vector<16x16xf32>
    %c37 = arith.constant 37 : index
    %311 = memref.load %arg3[%c37] : memref<72xf32, #tpu.memory_space<smem>>
    %312 = vector.broadcast %311 : f32 to vector<16x16xf32>
    %313 = arith.mulf %312, %25 : vector<16x16xf32>
    %314 = arith.addf %310, %313 : vector<16x16xf32>
    %c45 = arith.constant 45 : index
    %315 = memref.load %arg3[%c45] : memref<72xf32, #tpu.memory_space<smem>>
    %316 = vector.broadcast %315 : f32 to vector<16x16xf32>
    %317 = arith.mulf %316, %27 : vector<16x16xf32>
    %318 = arith.addf %314, %317 : vector<16x16xf32>
    %c53 = arith.constant 53 : index
    %319 = memref.load %arg3[%c53] : memref<72xf32, #tpu.memory_space<smem>>
    %320 = vector.broadcast %319 : f32 to vector<16x16xf32>
    %321 = arith.mulf %320, %29 : vector<16x16xf32>
    %322 = arith.addf %318, %321 : vector<16x16xf32>
    %c61 = arith.constant 61 : index
    %323 = memref.load %arg3[%c61] : memref<72xf32, #tpu.memory_space<smem>>
    %324 = vector.broadcast %323 : f32 to vector<16x16xf32>
    %325 = arith.mulf %324, %31 : vector<16x16xf32>
    %326 = arith.addf %322, %325 : vector<16x16xf32>
    %c69 = arith.constant 69 : index
    %327 = memref.load %arg3[%c69] : memref<72xf32, #tpu.memory_space<smem>>
    %328 = vector.broadcast %327 : f32 to vector<16x16xf32>
    %329 = arith.mulf %328, %33 : vector<16x16xf32>
    %330 = arith.addf %326, %329 : vector<16x16xf32>
    %331 = vector.broadcast %3 : f32 to vector<16x16xf32>
    %332 = arith.mulf %331, %330 : vector<16x16xf32>
    %c8_i32_67 = arith.constant 8 : i32
    %333 = arith.muli %arg0, %c8_i32_67 : i32
    %c5_i32 = arith.constant 5 : i32
    %334 = arith.addi %333, %c5_i32 : i32
    %335 = arith.index_cast %334 : i32 to index
    %336 = memref.load %arg2[%335] : memref<16xf32, #tpu.memory_space<smem>>
    %337 = vector.broadcast %336 : f32 to vector<16x16xf32>
    %338 = arith.addf %332, %337 : vector<16x16xf32>
    %cst_68 = arith.constant 0.000000e+00 : f32
    %339 = vector.broadcast %cst_68 : f32 to vector<16x16xf32>
    %340 = arith.subf %339, %338 : vector<16x16xf32>
    %341 = math.exp %340 : vector<16x16xf32>
    %cst_69 = arith.constant 1.000000e+00 : f32
    %342 = vector.broadcast %cst_69 : f32 to vector<16x16xf32>
    %343 = arith.addf %342, %341 : vector<16x16xf32>
    %344 = arith.divf %338, %343 : vector<16x16xf32>
    %c5_70 = arith.constant 5 : index
    %c1_71 = arith.constant 1 : index
    %c1_72 = arith.constant 1 : index
    %345 = vector.load %arg7[%c5_70, %c1_71, %c1_72] : memref<8x18x18xf32, #tpu.memory_space<vmem>>, vector<1x16x16xf32>
    %346 = vector.shape_cast %345 : vector<1x16x16xf32> to vector<16x16xf32>
    %347 = vector.shape_cast %344 : vector<16x16xf32> to vector<1x16x16xf32>
    tpu.vector_store %arg7[%c5_70, %c1_71, %c1_72], %347 {strides = array<i32>} : memref<8x18x18xf32, #tpu.memory_space<vmem>>, vector<1x16x16xf32>,
    %c6 = arith.constant 6 : index
    %348 = memref.load %arg3[%c6] : memref<72xf32, #tpu.memory_space<smem>>
    %349 = vector.broadcast %348 : f32 to vector<16x16xf32>
    %350 = arith.mulf %349, %17 : vector<16x16xf32>
    %c14 = arith.constant 14 : index
    %351 = memref.load %arg3[%c14] : memref<72xf32, #tpu.memory_space<smem>>
    %352 = vector.broadcast %351 : f32 to vector<16x16xf32>
    %353 = arith.mulf %352, %19 : vector<16x16xf32>
    %354 = arith.addf %350, %353 : vector<16x16xf32>
    %c22 = arith.constant 22 : index
    %355 = memref.load %arg3[%c22] : memref<72xf32, #tpu.memory_space<smem>>
    %356 = vector.broadcast %355 : f32 to vector<16x16xf32>
    %357 = arith.mulf %356, %21 : vector<16x16xf32>
    %358 = arith.addf %354, %357 : vector<16x16xf32>
    %c30 = arith.constant 30 : index
    %359 = memref.load %arg3[%c30] : memref<72xf32, #tpu.memory_space<smem>>
    %360 = vector.broadcast %359 : f32 to vector<16x16xf32>
    %361 = arith.mulf %360, %23 : vector<16x16xf32>
    %362 = arith.addf %358, %361 : vector<16x16xf32>
    %c38 = arith.constant 38 : index
    %363 = memref.load %arg3[%c38] : memref<72xf32, #tpu.memory_space<smem>>
    %364 = vector.broadcast %363 : f32 to vector<16x16xf32>
    %365 = arith.mulf %364, %25 : vector<16x16xf32>
    %366 = arith.addf %362, %365 : vector<16x16xf32>
    %c46 = arith.constant 46 : index
    %367 = memref.load %arg3[%c46] : memref<72xf32, #tpu.memory_space<smem>>
    %368 = vector.broadcast %367 : f32 to vector<16x16xf32>
    %369 = arith.mulf %368, %27 : vector<16x16xf32>
    %370 = arith.addf %366, %369 : vector<16x16xf32>
    %c54 = arith.constant 54 : index
    %371 = memref.load %arg3[%c54] : memref<72xf32, #tpu.memory_space<smem>>
    %372 = vector.broadcast %371 : f32 to vector<16x16xf32>
    %373 = arith.mulf %372, %29 : vector<16x16xf32>
    %374 = arith.addf %370, %373 : vector<16x16xf32>
    %c62 = arith.constant 62 : index
    %375 = memref.load %arg3[%c62] : memref<72xf32, #tpu.memory_space<smem>>
    %376 = vector.broadcast %375 : f32 to vector<16x16xf32>
    %377 = arith.mulf %376, %31 : vector<16x16xf32>
    %378 = arith.addf %374, %377 : vector<16x16xf32>
    %c70 = arith.constant 70 : index
    %379 = memref.load %arg3[%c70] : memref<72xf32, #tpu.memory_space<smem>>
    %380 = vector.broadcast %379 : f32 to vector<16x16xf32>
    %381 = arith.mulf %380, %33 : vector<16x16xf32>
    %382 = arith.addf %378, %381 : vector<16x16xf32>
    %383 = vector.broadcast %3 : f32 to vector<16x16xf32>
    %384 = arith.mulf %383, %382 : vector<16x16xf32>
    %c8_i32_73 = arith.constant 8 : i32
    %385 = arith.muli %arg0, %c8_i32_73 : i32
    %c6_i32 = arith.constant 6 : i32
    %386 = arith.addi %385, %c6_i32 : i32
    %387 = arith.index_cast %386 : i32 to index
    %388 = memref.load %arg2[%387] : memref<16xf32, #tpu.memory_space<smem>>
    %389 = vector.broadcast %388 : f32 to vector<16x16xf32>
    %390 = arith.addf %384, %389 : vector<16x16xf32>
    %cst_74 = arith.constant 0.000000e+00 : f32
    %391 = vector.broadcast %cst_74 : f32 to vector<16x16xf32>
    %392 = arith.subf %391, %390 : vector<16x16xf32>
    %393 = math.exp %392 : vector<16x16xf32>
    %cst_75 = arith.constant 1.000000e+00 : f32
    %394 = vector.broadcast %cst_75 : f32 to vector<16x16xf32>
    %395 = arith.addf %394, %393 : vector<16x16xf32>
    %396 = arith.divf %390, %395 : vector<16x16xf32>
    %c6_76 = arith.constant 6 : index
    %c1_77 = arith.constant 1 : index
    %c1_78 = arith.constant 1 : index
    %397 = vector.load %arg7[%c6_76, %c1_77, %c1_78] : memref<8x18x18xf32, #tpu.memory_space<vmem>>, vector<1x16x16xf32>
    %398 = vector.shape_cast %397 : vector<1x16x16xf32> to vector<16x16xf32>
    %399 = vector.shape_cast %396 : vector<16x16xf32> to vector<1x16x16xf32>
    tpu.vector_store %arg7[%c6_76, %c1_77, %c1_78], %399 {strides = array<i32>} : memref<8x18x18xf32, #tpu.memory_space<vmem>>, vector<1x16x16xf32>,
    %c7 = arith.constant 7 : index
    %400 = memref.load %arg3[%c7] : memref<72xf32, #tpu.memory_space<smem>>
    %401 = vector.broadcast %400 : f32 to vector<16x16xf32>
    %402 = arith.mulf %401, %17 : vector<16x16xf32>
    %c15 = arith.constant 15 : index
    %403 = memref.load %arg3[%c15] : memref<72xf32, #tpu.memory_space<smem>>
    %404 = vector.broadcast %403 : f32 to vector<16x16xf32>
    %405 = arith.mulf %404, %19 : vector<16x16xf32>
    %406 = arith.addf %402, %405 : vector<16x16xf32>
    %c23 = arith.constant 23 : index
    %407 = memref.load %arg3[%c23] : memref<72xf32, #tpu.memory_space<smem>>
    %408 = vector.broadcast %407 : f32 to vector<16x16xf32>
    %409 = arith.mulf %408, %21 : vector<16x16xf32>
    %410 = arith.addf %406, %409 : vector<16x16xf32>
    %c31 = arith.constant 31 : index
    %411 = memref.load %arg3[%c31] : memref<72xf32, #tpu.memory_space<smem>>
    %412 = vector.broadcast %411 : f32 to vector<16x16xf32>
    %413 = arith.mulf %412, %23 : vector<16x16xf32>
    %414 = arith.addf %410, %413 : vector<16x16xf32>
    %c39 = arith.constant 39 : index
    %415 = memref.load %arg3[%c39] : memref<72xf32, #tpu.memory_space<smem>>
    %416 = vector.broadcast %415 : f32 to vector<16x16xf32>
    %417 = arith.mulf %416, %25 : vector<16x16xf32>
    %418 = arith.addf %414, %417 : vector<16x16xf32>
    %c47 = arith.constant 47 : index
    %419 = memref.load %arg3[%c47] : memref<72xf32, #tpu.memory_space<smem>>
    %420 = vector.broadcast %419 : f32 to vector<16x16xf32>
    %421 = arith.mulf %420, %27 : vector<16x16xf32>
    %422 = arith.addf %418, %421 : vector<16x16xf32>
    %c55 = arith.constant 55 : index
    %423 = memref.load %arg3[%c55] : memref<72xf32, #tpu.memory_space<smem>>
    %424 = vector.broadcast %423 : f32 to vector<16x16xf32>
    %425 = arith.mulf %424, %29 : vector<16x16xf32>
    %426 = arith.addf %422, %425 : vector<16x16xf32>
    %c63 = arith.constant 63 : index
    %427 = memref.load %arg3[%c63] : memref<72xf32, #tpu.memory_space<smem>>
    %428 = vector.broadcast %427 : f32 to vector<16x16xf32>
    %429 = arith.mulf %428, %31 : vector<16x16xf32>
    %430 = arith.addf %426, %429 : vector<16x16xf32>
    %c71 = arith.constant 71 : index
    %431 = memref.load %arg3[%c71] : memref<72xf32, #tpu.memory_space<smem>>
    %432 = vector.broadcast %431 : f32 to vector<16x16xf32>
    %433 = arith.mulf %432, %33 : vector<16x16xf32>
    %434 = arith.addf %430, %433 : vector<16x16xf32>
    %435 = vector.broadcast %3 : f32 to vector<16x16xf32>
    %436 = arith.mulf %435, %434 : vector<16x16xf32>
    %c8_i32_79 = arith.constant 8 : i32
    %437 = arith.muli %arg0, %c8_i32_79 : i32
    %c7_i32 = arith.constant 7 : i32
    %438 = arith.addi %437, %c7_i32 : i32
    %439 = arith.index_cast %438 : i32 to index
    %440 = memref.load %arg2[%439] : memref<16xf32, #tpu.memory_space<smem>>
    %441 = vector.broadcast %440 : f32 to vector<16x16xf32>
    %442 = arith.addf %436, %441 : vector<16x16xf32>
    %cst_80 = arith.constant 0.000000e+00 : f32
    %443 = vector.broadcast %cst_80 : f32 to vector<16x16xf32>
    %444 = arith.subf %443, %442 : vector<16x16xf32>
    %445 = math.exp %444 : vector<16x16xf32>
    %cst_81 = arith.constant 1.000000e+00 : f32
    %446 = vector.broadcast %cst_81 : f32 to vector<16x16xf32>
    %447 = arith.addf %446, %445 : vector<16x16xf32>
    %448 = arith.divf %442, %447 : vector<16x16xf32>
    %c7_82 = arith.constant 7 : index
    %c1_83 = arith.constant 1 : index
    %c1_84 = arith.constant 1 : index
    %449 = vector.load %arg7[%c7_82, %c1_83, %c1_84] : memref<8x18x18xf32, #tpu.memory_space<vmem>>, vector<1x16x16xf32>
    %450 = vector.shape_cast %449 : vector<1x16x16xf32> to vector<16x16xf32>
    %451 = vector.shape_cast %448 : vector<16x16xf32> to vector<1x16x16xf32>
    tpu.vector_store %arg7[%c7_82, %c1_83, %c1_84], %451 {strides = array<i32>} : memref<8x18x18xf32, #tpu.memory_space<vmem>>, vector<1x16x16xf32>,
    %cst_85 = arith.constant 0.000000e+00 : f32
    %452 = vector.broadcast %cst_85 : f32 to vector<16x16xf32>
    %c0_86 = arith.constant 0 : index
    %453 = memref.load %arg4[%c0_86] : memref<72xf32, #tpu.memory_space<smem>>
    %c0_87 = arith.constant 0 : index
    %c0_88 = arith.constant 0 : index
    %c0_89 = arith.constant 0 : index
    %454 = vector.load %arg7[%c0_87, %c0_88, %c0_89] : memref<8x18x18xf32, #tpu.memory_space<vmem>>, vector<1x16x16xf32>
    %455 = vector.shape_cast %454 : vector<1x16x16xf32> to vector<16x16xf32>
    %456 = vector.broadcast %453 : f32 to vector<16x16xf32>
    %457 = arith.mulf %456, %455 : vector<16x16xf32>
    %458 = arith.addf %452, %457 : vector<16x16xf32>
    %c1_90 = arith.constant 1 : index
    %459 = memref.load %arg4[%c1_90] : memref<72xf32, #tpu.memory_space<smem>>
    %c1_91 = arith.constant 1 : index
    %c0_92 = arith.constant 0 : index
    %c0_93 = arith.constant 0 : index
    %460 = vector.load %arg7[%c1_91, %c0_92, %c0_93] : memref<8x18x18xf32, #tpu.memory_space<vmem>>, vector<1x16x16xf32>
    %461 = vector.shape_cast %460 : vector<1x16x16xf32> to vector<16x16xf32>
    %462 = vector.broadcast %459 : f32 to vector<16x16xf32>
    %463 = arith.mulf %462, %461 : vector<16x16xf32>
    %464 = arith.addf %458, %463 : vector<16x16xf32>
    %c2_94 = arith.constant 2 : index
    %465 = memref.load %arg4[%c2_94] : memref<72xf32, #tpu.memory_space<smem>>
    %c2_95 = arith.constant 2 : index
    %c0_96 = arith.constant 0 : index
    %c0_97 = arith.constant 0 : index
    %466 = vector.load %arg7[%c2_95, %c0_96, %c0_97] : memref<8x18x18xf32, #tpu.memory_space<vmem>>, vector<1x16x16xf32>
    %467 = vector.shape_cast %466 : vector<1x16x16xf32> to vector<16x16xf32>
    %468 = vector.broadcast %465 : f32 to vector<16x16xf32>
    %469 = arith.mulf %468, %467 : vector<16x16xf32>
    %470 = arith.addf %464, %469 : vector<16x16xf32>
    %c3_98 = arith.constant 3 : index
    %471 = memref.load %arg4[%c3_98] : memref<72xf32, #tpu.memory_space<smem>>
    %c3_99 = arith.constant 3 : index
    %c0_100 = arith.constant 0 : index
    %c0_101 = arith.constant 0 : index
    %472 = vector.load %arg7[%c3_99, %c0_100, %c0_101] : memref<8x18x18xf32, #tpu.memory_space<vmem>>, vector<1x16x16xf32>
    %473 = vector.shape_cast %472 : vector<1x16x16xf32> to vector<16x16xf32>
    %474 = vector.broadcast %471 : f32 to vector<16x16xf32>
    %475 = arith.mulf %474, %473 : vector<16x16xf32>
    %476 = arith.addf %470, %475 : vector<16x16xf32>
    %c4_102 = arith.constant 4 : index
    %477 = memref.load %arg4[%c4_102] : memref<72xf32, #tpu.memory_space<smem>>
    %c4_103 = arith.constant 4 : index
    %c0_104 = arith.constant 0 : index
    %c0_105 = arith.constant 0 : index
    %478 = vector.load %arg7[%c4_103, %c0_104, %c0_105] : memref<8x18x18xf32, #tpu.memory_space<vmem>>, vector<1x16x16xf32>
    %479 = vector.shape_cast %478 : vector<1x16x16xf32> to vector<16x16xf32>
    %480 = vector.broadcast %477 : f32 to vector<16x16xf32>
    %481 = arith.mulf %480, %479 : vector<16x16xf32>
    %482 = arith.addf %476, %481 : vector<16x16xf32>
    %c5_106 = arith.constant 5 : index
    %483 = memref.load %arg4[%c5_106] : memref<72xf32, #tpu.memory_space<smem>>
    %c5_107 = arith.constant 5 : index
    %c0_108 = arith.constant 0 : index
    %c0_109 = arith.constant 0 : index
    %484 = vector.load %arg7[%c5_107, %c0_108, %c0_109] : memref<8x18x18xf32, #tpu.memory_space<vmem>>, vector<1x16x16xf32>
    %485 = vector.shape_cast %484 : vector<1x16x16xf32> to vector<16x16xf32>
    %486 = vector.broadcast %483 : f32 to vector<16x16xf32>
    %487 = arith.mulf %486, %485 : vector<16x16xf32>
    %488 = arith.addf %482, %487 : vector<16x16xf32>
    %c6_110 = arith.constant 6 : index
    %489 = memref.load %arg4[%c6_110] : memref<72xf32, #tpu.memory_space<smem>>
    %c6_111 = arith.constant 6 : index
    %c0_112 = arith.constant 0 : index
    %c0_113 = arith.constant 0 : index
    %490 = vector.load %arg7[%c6_111, %c0_112, %c0_113] : memref<8x18x18xf32, #tpu.memory_space<vmem>>, vector<1x16x16xf32>
    %491 = vector.shape_cast %490 : vector<1x16x16xf32> to vector<16x16xf32>
    %492 = vector.broadcast %489 : f32 to vector<16x16xf32>
    %493 = arith.mulf %492, %491 : vector<16x16xf32>
    %494 = arith.addf %488, %493 : vector<16x16xf32>
    %c7_114 = arith.constant 7 : index
    %495 = memref.load %arg4[%c7_114] : memref<72xf32, #tpu.memory_space<smem>>
    %c7_115 = arith.constant 7 : index
    %c0_116 = arith.constant 0 : index
    %c0_117 = arith.constant 0 : index
    %496 = vector.load %arg7[%c7_115, %c0_116, %c0_117] : memref<8x18x18xf32, #tpu.memory_space<vmem>>, vector<1x16x16xf32>
    %497 = vector.shape_cast %496 : vector<1x16x16xf32> to vector<16x16xf32>
    %498 = vector.broadcast %495 : f32 to vector<16x16xf32>
    %499 = arith.mulf %498, %497 : vector<16x16xf32>
    %500 = arith.addf %494, %499 : vector<16x16xf32>
    %c8_118 = arith.constant 8 : index
    %501 = memref.load %arg4[%c8_118] : memref<72xf32, #tpu.memory_space<smem>>
    %c0_119 = arith.constant 0 : index
    %c0_120 = arith.constant 0 : index
    %c1_121 = arith.constant 1 : index
    %502 = vector.load %arg7[%c0_119, %c0_120, %c1_121] : memref<8x18x18xf32, #tpu.memory_space<vmem>>, vector<1x16x16xf32>
    %503 = vector.shape_cast %502 : vector<1x16x16xf32> to vector<16x16xf32>
    %504 = vector.broadcast %501 : f32 to vector<16x16xf32>
    %505 = arith.mulf %504, %503 : vector<16x16xf32>
    %506 = arith.addf %500, %505 : vector<16x16xf32>
    %c9_122 = arith.constant 9 : index
    %507 = memref.load %arg4[%c9_122] : memref<72xf32, #tpu.memory_space<smem>>
    %c1_123 = arith.constant 1 : index
    %c0_124 = arith.constant 0 : index
    %c1_125 = arith.constant 1 : index
    %508 = vector.load %arg7[%c1_123, %c0_124, %c1_125] : memref<8x18x18xf32, #tpu.memory_space<vmem>>, vector<1x16x16xf32>
    %509 = vector.shape_cast %508 : vector<1x16x16xf32> to vector<16x16xf32>
    %510 = vector.broadcast %507 : f32 to vector<16x16xf32>
    %511 = arith.mulf %510, %509 : vector<16x16xf32>
    %512 = arith.addf %506, %511 : vector<16x16xf32>
    %c10_126 = arith.constant 10 : index
    %513 = memref.load %arg4[%c10_126] : memref<72xf32, #tpu.memory_space<smem>>
    %c2_127 = arith.constant 2 : index
    %c0_128 = arith.constant 0 : index
    %c1_129 = arith.constant 1 : index
    %514 = vector.load %arg7[%c2_127, %c0_128, %c1_129] : memref<8x18x18xf32, #tpu.memory_space<vmem>>, vector<1x16x16xf32>
    %515 = vector.shape_cast %514 : vector<1x16x16xf32> to vector<16x16xf32>
    %516 = vector.broadcast %513 : f32 to vector<16x16xf32>
    %517 = arith.mulf %516, %515 : vector<16x16xf32>
    %518 = arith.addf %512, %517 : vector<16x16xf32>
    %c11_130 = arith.constant 11 : index
    %519 = memref.load %arg4[%c11_130] : memref<72xf32, #tpu.memory_space<smem>>
    %c3_131 = arith.constant 3 : index
    %c0_132 = arith.constant 0 : index
    %c1_133 = arith.constant 1 : index
    %520 = vector.load %arg7[%c3_131, %c0_132, %c1_133] : memref<8x18x18xf32, #tpu.memory_space<vmem>>, vector<1x16x16xf32>
    %521 = vector.shape_cast %520 : vector<1x16x16xf32> to vector<16x16xf32>
    %522 = vector.broadcast %519 : f32 to vector<16x16xf32>
    %523 = arith.mulf %522, %521 : vector<16x16xf32>
    %524 = arith.addf %518, %523 : vector<16x16xf32>
    %c12_134 = arith.constant 12 : index
    %525 = memref.load %arg4[%c12_134] : memref<72xf32, #tpu.memory_space<smem>>
    %c4_135 = arith.constant 4 : index
    %c0_136 = arith.constant 0 : index
    %c1_137 = arith.constant 1 : index
    %526 = vector.load %arg7[%c4_135, %c0_136, %c1_137] : memref<8x18x18xf32, #tpu.memory_space<vmem>>, vector<1x16x16xf32>
    %527 = vector.shape_cast %526 : vector<1x16x16xf32> to vector<16x16xf32>
    %528 = vector.broadcast %525 : f32 to vector<16x16xf32>
    %529 = arith.mulf %528, %527 : vector<16x16xf32>
    %530 = arith.addf %524, %529 : vector<16x16xf32>
    %c13_138 = arith.constant 13 : index
    %531 = memref.load %arg4[%c13_138] : memref<72xf32, #tpu.memory_space<smem>>
    %c5_139 = arith.constant 5 : index
    %c0_140 = arith.constant 0 : index
    %c1_141 = arith.constant 1 : index
    %532 = vector.load %arg7[%c5_139, %c0_140, %c1_141] : memref<8x18x18xf32, #tpu.memory_space<vmem>>, vector<1x16x16xf32>
    %533 = vector.shape_cast %532 : vector<1x16x16xf32> to vector<16x16xf32>
    %534 = vector.broadcast %531 : f32 to vector<16x16xf32>
    %535 = arith.mulf %534, %533 : vector<16x16xf32>
    %536 = arith.addf %530, %535 : vector<16x16xf32>
    %c14_142 = arith.constant 14 : index
    %537 = memref.load %arg4[%c14_142] : memref<72xf32, #tpu.memory_space<smem>>
    %c6_143 = arith.constant 6 : index
    %c0_144 = arith.constant 0 : index
    %c1_145 = arith.constant 1 : index
    %538 = vector.load %arg7[%c6_143, %c0_144, %c1_145] : memref<8x18x18xf32, #tpu.memory_space<vmem>>, vector<1x16x16xf32>
    %539 = vector.shape_cast %538 : vector<1x16x16xf32> to vector<16x16xf32>
    %540 = vector.broadcast %537 : f32 to vector<16x16xf32>
    %541 = arith.mulf %540, %539 : vector<16x16xf32>
    %542 = arith.addf %536, %541 : vector<16x16xf32>
    %c15_146 = arith.constant 15 : index
    %543 = memref.load %arg4[%c15_146] : memref<72xf32, #tpu.memory_space<smem>>
    %c7_147 = arith.constant 7 : index
    %c0_148 = arith.constant 0 : index
    %c1_149 = arith.constant 1 : index
    %544 = vector.load %arg7[%c7_147, %c0_148, %c1_149] : memref<8x18x18xf32, #tpu.memory_space<vmem>>, vector<1x16x16xf32>
    %545 = vector.shape_cast %544 : vector<1x16x16xf32> to vector<16x16xf32>
    %546 = vector.broadcast %543 : f32 to vector<16x16xf32>
    %547 = arith.mulf %546, %545 : vector<16x16xf32>
    %548 = arith.addf %542, %547 : vector<16x16xf32>
    %c16_150 = arith.constant 16 : index
    %549 = memref.load %arg4[%c16_150] : memref<72xf32, #tpu.memory_space<smem>>
    %c0_151 = arith.constant 0 : index
    %c0_152 = arith.constant 0 : index
    %c2_153 = arith.constant 2 : index
    %550 = vector.load %arg7[%c0_151, %c0_152, %c2_153] : memref<8x18x18xf32, #tpu.memory_space<vmem>>, vector<1x16x16xf32>
    %551 = vector.shape_cast %550 : vector<1x16x16xf32> to vector<16x16xf32>
    %552 = vector.broadcast %549 : f32 to vector<16x16xf32>
    %553 = arith.mulf %552, %551 : vector<16x16xf32>
    %554 = arith.addf %548, %553 : vector<16x16xf32>
    %c17_154 = arith.constant 17 : index
    %555 = memref.load %arg4[%c17_154] : memref<72xf32, #tpu.memory_space<smem>>
    %c1_155 = arith.constant 1 : index
    %c0_156 = arith.constant 0 : index
    %c2_157 = arith.constant 2 : index
    %556 = vector.load %arg7[%c1_155, %c0_156, %c2_157] : memref<8x18x18xf32, #tpu.memory_space<vmem>>, vector<1x16x16xf32>
    %557 = vector.shape_cast %556 : vector<1x16x16xf32> to vector<16x16xf32>
    %558 = vector.broadcast %555 : f32 to vector<16x16xf32>
    %559 = arith.mulf %558, %557 : vector<16x16xf32>
    %560 = arith.addf %554, %559 : vector<16x16xf32>
    %c18_158 = arith.constant 18 : index
    %561 = memref.load %arg4[%c18_158] : memref<72xf32, #tpu.memory_space<smem>>
    %c2_159 = arith.constant 2 : index
    %c0_160 = arith.constant 0 : index
    %c2_161 = arith.constant 2 : index
    %562 = vector.load %arg7[%c2_159, %c0_160, %c2_161] : memref<8x18x18xf32, #tpu.memory_space<vmem>>, vector<1x16x16xf32>
    %563 = vector.shape_cast %562 : vector<1x16x16xf32> to vector<16x16xf32>
    %564 = vector.broadcast %561 : f32 to vector<16x16xf32>
    %565 = arith.mulf %564, %563 : vector<16x16xf32>
    %566 = arith.addf %560, %565 : vector<16x16xf32>
    %c19_162 = arith.constant 19 : index
    %567 = memref.load %arg4[%c19_162] : memref<72xf32, #tpu.memory_space<smem>>
    %c3_163 = arith.constant 3 : index
    %c0_164 = arith.constant 0 : index
    %c2_165 = arith.constant 2 : index
    %568 = vector.load %arg7[%c3_163, %c0_164, %c2_165] : memref<8x18x18xf32, #tpu.memory_space<vmem>>, vector<1x16x16xf32>
    %569 = vector.shape_cast %568 : vector<1x16x16xf32> to vector<16x16xf32>
    %570 = vector.broadcast %567 : f32 to vector<16x16xf32>
    %571 = arith.mulf %570, %569 : vector<16x16xf32>
    %572 = arith.addf %566, %571 : vector<16x16xf32>
    %c20_166 = arith.constant 20 : index
    %573 = memref.load %arg4[%c20_166] : memref<72xf32, #tpu.memory_space<smem>>
    %c4_167 = arith.constant 4 : index
    %c0_168 = arith.constant 0 : index
    %c2_169 = arith.constant 2 : index
    %574 = vector.load %arg7[%c4_167, %c0_168, %c2_169] : memref<8x18x18xf32, #tpu.memory_space<vmem>>, vector<1x16x16xf32>
    %575 = vector.shape_cast %574 : vector<1x16x16xf32> to vector<16x16xf32>
    %576 = vector.broadcast %573 : f32 to vector<16x16xf32>
    %577 = arith.mulf %576, %575 : vector<16x16xf32>
    %578 = arith.addf %572, %577 : vector<16x16xf32>
    %c21_170 = arith.constant 21 : index
    %579 = memref.load %arg4[%c21_170] : memref<72xf32, #tpu.memory_space<smem>>
    %c5_171 = arith.constant 5 : index
    %c0_172 = arith.constant 0 : index
    %c2_173 = arith.constant 2 : index
    %580 = vector.load %arg7[%c5_171, %c0_172, %c2_173] : memref<8x18x18xf32, #tpu.memory_space<vmem>>, vector<1x16x16xf32>
    %581 = vector.shape_cast %580 : vector<1x16x16xf32> to vector<16x16xf32>
    %582 = vector.broadcast %579 : f32 to vector<16x16xf32>
    %583 = arith.mulf %582, %581 : vector<16x16xf32>
    %584 = arith.addf %578, %583 : vector<16x16xf32>
    %c22_174 = arith.constant 22 : index
    %585 = memref.load %arg4[%c22_174] : memref<72xf32, #tpu.memory_space<smem>>
    %c6_175 = arith.constant 6 : index
    %c0_176 = arith.constant 0 : index
    %c2_177 = arith.constant 2 : index
    %586 = vector.load %arg7[%c6_175, %c0_176, %c2_177] : memref<8x18x18xf32, #tpu.memory_space<vmem>>, vector<1x16x16xf32>
    %587 = vector.shape_cast %586 : vector<1x16x16xf32> to vector<16x16xf32>
    %588 = vector.broadcast %585 : f32 to vector<16x16xf32>
    %589 = arith.mulf %588, %587 : vector<16x16xf32>
    %590 = arith.addf %584, %589 : vector<16x16xf32>
    %c23_178 = arith.constant 23 : index
    %591 = memref.load %arg4[%c23_178] : memref<72xf32, #tpu.memory_space<smem>>
    %c7_179 = arith.constant 7 : index
    %c0_180 = arith.constant 0 : index
    %c2_181 = arith.constant 2 : index
    %592 = vector.load %arg7[%c7_179, %c0_180, %c2_181] : memref<8x18x18xf32, #tpu.memory_space<vmem>>, vector<1x16x16xf32>
    %593 = vector.shape_cast %592 : vector<1x16x16xf32> to vector<16x16xf32>
    %594 = vector.broadcast %591 : f32 to vector<16x16xf32>
    %595 = arith.mulf %594, %593 : vector<16x16xf32>
    %596 = arith.addf %590, %595 : vector<16x16xf32>
    %c24_182 = arith.constant 24 : index
    %597 = memref.load %arg4[%c24_182] : memref<72xf32, #tpu.memory_space<smem>>
    %c0_183 = arith.constant 0 : index
    %c1_184 = arith.constant 1 : index
    %c0_185 = arith.constant 0 : index
    %598 = vector.load %arg7[%c0_183, %c1_184, %c0_185] : memref<8x18x18xf32, #tpu.memory_space<vmem>>, vector<1x16x16xf32>
    %599 = vector.shape_cast %598 : vector<1x16x16xf32> to vector<16x16xf32>
    %600 = vector.broadcast %597 : f32 to vector<16x16xf32>
    %601 = arith.mulf %600, %599 : vector<16x16xf32>
    %602 = arith.addf %596, %601 : vector<16x16xf32>
    %c25_186 = arith.constant 25 : index
    %603 = memref.load %arg4[%c25_186] : memref<72xf32, #tpu.memory_space<smem>>
    %c1_187 = arith.constant 1 : index
    %c1_188 = arith.constant 1 : index
    %c0_189 = arith.constant 0 : index
    %604 = vector.load %arg7[%c1_187, %c1_188, %c0_189] : memref<8x18x18xf32, #tpu.memory_space<vmem>>, vector<1x16x16xf32>
    %605 = vector.shape_cast %604 : vector<1x16x16xf32> to vector<16x16xf32>
    %606 = vector.broadcast %603 : f32 to vector<16x16xf32>
    %607 = arith.mulf %606, %605 : vector<16x16xf32>
    %608 = arith.addf %602, %607 : vector<16x16xf32>
    %c26_190 = arith.constant 26 : index
    %609 = memref.load %arg4[%c26_190] : memref<72xf32, #tpu.memory_space<smem>>
    %c2_191 = arith.constant 2 : index
    %c1_192 = arith.constant 1 : index
    %c0_193 = arith.constant 0 : index
    %610 = vector.load %arg7[%c2_191, %c1_192, %c0_193] : memref<8x18x18xf32, #tpu.memory_space<vmem>>, vector<1x16x16xf32>
    %611 = vector.shape_cast %610 : vector<1x16x16xf32> to vector<16x16xf32>
    %612 = vector.broadcast %609 : f32 to vector<16x16xf32>
    %613 = arith.mulf %612, %611 : vector<16x16xf32>
    %614 = arith.addf %608, %613 : vector<16x16xf32>
    %c27_194 = arith.constant 27 : index
    %615 = memref.load %arg4[%c27_194] : memref<72xf32, #tpu.memory_space<smem>>
    %c3_195 = arith.constant 3 : index
    %c1_196 = arith.constant 1 : index
    %c0_197 = arith.constant 0 : index
    %616 = vector.load %arg7[%c3_195, %c1_196, %c0_197] : memref<8x18x18xf32, #tpu.memory_space<vmem>>, vector<1x16x16xf32>
    %617 = vector.shape_cast %616 : vector<1x16x16xf32> to vector<16x16xf32>
    %618 = vector.broadcast %615 : f32 to vector<16x16xf32>
    %619 = arith.mulf %618, %617 : vector<16x16xf32>
    %620 = arith.addf %614, %619 : vector<16x16xf32>
    %c28_198 = arith.constant 28 : index
    %621 = memref.load %arg4[%c28_198] : memref<72xf32, #tpu.memory_space<smem>>
    %c4_199 = arith.constant 4 : index
    %c1_200 = arith.constant 1 : index
    %c0_201 = arith.constant 0 : index
    %622 = vector.load %arg7[%c4_199, %c1_200, %c0_201] : memref<8x18x18xf32, #tpu.memory_space<vmem>>, vector<1x16x16xf32>
    %623 = vector.shape_cast %622 : vector<1x16x16xf32> to vector<16x16xf32>
    %624 = vector.broadcast %621 : f32 to vector<16x16xf32>
    %625 = arith.mulf %624, %623 : vector<16x16xf32>
    %626 = arith.addf %620, %625 : vector<16x16xf32>
    %c29_202 = arith.constant 29 : index
    %627 = memref.load %arg4[%c29_202] : memref<72xf32, #tpu.memory_space<smem>>
    %c5_203 = arith.constant 5 : index
    %c1_204 = arith.constant 1 : index
    %c0_205 = arith.constant 0 : index
    %628 = vector.load %arg7[%c5_203, %c1_204, %c0_205] : memref<8x18x18xf32, #tpu.memory_space<vmem>>, vector<1x16x16xf32>
    %629 = vector.shape_cast %628 : vector<1x16x16xf32> to vector<16x16xf32>
    %630 = vector.broadcast %627 : f32 to vector<16x16xf32>
    %631 = arith.mulf %630, %629 : vector<16x16xf32>
    %632 = arith.addf %626, %631 : vector<16x16xf32>
    %c30_206 = arith.constant 30 : index
    %633 = memref.load %arg4[%c30_206] : memref<72xf32, #tpu.memory_space<smem>>
    %c6_207 = arith.constant 6 : index
    %c1_208 = arith.constant 1 : index
    %c0_209 = arith.constant 0 : index
    %634 = vector.load %arg7[%c6_207, %c1_208, %c0_209] : memref<8x18x18xf32, #tpu.memory_space<vmem>>, vector<1x16x16xf32>
    %635 = vector.shape_cast %634 : vector<1x16x16xf32> to vector<16x16xf32>
    %636 = vector.broadcast %633 : f32 to vector<16x16xf32>
    %637 = arith.mulf %636, %635 : vector<16x16xf32>
    %638 = arith.addf %632, %637 : vector<16x16xf32>
    %c31_210 = arith.constant 31 : index
    %639 = memref.load %arg4[%c31_210] : memref<72xf32, #tpu.memory_space<smem>>
    %c7_211 = arith.constant 7 : index
    %c1_212 = arith.constant 1 : index
    %c0_213 = arith.constant 0 : index
    %640 = vector.load %arg7[%c7_211, %c1_212, %c0_213] : memref<8x18x18xf32, #tpu.memory_space<vmem>>, vector<1x16x16xf32>
    %641 = vector.shape_cast %640 : vector<1x16x16xf32> to vector<16x16xf32>
    %642 = vector.broadcast %639 : f32 to vector<16x16xf32>
    %643 = arith.mulf %642, %641 : vector<16x16xf32>
    %644 = arith.addf %638, %643 : vector<16x16xf32>
    %c32_214 = arith.constant 32 : index
    %645 = memref.load %arg4[%c32_214] : memref<72xf32, #tpu.memory_space<smem>>
    %c0_215 = arith.constant 0 : index
    %c1_216 = arith.constant 1 : index
    %c1_217 = arith.constant 1 : index
    %646 = vector.load %arg7[%c0_215, %c1_216, %c1_217] : memref<8x18x18xf32, #tpu.memory_space<vmem>>, vector<1x16x16xf32>
    %647 = vector.shape_cast %646 : vector<1x16x16xf32> to vector<16x16xf32>
    %648 = vector.broadcast %645 : f32 to vector<16x16xf32>
    %649 = arith.mulf %648, %647 : vector<16x16xf32>
    %650 = arith.addf %644, %649 : vector<16x16xf32>
    %c33_218 = arith.constant 33 : index
    %651 = memref.load %arg4[%c33_218] : memref<72xf32, #tpu.memory_space<smem>>
    %c1_219 = arith.constant 1 : index
    %c1_220 = arith.constant 1 : index
    %c1_221 = arith.constant 1 : index
    %652 = vector.load %arg7[%c1_219, %c1_220, %c1_221] : memref<8x18x18xf32, #tpu.memory_space<vmem>>, vector<1x16x16xf32>
    %653 = vector.shape_cast %652 : vector<1x16x16xf32> to vector<16x16xf32>
    %654 = vector.broadcast %651 : f32 to vector<16x16xf32>
    %655 = arith.mulf %654, %653 : vector<16x16xf32>
    %656 = arith.addf %650, %655 : vector<16x16xf32>
    %c34_222 = arith.constant 34 : index
    %657 = memref.load %arg4[%c34_222] : memref<72xf32, #tpu.memory_space<smem>>
    %c2_223 = arith.constant 2 : index
    %c1_224 = arith.constant 1 : index
    %c1_225 = arith.constant 1 : index
    %658 = vector.load %arg7[%c2_223, %c1_224, %c1_225] : memref<8x18x18xf32, #tpu.memory_space<vmem>>, vector<1x16x16xf32>
    %659 = vector.shape_cast %658 : vector<1x16x16xf32> to vector<16x16xf32>
    %660 = vector.broadcast %657 : f32 to vector<16x16xf32>
    %661 = arith.mulf %660, %659 : vector<16x16xf32>
    %662 = arith.addf %656, %661 : vector<16x16xf32>
    %c35_226 = arith.constant 35 : index
    %663 = memref.load %arg4[%c35_226] : memref<72xf32, #tpu.memory_space<smem>>
    %c3_227 = arith.constant 3 : index
    %c1_228 = arith.constant 1 : index
    %c1_229 = arith.constant 1 : index
    %664 = vector.load %arg7[%c3_227, %c1_228, %c1_229] : memref<8x18x18xf32, #tpu.memory_space<vmem>>, vector<1x16x16xf32>
    %665 = vector.shape_cast %664 : vector<1x16x16xf32> to vector<16x16xf32>
    %666 = vector.broadcast %663 : f32 to vector<16x16xf32>
    %667 = arith.mulf %666, %665 : vector<16x16xf32>
    %668 = arith.addf %662, %667 : vector<16x16xf32>
    %c36_230 = arith.constant 36 : index
    %669 = memref.load %arg4[%c36_230] : memref<72xf32, #tpu.memory_space<smem>>
    %c4_231 = arith.constant 4 : index
    %c1_232 = arith.constant 1 : index
    %c1_233 = arith.constant 1 : index
    %670 = vector.load %arg7[%c4_231, %c1_232, %c1_233] : memref<8x18x18xf32, #tpu.memory_space<vmem>>, vector<1x16x16xf32>
    %671 = vector.shape_cast %670 : vector<1x16x16xf32> to vector<16x16xf32>
    %672 = vector.broadcast %669 : f32 to vector<16x16xf32>
    %673 = arith.mulf %672, %671 : vector<16x16xf32>
    %674 = arith.addf %668, %673 : vector<16x16xf32>
    %c37_234 = arith.constant 37 : index
    %675 = memref.load %arg4[%c37_234] : memref<72xf32, #tpu.memory_space<smem>>
    %c5_235 = arith.constant 5 : index
    %c1_236 = arith.constant 1 : index
    %c1_237 = arith.constant 1 : index
    %676 = vector.load %arg7[%c5_235, %c1_236, %c1_237] : memref<8x18x18xf32, #tpu.memory_space<vmem>>, vector<1x16x16xf32>
    %677 = vector.shape_cast %676 : vector<1x16x16xf32> to vector<16x16xf32>
    %678 = vector.broadcast %675 : f32 to vector<16x16xf32>
    %679 = arith.mulf %678, %677 : vector<16x16xf32>
    %680 = arith.addf %674, %679 : vector<16x16xf32>
    %c38_238 = arith.constant 38 : index
    %681 = memref.load %arg4[%c38_238] : memref<72xf32, #tpu.memory_space<smem>>
    %c6_239 = arith.constant 6 : index
    %c1_240 = arith.constant 1 : index
    %c1_241 = arith.constant 1 : index
    %682 = vector.load %arg7[%c6_239, %c1_240, %c1_241] : memref<8x18x18xf32, #tpu.memory_space<vmem>>, vector<1x16x16xf32>
    %683 = vector.shape_cast %682 : vector<1x16x16xf32> to vector<16x16xf32>
    %684 = vector.broadcast %681 : f32 to vector<16x16xf32>
    %685 = arith.mulf %684, %683 : vector<16x16xf32>
    %686 = arith.addf %680, %685 : vector<16x16xf32>
    %c39_242 = arith.constant 39 : index
    %687 = memref.load %arg4[%c39_242] : memref<72xf32, #tpu.memory_space<smem>>
    %c7_243 = arith.constant 7 : index
    %c1_244 = arith.constant 1 : index
    %c1_245 = arith.constant 1 : index
    %688 = vector.load %arg7[%c7_243, %c1_244, %c1_245] : memref<8x18x18xf32, #tpu.memory_space<vmem>>, vector<1x16x16xf32>
    %689 = vector.shape_cast %688 : vector<1x16x16xf32> to vector<16x16xf32>
    %690 = vector.broadcast %687 : f32 to vector<16x16xf32>
    %691 = arith.mulf %690, %689 : vector<16x16xf32>
    %692 = arith.addf %686, %691 : vector<16x16xf32>
    %c40_246 = arith.constant 40 : index
    %693 = memref.load %arg4[%c40_246] : memref<72xf32, #tpu.memory_space<smem>>
    %c0_247 = arith.constant 0 : index
    %c1_248 = arith.constant 1 : index
    %c2_249 = arith.constant 2 : index
    %694 = vector.load %arg7[%c0_247, %c1_248, %c2_249] : memref<8x18x18xf32, #tpu.memory_space<vmem>>, vector<1x16x16xf32>
    %695 = vector.shape_cast %694 : vector<1x16x16xf32> to vector<16x16xf32>
    %696 = vector.broadcast %693 : f32 to vector<16x16xf32>
    %697 = arith.mulf %696, %695 : vector<16x16xf32>
    %698 = arith.addf %692, %697 : vector<16x16xf32>
    %c41_250 = arith.constant 41 : index
    %699 = memref.load %arg4[%c41_250] : memref<72xf32, #tpu.memory_space<smem>>
    %c1_251 = arith.constant 1 : index
    %c1_252 = arith.constant 1 : index
    %c2_253 = arith.constant 2 : index
    %700 = vector.load %arg7[%c1_251, %c1_252, %c2_253] : memref<8x18x18xf32, #tpu.memory_space<vmem>>, vector<1x16x16xf32>
    %701 = vector.shape_cast %700 : vector<1x16x16xf32> to vector<16x16xf32>
    %702 = vector.broadcast %699 : f32 to vector<16x16xf32>
    %703 = arith.mulf %702, %701 : vector<16x16xf32>
    %704 = arith.addf %698, %703 : vector<16x16xf32>
    %c42_254 = arith.constant 42 : index
    %705 = memref.load %arg4[%c42_254] : memref<72xf32, #tpu.memory_space<smem>>
    %c2_255 = arith.constant 2 : index
    %c1_256 = arith.constant 1 : index
    %c2_257 = arith.constant 2 : index
    %706 = vector.load %arg7[%c2_255, %c1_256, %c2_257] : memref<8x18x18xf32, #tpu.memory_space<vmem>>, vector<1x16x16xf32>
    %707 = vector.shape_cast %706 : vector<1x16x16xf32> to vector<16x16xf32>
    %708 = vector.broadcast %705 : f32 to vector<16x16xf32>
    %709 = arith.mulf %708, %707 : vector<16x16xf32>
    %710 = arith.addf %704, %709 : vector<16x16xf32>
    %c43_258 = arith.constant 43 : index
    %711 = memref.load %arg4[%c43_258] : memref<72xf32, #tpu.memory_space<smem>>
    %c3_259 = arith.constant 3 : index
    %c1_260 = arith.constant 1 : index
    %c2_261 = arith.constant 2 : index
    %712 = vector.load %arg7[%c3_259, %c1_260, %c2_261] : memref<8x18x18xf32, #tpu.memory_space<vmem>>, vector<1x16x16xf32>
    %713 = vector.shape_cast %712 : vector<1x16x16xf32> to vector<16x16xf32>
    %714 = vector.broadcast %711 : f32 to vector<16x16xf32>
    %715 = arith.mulf %714, %713 : vector<16x16xf32>
    %716 = arith.addf %710, %715 : vector<16x16xf32>
    %c44_262 = arith.constant 44 : index
    %717 = memref.load %arg4[%c44_262] : memref<72xf32, #tpu.memory_space<smem>>
    %c4_263 = arith.constant 4 : index
    %c1_264 = arith.constant 1 : index
    %c2_265 = arith.constant 2 : index
    %718 = vector.load %arg7[%c4_263, %c1_264, %c2_265] : memref<8x18x18xf32, #tpu.memory_space<vmem>>, vector<1x16x16xf32>
    %719 = vector.shape_cast %718 : vector<1x16x16xf32> to vector<16x16xf32>
    %720 = vector.broadcast %717 : f32 to vector<16x16xf32>
    %721 = arith.mulf %720, %719 : vector<16x16xf32>
    %722 = arith.addf %716, %721 : vector<16x16xf32>
    %c45_266 = arith.constant 45 : index
    %723 = memref.load %arg4[%c45_266] : memref<72xf32, #tpu.memory_space<smem>>
    %c5_267 = arith.constant 5 : index
    %c1_268 = arith.constant 1 : index
    %c2_269 = arith.constant 2 : index
    %724 = vector.load %arg7[%c5_267, %c1_268, %c2_269] : memref<8x18x18xf32, #tpu.memory_space<vmem>>, vector<1x16x16xf32>
    %725 = vector.shape_cast %724 : vector<1x16x16xf32> to vector<16x16xf32>
    %726 = vector.broadcast %723 : f32 to vector<16x16xf32>
    %727 = arith.mulf %726, %725 : vector<16x16xf32>
    %728 = arith.addf %722, %727 : vector<16x16xf32>
    %c46_270 = arith.constant 46 : index
    %729 = memref.load %arg4[%c46_270] : memref<72xf32, #tpu.memory_space<smem>>
    %c6_271 = arith.constant 6 : index
    %c1_272 = arith.constant 1 : index
    %c2_273 = arith.constant 2 : index
    %730 = vector.load %arg7[%c6_271, %c1_272, %c2_273] : memref<8x18x18xf32, #tpu.memory_space<vmem>>, vector<1x16x16xf32>
    %731 = vector.shape_cast %730 : vector<1x16x16xf32> to vector<16x16xf32>
    %732 = vector.broadcast %729 : f32 to vector<16x16xf32>
    %733 = arith.mulf %732, %731 : vector<16x16xf32>
    %734 = arith.addf %728, %733 : vector<16x16xf32>
    %c47_274 = arith.constant 47 : index
    %735 = memref.load %arg4[%c47_274] : memref<72xf32, #tpu.memory_space<smem>>
    %c7_275 = arith.constant 7 : index
    %c1_276 = arith.constant 1 : index
    %c2_277 = arith.constant 2 : index
    %736 = vector.load %arg7[%c7_275, %c1_276, %c2_277] : memref<8x18x18xf32, #tpu.memory_space<vmem>>, vector<1x16x16xf32>
    %737 = vector.shape_cast %736 : vector<1x16x16xf32> to vector<16x16xf32>
    %738 = vector.broadcast %735 : f32 to vector<16x16xf32>
    %739 = arith.mulf %738, %737 : vector<16x16xf32>
    %740 = arith.addf %734, %739 : vector<16x16xf32>
    %c48_278 = arith.constant 48 : index
    %741 = memref.load %arg4[%c48_278] : memref<72xf32, #tpu.memory_space<smem>>
    %c0_279 = arith.constant 0 : index
    %c2_280 = arith.constant 2 : index
    %c0_281 = arith.constant 0 : index
    %742 = vector.load %arg7[%c0_279, %c2_280, %c0_281] : memref<8x18x18xf32, #tpu.memory_space<vmem>>, vector<1x16x16xf32>
    %743 = vector.shape_cast %742 : vector<1x16x16xf32> to vector<16x16xf32>
    %744 = vector.broadcast %741 : f32 to vector<16x16xf32>
    %745 = arith.mulf %744, %743 : vector<16x16xf32>
    %746 = arith.addf %740, %745 : vector<16x16xf32>
    %c49_282 = arith.constant 49 : index
    %747 = memref.load %arg4[%c49_282] : memref<72xf32, #tpu.memory_space<smem>>
    %c1_283 = arith.constant 1 : index
    %c2_284 = arith.constant 2 : index
    %c0_285 = arith.constant 0 : index
    %748 = vector.load %arg7[%c1_283, %c2_284, %c0_285] : memref<8x18x18xf32, #tpu.memory_space<vmem>>, vector<1x16x16xf32>
    %749 = vector.shape_cast %748 : vector<1x16x16xf32> to vector<16x16xf32>
    %750 = vector.broadcast %747 : f32 to vector<16x16xf32>
    %751 = arith.mulf %750, %749 : vector<16x16xf32>
    %752 = arith.addf %746, %751 : vector<16x16xf32>
    %c50_286 = arith.constant 50 : index
    %753 = memref.load %arg4[%c50_286] : memref<72xf32, #tpu.memory_space<smem>>
    %c2_287 = arith.constant 2 : index
    %c2_288 = arith.constant 2 : index
    %c0_289 = arith.constant 0 : index
    %754 = vector.load %arg7[%c2_287, %c2_288, %c0_289] : memref<8x18x18xf32, #tpu.memory_space<vmem>>, vector<1x16x16xf32>
    %755 = vector.shape_cast %754 : vector<1x16x16xf32> to vector<16x16xf32>
    %756 = vector.broadcast %753 : f32 to vector<16x16xf32>
    %757 = arith.mulf %756, %755 : vector<16x16xf32>
    %758 = arith.addf %752, %757 : vector<16x16xf32>
    %c51_290 = arith.constant 51 : index
    %759 = memref.load %arg4[%c51_290] : memref<72xf32, #tpu.memory_space<smem>>
    %c3_291 = arith.constant 3 : index
    %c2_292 = arith.constant 2 : index
    %c0_293 = arith.constant 0 : index
    %760 = vector.load %arg7[%c3_291, %c2_292, %c0_293] : memref<8x18x18xf32, #tpu.memory_space<vmem>>, vector<1x16x16xf32>
    %761 = vector.shape_cast %760 : vector<1x16x16xf32> to vector<16x16xf32>
    %762 = vector.broadcast %759 : f32 to vector<16x16xf32>
    %763 = arith.mulf %762, %761 : vector<16x16xf32>
    %764 = arith.addf %758, %763 : vector<16x16xf32>
    %c52_294 = arith.constant 52 : index
    %765 = memref.load %arg4[%c52_294] : memref<72xf32, #tpu.memory_space<smem>>
    %c4_295 = arith.constant 4 : index
    %c2_296 = arith.constant 2 : index
    %c0_297 = arith.constant 0 : index
    %766 = vector.load %arg7[%c4_295, %c2_296, %c0_297] : memref<8x18x18xf32, #tpu.memory_space<vmem>>, vector<1x16x16xf32>
    %767 = vector.shape_cast %766 : vector<1x16x16xf32> to vector<16x16xf32>
    %768 = vector.broadcast %765 : f32 to vector<16x16xf32>
    %769 = arith.mulf %768, %767 : vector<16x16xf32>
    %770 = arith.addf %764, %769 : vector<16x16xf32>
    %c53_298 = arith.constant 53 : index
    %771 = memref.load %arg4[%c53_298] : memref<72xf32, #tpu.memory_space<smem>>
    %c5_299 = arith.constant 5 : index
    %c2_300 = arith.constant 2 : index
    %c0_301 = arith.constant 0 : index
    %772 = vector.load %arg7[%c5_299, %c2_300, %c0_301] : memref<8x18x18xf32, #tpu.memory_space<vmem>>, vector<1x16x16xf32>
    %773 = vector.shape_cast %772 : vector<1x16x16xf32> to vector<16x16xf32>
    %774 = vector.broadcast %771 : f32 to vector<16x16xf32>
    %775 = arith.mulf %774, %773 : vector<16x16xf32>
    %776 = arith.addf %770, %775 : vector<16x16xf32>
    %c54_302 = arith.constant 54 : index
    %777 = memref.load %arg4[%c54_302] : memref<72xf32, #tpu.memory_space<smem>>
    %c6_303 = arith.constant 6 : index
    %c2_304 = arith.constant 2 : index
    %c0_305 = arith.constant 0 : index
    %778 = vector.load %arg7[%c6_303, %c2_304, %c0_305] : memref<8x18x18xf32, #tpu.memory_space<vmem>>, vector<1x16x16xf32>
    %779 = vector.shape_cast %778 : vector<1x16x16xf32> to vector<16x16xf32>
    %780 = vector.broadcast %777 : f32 to vector<16x16xf32>
    %781 = arith.mulf %780, %779 : vector<16x16xf32>
    %782 = arith.addf %776, %781 : vector<16x16xf32>
    %c55_306 = arith.constant 55 : index
    %783 = memref.load %arg4[%c55_306] : memref<72xf32, #tpu.memory_space<smem>>
    %c7_307 = arith.constant 7 : index
    %c2_308 = arith.constant 2 : index
    %c0_309 = arith.constant 0 : index
    %784 = vector.load %arg7[%c7_307, %c2_308, %c0_309] : memref<8x18x18xf32, #tpu.memory_space<vmem>>, vector<1x16x16xf32>
    %785 = vector.shape_cast %784 : vector<1x16x16xf32> to vector<16x16xf32>
    %786 = vector.broadcast %783 : f32 to vector<16x16xf32>
    %787 = arith.mulf %786, %785 : vector<16x16xf32>
    %788 = arith.addf %782, %787 : vector<16x16xf32>
    %c56_310 = arith.constant 56 : index
    %789 = memref.load %arg4[%c56_310] : memref<72xf32, #tpu.memory_space<smem>>
    %c0_311 = arith.constant 0 : index
    %c2_312 = arith.constant 2 : index
    %c1_313 = arith.constant 1 : index
    %790 = vector.load %arg7[%c0_311, %c2_312, %c1_313] : memref<8x18x18xf32, #tpu.memory_space<vmem>>, vector<1x16x16xf32>
    %791 = vector.shape_cast %790 : vector<1x16x16xf32> to vector<16x16xf32>
    %792 = vector.broadcast %789 : f32 to vector<16x16xf32>
    %793 = arith.mulf %792, %791 : vector<16x16xf32>
    %794 = arith.addf %788, %793 : vector<16x16xf32>
    %c57_314 = arith.constant 57 : index
    %795 = memref.load %arg4[%c57_314] : memref<72xf32, #tpu.memory_space<smem>>
    %c1_315 = arith.constant 1 : index
    %c2_316 = arith.constant 2 : index
    %c1_317 = arith.constant 1 : index
    %796 = vector.load %arg7[%c1_315, %c2_316, %c1_317] : memref<8x18x18xf32, #tpu.memory_space<vmem>>, vector<1x16x16xf32>
    %797 = vector.shape_cast %796 : vector<1x16x16xf32> to vector<16x16xf32>
    %798 = vector.broadcast %795 : f32 to vector<16x16xf32>
    %799 = arith.mulf %798, %797 : vector<16x16xf32>
    %800 = arith.addf %794, %799 : vector<16x16xf32>
    %c58_318 = arith.constant 58 : index
    %801 = memref.load %arg4[%c58_318] : memref<72xf32, #tpu.memory_space<smem>>
    %c2_319 = arith.constant 2 : index
    %c2_320 = arith.constant 2 : index
    %c1_321 = arith.constant 1 : index
    %802 = vector.load %arg7[%c2_319, %c2_320, %c1_321] : memref<8x18x18xf32, #tpu.memory_space<vmem>>, vector<1x16x16xf32>
    %803 = vector.shape_cast %802 : vector<1x16x16xf32> to vector<16x16xf32>
    %804 = vector.broadcast %801 : f32 to vector<16x16xf32>
    %805 = arith.mulf %804, %803 : vector<16x16xf32>
    %806 = arith.addf %800, %805 : vector<16x16xf32>
    %c59_322 = arith.constant 59 : index
    %807 = memref.load %arg4[%c59_322] : memref<72xf32, #tpu.memory_space<smem>>
    %c3_323 = arith.constant 3 : index
    %c2_324 = arith.constant 2 : index
    %c1_325 = arith.constant 1 : index
    %808 = vector.load %arg7[%c3_323, %c2_324, %c1_325] : memref<8x18x18xf32, #tpu.memory_space<vmem>>, vector<1x16x16xf32>
    %809 = vector.shape_cast %808 : vector<1x16x16xf32> to vector<16x16xf32>
    %810 = vector.broadcast %807 : f32 to vector<16x16xf32>
    %811 = arith.mulf %810, %809 : vector<16x16xf32>
    %812 = arith.addf %806, %811 : vector<16x16xf32>
    %c60_326 = arith.constant 60 : index
    %813 = memref.load %arg4[%c60_326] : memref<72xf32, #tpu.memory_space<smem>>
    %c4_327 = arith.constant 4 : index
    %c2_328 = arith.constant 2 : index
    %c1_329 = arith.constant 1 : index
    %814 = vector.load %arg7[%c4_327, %c2_328, %c1_329] : memref<8x18x18xf32, #tpu.memory_space<vmem>>, vector<1x16x16xf32>
    %815 = vector.shape_cast %814 : vector<1x16x16xf32> to vector<16x16xf32>
    %816 = vector.broadcast %813 : f32 to vector<16x16xf32>
    %817 = arith.mulf %816, %815 : vector<16x16xf32>
    %818 = arith.addf %812, %817 : vector<16x16xf32>
    %c61_330 = arith.constant 61 : index
    %819 = memref.load %arg4[%c61_330] : memref<72xf32, #tpu.memory_space<smem>>
    %c5_331 = arith.constant 5 : index
    %c2_332 = arith.constant 2 : index
    %c1_333 = arith.constant 1 : index
    %820 = vector.load %arg7[%c5_331, %c2_332, %c1_333] : memref<8x18x18xf32, #tpu.memory_space<vmem>>, vector<1x16x16xf32>
    %821 = vector.shape_cast %820 : vector<1x16x16xf32> to vector<16x16xf32>
    %822 = vector.broadcast %819 : f32 to vector<16x16xf32>
    %823 = arith.mulf %822, %821 : vector<16x16xf32>
    %824 = arith.addf %818, %823 : vector<16x16xf32>
    %c62_334 = arith.constant 62 : index
    %825 = memref.load %arg4[%c62_334] : memref<72xf32, #tpu.memory_space<smem>>
    %c6_335 = arith.constant 6 : index
    %c2_336 = arith.constant 2 : index
    %c1_337 = arith.constant 1 : index
    %826 = vector.load %arg7[%c6_335, %c2_336, %c1_337] : memref<8x18x18xf32, #tpu.memory_space<vmem>>, vector<1x16x16xf32>
    %827 = vector.shape_cast %826 : vector<1x16x16xf32> to vector<16x16xf32>
    %828 = vector.broadcast %825 : f32 to vector<16x16xf32>
    %829 = arith.mulf %828, %827 : vector<16x16xf32>
    %830 = arith.addf %824, %829 : vector<16x16xf32>
    %c63_338 = arith.constant 63 : index
    %831 = memref.load %arg4[%c63_338] : memref<72xf32, #tpu.memory_space<smem>>
    %c7_339 = arith.constant 7 : index
    %c2_340 = arith.constant 2 : index
    %c1_341 = arith.constant 1 : index
    %832 = vector.load %arg7[%c7_339, %c2_340, %c1_341] : memref<8x18x18xf32, #tpu.memory_space<vmem>>, vector<1x16x16xf32>
    %833 = vector.shape_cast %832 : vector<1x16x16xf32> to vector<16x16xf32>
    %834 = vector.broadcast %831 : f32 to vector<16x16xf32>
    %835 = arith.mulf %834, %833 : vector<16x16xf32>
    %836 = arith.addf %830, %835 : vector<16x16xf32>
    %c64_342 = arith.constant 64 : index
    %837 = memref.load %arg4[%c64_342] : memref<72xf32, #tpu.memory_space<smem>>
    %c0_343 = arith.constant 0 : index
    %c2_344 = arith.constant 2 : index
    %c2_345 = arith.constant 2 : index
    %838 = vector.load %arg7[%c0_343, %c2_344, %c2_345] : memref<8x18x18xf32, #tpu.memory_space<vmem>>, vector<1x16x16xf32>
    %839 = vector.shape_cast %838 : vector<1x16x16xf32> to vector<16x16xf32>
    %840 = vector.broadcast %837 : f32 to vector<16x16xf32>
    %841 = arith.mulf %840, %839 : vector<16x16xf32>
    %842 = arith.addf %836, %841 : vector<16x16xf32>
    %c65_346 = arith.constant 65 : index
    %843 = memref.load %arg4[%c65_346] : memref<72xf32, #tpu.memory_space<smem>>
    %c1_347 = arith.constant 1 : index
    %c2_348 = arith.constant 2 : index
    %c2_349 = arith.constant 2 : index
    %844 = vector.load %arg7[%c1_347, %c2_348, %c2_349] : memref<8x18x18xf32, #tpu.memory_space<vmem>>, vector<1x16x16xf32>
    %845 = vector.shape_cast %844 : vector<1x16x16xf32> to vector<16x16xf32>
    %846 = vector.broadcast %843 : f32 to vector<16x16xf32>
    %847 = arith.mulf %846, %845 : vector<16x16xf32>
    %848 = arith.addf %842, %847 : vector<16x16xf32>
    %c66_350 = arith.constant 66 : index
    %849 = memref.load %arg4[%c66_350] : memref<72xf32, #tpu.memory_space<smem>>
    %c2_351 = arith.constant 2 : index
    %c2_352 = arith.constant 2 : index
    %c2_353 = arith.constant 2 : index
    %850 = vector.load %arg7[%c2_351, %c2_352, %c2_353] : memref<8x18x18xf32, #tpu.memory_space<vmem>>, vector<1x16x16xf32>
    %851 = vector.shape_cast %850 : vector<1x16x16xf32> to vector<16x16xf32>
    %852 = vector.broadcast %849 : f32 to vector<16x16xf32>
    %853 = arith.mulf %852, %851 : vector<16x16xf32>
    %854 = arith.addf %848, %853 : vector<16x16xf32>
    %c67_354 = arith.constant 67 : index
    %855 = memref.load %arg4[%c67_354] : memref<72xf32, #tpu.memory_space<smem>>
    %c3_355 = arith.constant 3 : index
    %c2_356 = arith.constant 2 : index
    %c2_357 = arith.constant 2 : index
    %856 = vector.load %arg7[%c3_355, %c2_356, %c2_357] : memref<8x18x18xf32, #tpu.memory_space<vmem>>, vector<1x16x16xf32>
    %857 = vector.shape_cast %856 : vector<1x16x16xf32> to vector<16x16xf32>
    %858 = vector.broadcast %855 : f32 to vector<16x16xf32>
    %859 = arith.mulf %858, %857 : vector<16x16xf32>
    %860 = arith.addf %854, %859 : vector<16x16xf32>
    %c68_358 = arith.constant 68 : index
    %861 = memref.load %arg4[%c68_358] : memref<72xf32, #tpu.memory_space<smem>>
    %c4_359 = arith.constant 4 : index
    %c2_360 = arith.constant 2 : index
    %c2_361 = arith.constant 2 : index
    %862 = vector.load %arg7[%c4_359, %c2_360, %c2_361] : memref<8x18x18xf32, #tpu.memory_space<vmem>>, vector<1x16x16xf32>
    %863 = vector.shape_cast %862 : vector<1x16x16xf32> to vector<16x16xf32>
    %864 = vector.broadcast %861 : f32 to vector<16x16xf32>
    %865 = arith.mulf %864, %863 : vector<16x16xf32>
    %866 = arith.addf %860, %865 : vector<16x16xf32>
    %c69_362 = arith.constant 69 : index
    %867 = memref.load %arg4[%c69_362] : memref<72xf32, #tpu.memory_space<smem>>
    %c5_363 = arith.constant 5 : index
    %c2_364 = arith.constant 2 : index
    %c2_365 = arith.constant 2 : index
    %868 = vector.load %arg7[%c5_363, %c2_364, %c2_365] : memref<8x18x18xf32, #tpu.memory_space<vmem>>, vector<1x16x16xf32>
    %869 = vector.shape_cast %868 : vector<1x16x16xf32> to vector<16x16xf32>
    %870 = vector.broadcast %867 : f32 to vector<16x16xf32>
    %871 = arith.mulf %870, %869 : vector<16x16xf32>
    %872 = arith.addf %866, %871 : vector<16x16xf32>
    %c70_366 = arith.constant 70 : index
    %873 = memref.load %arg4[%c70_366] : memref<72xf32, #tpu.memory_space<smem>>
    %c6_367 = arith.constant 6 : index
    %c2_368 = arith.constant 2 : index
    %c2_369 = arith.constant 2 : index
    %874 = vector.load %arg7[%c6_367, %c2_368, %c2_369] : memref<8x18x18xf32, #tpu.memory_space<vmem>>, vector<1x16x16xf32>
    %875 = vector.shape_cast %874 : vector<1x16x16xf32> to vector<16x16xf32>
    %876 = vector.broadcast %873 : f32 to vector<16x16xf32>
    %877 = arith.mulf %876, %875 : vector<16x16xf32>
    %878 = arith.addf %872, %877 : vector<16x16xf32>
    %c71_370 = arith.constant 71 : index
    %879 = memref.load %arg4[%c71_370] : memref<72xf32, #tpu.memory_space<smem>>
    %c7_371 = arith.constant 7 : index
    %c2_372 = arith.constant 2 : index
    %c2_373 = arith.constant 2 : index
    %880 = vector.load %arg7[%c7_371, %c2_372, %c2_373] : memref<8x18x18xf32, #tpu.memory_space<vmem>>, vector<1x16x16xf32>
    %881 = vector.shape_cast %880 : vector<1x16x16xf32> to vector<16x16xf32>
    %882 = vector.broadcast %879 : f32 to vector<16x16xf32>
    %883 = arith.mulf %882, %881 : vector<16x16xf32>
    %884 = arith.addf %878, %883 : vector<16x16xf32>
    %885 = vector.broadcast %15 : f32 to vector<16x16xf32>
    %886 = arith.addf %884, %885 : vector<16x16xf32>
    %c0_374 = arith.constant 0 : index
    %c1_375 = arith.constant 1 : index
    %c1_376 = arith.constant 1 : index
    %887 = vector.load %arg5[%c0_374, %c1_375, %c1_376] : memref<1x18x18xf32, #tpu.memory_space<vmem>>, vector<1x16x16xf32>
    %888 = vector.shape_cast %887 : vector<1x16x16xf32> to vector<16x16xf32>
    %889 = vector.broadcast %7 : f32 to vector<16x16xf32>
    %890 = arith.mulf %889, %888 : vector<16x16xf32>
    %891 = vector.broadcast %11 : f32 to vector<16x16xf32>
    %892 = arith.mulf %891, %886 : vector<16x16xf32>
    %893 = arith.addf %890, %892 : vector<16x16xf32>
    %c0_377 = arith.constant 0 : index
    %c0_378 = arith.constant 0 : index
    %c0_379 = arith.constant 0 : index
    %894 = vector.load %arg6[%c0_377, %c0_378, %c0_379] : memref<1x16x16xf32, #tpu.memory_space<vmem>>, vector<1x16x16xf32>
    %895 = vector.shape_cast %894 : vector<1x16x16xf32> to vector<16x16xf32>
    %896 = vector.shape_cast %893 : vector<16x16xf32> to vector<1x16x16xf32>
    tpu.vector_store %arg6[%c0_377, %c0_378, %c0_379], %896 {strides = array<i32>} : memref<1x16x16xf32, #tpu.memory_space<vmem>>, vector<1x16x16xf32>,
    return
  }
  func.func @transform_0(%arg0: i32) -> i32 {
    %c0_i32 = arith.constant 0 : i32
    %c0_i32_0 = arith.constant 0 : i32
    return %c0_i32 : i32
  }
  func.func @transform_1(%arg0: i32) -> i32 {
    %c0_i32 = arith.constant 0 : i32
    %c0_i32_0 = arith.constant 0 : i32
    return %c0_i32 : i32
  }
  func.func @transform_2(%arg0: i32) -> i32 {
    %c0_i32 = arith.constant 0 : i32
    %c0_i32_0 = arith.constant 0 : i32
    return %c0_i32 : i32
  }
  func.func @transform_3(%arg0: i32) -> i32 {
    %c0_i32 = arith.constant 0 : i32
    %c0_i32_0 = arith.constant 0 : i32
    return %c0_i32 : i32
  }
  func.func @transform_4(%arg0: i32) -> (i32, i32, i32) {
    %c0_i32 = arith.constant 0 : i32
    %c0_i32_0 = arith.constant 0 : i32
    %c0_i32_1 = arith.constant 0 : i32
    return %arg0, %c0_i32, %c0_i32_0 : i32, i32, i32
  }
  func.func @transform_5(%arg0: i32) -> (i32, i32, i32) {
    %c0_i32 = arith.constant 0 : i32
    %c0_i32_0 = arith.constant 0 : i32
    %c0_i32_1 = arith.constant 0 : i32
    return %arg0, %c0_i32, %c0_i32_0 : i32, i32, i32
  }
}

</mosaic_0001>

<bundles_post_ra>
// kernel: gc_precond_forward.1
= control target key start
LH: loop header
LB: loop body
LE: loop exit
PB: predicated region body
PF: predicated region fallthrough
CT: control target
= control target key end

     0   :  { %10 = vsyncpa [#allocation5], 0  ;;  %s4175_s0 = inlined_call_operand.vmem [shape: f32[8], index: 0, kind: input, shape index: {}]   ;;  %s4176_s1 = inlined_call_operand.vmem [shape: f32[16], index: 1, kind: input, shape index: {}]   ;;  %s4177_s2 = inlined_call_operand.vmem [shape: f32[72], index: 2, kind: input, shape index: {}]   ;;  %s4178_s3 = inlined_call_operand.vmem [shape: f32[72], index: 3, kind: input, shape index: {}]   ;;  %s4179_s4 = inlined_call_operand.vmem [shape: f32[2,18,18], index: 4, kind: input, shape index: {}]   ;;  %s4180_s5 = inlined_call_operand.hbm [shape: f32[2,16,16], index: 5, kind: output, shape index: {}]  }
   0x1   :  { %11 = vsyncpa [#allocation7], 0 }
   0x2   :  { %12 = vsyncpa [#allocation10], 0 }
   0x3   :  { %13 = vsyncpa [#allocation4], 0 }
   0x4   :  { %15 = vsyncpa [#allocation4 + $0x1], 0  ;;  %s2865_s18 = smov 0   ;;  %s2867_s19 = smov 0  }
   0x5   :  { %s2869_s20 = smov 0   ;;  %s2871_s21 = smov 0  }
   0x6 LB: > { %s2886_s22 = sadd.s32 4294967295, %s2822_s21   ;;  %s2369_s23 = sadd.s32 4294967294, %s2822_s21   ;;  %s2822_s21 = sphi %s2871_s21, %s4200_s21   ;;  %s2818_s20 = sphi %s2869_s20, %s4199_s20   ;;  %s2814_s19 = sphi %s2867_s19, %s4198_s19   ;;  %s2810_s18 = sphi %s2865_s18, %s4197_s18  }
   0x7   : > { %s2890_s24 = sadd.s32 1, %s2822_s21   ;;  %s138_s25 = sadd.s32 1, %s2818_s20 }
   0x8   : > { %s135_s26 = ssub.s32 %s2822_s21, %s2890_s24  ;;  %p148_p0 = scmp.ne.s32.totalorder %s2818_s20, %s2814_s19 }
   0x9   : > { %p136_p1 = scmp.eq.s32.totalorder %s135_s26, 0  ;;  %p149_p2 = scmp.eq.s32.totalorder %s2886_s22, 1 }
   0xa   : > { %p154_p3 = scmp.ne.s32.totalorder %s2814_s19, %s2810_s18  ;;  %p155_p4 = scmp.eq.s32.totalorder %s2369_s23, 1 }
   0xb   : > { %s2901_s27 = scalar_select %p136_p1, %s2818_s20, %s138_s25  }
   0xc   : > { %p2903_p5 = por %p149_p2, %p148_p0  ;;  %p2907_p6 = por %p155_p4, %p154_p3 }
   0xd   : > { %p2370_p7 = scmp.ge.s32.totalorder %s2822_s21, 1  ;;  %p162_p8 = scmp.lt.s32.totalorder %s2822_s21, 3 }
   0xe   : > { %s4184_s28 = scalar_select %p2903_p5, 1, 0 }
   0xf   : > { %s4185_s29 = scalar_select %p2907_p6, 1, 0 }
  0x10   : > { %p4181_p9 = scmp.eq.s32.totalorder %s2886_s22, 0  ;;  %p2914_p10 = pnand %p2370_p7, %p162_p8 }
  0x11   : > { %s186_s8 = sshll.u32 %s4176_s1, 4  ;;  %s175_s11 = sshll.u32 %s4175_s0, 4  ;;  %s187_s8 = int_to_ptr.vmem [resolvable:$true] %s186_s8  ;;  %s176_s11 = int_to_ptr.vmem [resolvable:$true] %s175_s11 }
  0x12   : > { %s4186_s30 = scalar_select %p2914_p10, 1, 0 }
  0x13   : > { %p2552_p11 = pneg %p2914_p10  ;;  %s197_s15 = sshll.u32 %s4177_s2, 4  ;;  %s2935_s15 = int_to_ptr.vmem [resolvable:$true] %s197_s15 }
  0x14   : > { %s208_s23 = sshll.u32 %s4178_s3, 4  ;;  %s2690_s25 = scalar_lea.vmem %s187_s8, 16  ;;  %s209_s23 = int_to_ptr.vmem [resolvable:$true] %s208_s23 }
  0x15   : > { %p2928_p12 = pnand %p4181_p9, %p2552_p11  ;;  %p2691_p13 = scmp.ne.s32.totalorder %s187_s8, %s2690_s25 }
  0x16   : > { %p2698_p3 = scmp.lt.s32.totalorder %s187_s8, %s187_s8  ;;  %p2699_p4 = scmp.lt.s32.totalorder %s2690_s25, %s2690_s25 }
  0x17   : > { %p2692_p0 = pneg %p2928_p12 }
  0x18   : > { %p2700_p7 = por %p2699_p4, %p2698_p3 }
  0x19   : > { %p2693_p1 = pnand %p2692_p0, %p2691_p13 }
  0x1b   : > { %p2694_p2 = pneg %p2693_p1 }
  0x1d   : > { %p2701_p8 = pnand %p2700_p7, %p2694_p2 }
  0x1f   : > { %2704 = shalt.err (!%p2701_p8)
}
  0x20   : > { %s2824_s26 = smov [#allocation6]   ;;  %s2705_s6 = scalar_lea.vmem %s176_s11, 16 }
  0x21   : > { %2558 = dma.vmem_to_smem (!%p2928_p12), %s187_s8, 16, %s2824_s26, [#allocation7]  }
  0x22   : > { %p2706_p11 = scmp.ne.s32.totalorder %s176_s11, %s2705_s6  ;;  %p2713_p5 = scmp.lt.s32.totalorder %s176_s11, %s176_s11 }
  0x23   : > { %p2714_p10 = scmp.lt.s32.totalorder %s2705_s6, %s2705_s6 }
  0x24   : > { %p2708_p9 = pnand %p2706_p11, %p2692_p0 }
  0x25   : > { %p2715_p13 = por %p2714_p10, %p2713_p5 }
  0x26   : > { %p2709_p6 = pneg %p2708_p9 }
  0x28   : > { %p2716_p1 = pnand %p2715_p13, %p2709_p6 }
  0x2a   : > { %2719 = shalt.err (!%p2716_p1)
}
  0x2b   : > { %s2825_s7 = smov [#allocation3]   ;;  %s2720_s8 = scalar_lea.vmem %s2935_s15, 16 }
  0x2c   : > { %2555 = dma.vmem_to_smem (!%p2928_p12), %s176_s11, 16, %s2825_s7, [#allocation5]  }
  0x2d   : > { %p2721_p2 = scmp.ne.s32.totalorder %s2935_s15, %s2720_s8  ;;  %p2728_p9 = scmp.lt.s32.totalorder %s2935_s15, %s2935_s15 }
  0x2e   : > { %p2729_p7 = scmp.lt.s32.totalorder %s2720_s8, %s2720_s8 }
  0x2f   : > { %p2723_p3 = pnand %p2721_p2, %p2692_p0 }
  0x30   : > { %p2730_p5 = por %p2729_p7, %p2728_p9 }
  0x31   : > { %p2724_p4 = pneg %p2723_p3 }
  0x33   : > { %p2731_p6 = pnand %p2730_p5, %p2724_p4 }
  0x35   : > { %2734 = shalt.err (!%p2731_p6)
}
  0x36   : > { %s2826_s9 = smov [#allocation8]   ;;  %s2735_s13 = scalar_lea.vmem %s209_s23, 16 }
  0x37   : > { %2561 = dma.vmem_to_smem (!%p2928_p12), %s2935_s15, 16, %s2826_s9, [#allocation7]  }
  0x38   : > { %p2736_p10 = scmp.ne.s32.totalorder %s209_s23, %s2735_s13  ;;  %p2743_p13 = scmp.lt.s32.totalorder %s209_s23, %s209_s23 }
  0x39   : > { %p2744_p1 = scmp.lt.s32.totalorder %s2735_s13, %s2735_s13 }
  0x3a   : > { %p2738_p8 = pnand %p2736_p10, %p2692_p0 }
  0x3b   : > { %p2745_p2 = por %p2744_p1, %p2743_p13 }
  0x3c   : > { %p2739_p11 = pneg %p2738_p8 }
  0x3e   : > { %p2746_p3 = pnand %p2745_p2, %p2739_p11 }
  0x40   : > { %2749 = shalt.err (!%p2746_p3)
}
  0x41   : > { %s2827_s14 = smov [#allocation9]   ;;  %p4188_p4 = scmp.ne.s32.totalorder %s4186_s30, 0 }
  0x42   : > { %2564 = dma.vmem_to_smem (!%p2928_p12), %s209_s23, 16, %s2827_s14, [#allocation10]  }
  0x43   : > { %229 = sbr.rel (%p4188_p4) target bundleno = 1093 (0x445), region = 40  ;;  %p4189_p9 = scmp.eq.s32.totalorder (!%p4188_p4), %s2886_s22, 0 }
  0x48   : > { %2793 = dma.done.wait (%p4189_p9), [#allocation5], 16   ;;  %p4190_p7 = pmov %p4189_p9 }
  0x4a   : > { %2795 = vsyncadd (%p4190_p7), [#allocation5], 4294967280  ;;  %p4191_p0 = pmov %p4190_p7 }
  0x4c   : > { %2797 = dma.done.wait (%p4191_p0), [#allocation7], 32   ;;  %p4192_p5 = pmov %p4191_p0 }
  0x4d   : > { %p4193_p6 = pmov %p4191_p0 }
  0x4e   : > { %2799 = vsyncadd (%p4192_p5), [#allocation7], 4294967264 }
  0x4f   : > { %2801 = dma.done.wait (%p4193_p6), [#allocation10], 16   ;;  %p4194_p12 = pmov %p4191_p0 }
  0x51   : > { %2803 = vsyncadd (%p4194_p12), [#allocation10], 4294967280 }
  0x52   : > { %247 = sfence }
  0x53   : > { %p270_p10 = scmp.lt.s32.totalorder %s2886_s22, 1  ;;  %s2385_s30 = sld [smem:[#allocation8 + $0x10]]  ;;  %vm289_vm0 = vcmask 146432   ;;  %vm292_vm1 = vcmask 140288   ;;  %vm443_vm2 = vcmask 138248   ;;  %vm2249_vm3 = vcmask 130048  }
  0x54   : > { %s2384_s12 = sld [smem:[#allocation8 + $0x8]]  ;;  %s2828_s7 = smov 126  }
  0x55   : > { %s271_s15 = scalar_select %p270_p10, %s2886_s22, 1 }
  0x56   : > { %s2394_s16 = sld [smem:[#allocation8 + $0x9]]  ;;  %s2829_s8 = smov 127  }
  0x57   : > { %s2533_s17 = smul.u32 24, %s271_s15  ;;  %s2395_s6 = sld [smem:[#allocation8 + $0x11]] }
  0x58   : > { %s2403_s9 = sld [smem:[#allocation8 + $0xa]]  ;;  %p4195_p11 = scmp.ne.s32.totalorder %s4184_s28, 0 }
  0x59   : > { %s2990_s26 = scalar_lea.vmem %s4179_s4, %s2533_s17  ;;  %v334_v0 = vstv %s2385_s30  ;;  %s2387_s10 = sld [smem:[#allocation8 + $0x20]] }
  0x5a   : > { %v2993_v1 = vld [vmem:[%s2990_s26] sm:$0xff]  ;;  %v2996_v2 = vld [vmem:[%s2990_s26 + $0x8] sm:$0xff]  ;;  %v320_v3 = vstv %s2384_s12  ;;  %s2404_s11 = sld [smem:[#allocation8 + $0x12]] }
  0x5b   : > { %v335_v4 = vmul.f32 %v334_v0, %v2993_v1  ;;  %v321_v5 = vmul.f32 %v320_v3, %v2993_v1  ;;  %v336_v6 = vmul.f32 %v334_v0, %v2996_v2  ;;  %v322_v7 = vmul.f32 %v320_v3, %v2996_v2  ;;  %v3017_v17 = vld [vmem:[%s2990_s26 + $0x9] sm:$0xff]  ;;  %v3020_v19 = vld [vmem:[%s2990_s26 + $0x1] sm:$0xff]  ;;  %s2412_s13 = sld [smem:[#allocation8 + $0xb]] }
  0x5c   : > { %v451_v8 = vstv %s2394_s16  ;;  %s2388_s14 = sld [smem:[#allocation8 + $0x28]]  ;;  %v3067_v52 = vld [vmem:[%s2990_s26 + $0xa] sm:$0xff]  ;;  %v3070_v54 = vld [vmem:[%s2990_s26 + $0x2] sm:$0xff] }
  0x5d   : > { %339 = vrot.lane.b32.xlu1 %v335_v4, %s2828_s7  ;;  %325 = vrot.lane.b32.xlu0 %v321_v5, %s2829_s8  ;;  %v453_v9 = vmul.f32 %v451_v8, %v2996_v2  ;;  %v452_v10 = vmul.f32 %v451_v8, %v2993_v1  ;;  %v465_v11 = vstv %s2395_s6  ;;  %s2397_s30 = sld [smem:[#allocation8 + $0x21]] }
  0x5e   : > { %v467_v12 = vmul.f32 %v465_v11, %v2996_v2  ;;  %v466_v13 = vmul.f32 %v465_v11, %v2993_v1  ;;  %v581_v14 = vstv %s2403_s9  ;;  %s2413_s12 = sld [smem:[#allocation8 + $0x13]] }
  0x5f   : > { %v583_v15 = vmul.f32 %v581_v14, %v2996_v2  ;;  %v582_v16 = vmul.f32 %v581_v14, %v2993_v1  ;;  %v354_v18 = vstv %s2387_s10  ;;  %s2421_s15 = sld [smem:[#allocation8 + $0xc]] }
  0x60   : > { %v356_v20 = vmul.f32 %v354_v18, %v3017_v17  ;;  %v355_v21 = vmul.f32 %v354_v18, %v3020_v19  ;;  %v595_v22 = vstv %s2404_s11  ;;  %s2398_s16 = sld [smem:[#allocation8 + $0x29]] }
  0x61   : > { %341 = vrot.lane.b32.xlu1 %v336_v6, %s2828_s7  ;;  %327 = vrot.lane.b32.xlu0 %v322_v7, %s2829_s8  ;;  %v597_v23 = vmul.f32 %v595_v22, %v2996_v2  ;;  %v596_v24 = vmul.f32 %v595_v22, %v2993_v1  ;;  %v711_v25 = vstv %s2412_s13  ;;  %s2406_s17 = sld [smem:[#allocation8 + $0x22]] }
  0x62   : > { %v713_v26 = vmul.f32 %v711_v25, %v2996_v2  ;;  %v712_v27 = vmul.f32 %v711_v25, %v2993_v1  ;;  %v368_v28 = vstv %s2388_s14  ;;  %s2422_s23 = sld [smem:[#allocation8 + $0x14]] }
  0x63   : > { %v370_v29 = vmul.f32 %v368_v28, %v3017_v17  ;;  %v369_v30 = vmul.f32 %v368_v28, %v3020_v19  ;;  %v485_v31 = vstv %s2397_s30  ;;  %s2430_s25 = sld [smem:[#allocation8 + $0xd]] }
  0x64   : > { %v487_v32 = vmul.f32 %v485_v31, %v3017_v17  ;;  %v486_v33 = vmul.f32 %v485_v31, %v3020_v19  ;;  %v725_v34 = vstv %s2413_s12  ;;  %s2390_s6 = sld [smem:[#allocation8 + $0x38]] }
  0x65   : > { %458 = vrot.lane.b32.xlu1 %v453_v9, %s2829_s8  ;;  %456 = vrot.lane.b32.xlu0 %v452_v10, %s2829_s8  ;;  %v727_v35 = vmul.f32 %v725_v34, %v2996_v2  ;;  %v726_v36 = vmul.f32 %v725_v34, %v2993_v1  ;;  %v841_v37 = vstv %s2421_s15  ;;  %s2407_s9 = sld [smem:[#allocation8 + $0x2a]] }
  0x66   : > { %v843_v38 = vmul.f32 %v841_v37, %v2996_v2  ;;  %v842_v39 = vmul.f32 %v841_v37, %v2993_v1  ;;  %v499_v40 = vstv %s2398_s16  ;;  %s2415_s10 = sld [smem:[#allocation8 + $0x23]] }
  0x67   : > { %v501_v41 = vmul.f32 %v499_v40, %v3017_v17  ;;  %v500_v42 = vmul.f32 %v499_v40, %v3020_v19  ;;  %v615_v43 = vstv %s2406_s17  ;;  %s2431_s11 = sld [smem:[#allocation8 + $0x15]] }
  0x68   : > { %v617_v44 = vmul.f32 %v615_v43, %v3017_v17  ;;  %v616_v45 = vmul.f32 %v615_v43, %v3020_v19  ;;  %v855_v46 = vstv %s2422_s23  ;;  %s2439_s13 = sld [smem:[#allocation8 + $0xe]] }
  0x69   : > { %472 = vrot.lane.b32.xlu1 %v467_v12, %s2828_s7  ;;  %470 = vrot.lane.b32.xlu0 %v466_v13, %s2828_s7  ;;  %v857_v47 = vmul.f32 %v855_v46, %v2996_v2  ;;  %v856_v48 = vmul.f32 %v855_v46, %v2993_v1  ;;  %v971_v49 = vstv %s2430_s25  ;;  %s2391_s14 = sld [smem:[#allocation8 + $0x40]] }
  0x6a   : > { %v973_v50 = vmul.f32 %v971_v49, %v2996_v2  ;;  %v972_v51 = vmul.f32 %v971_v49, %v2993_v1  ;;  %v388_v53 = vstv %s2390_s6  ;;  %s2400_s30 = sld [smem:[#allocation8 + $0x39]] }
  0x6b   : > { %v390_v55 = vmul.f32 %v388_v53, %v3067_v52  ;;  %v389_v56 = vmul.f32 %v388_v53, %v3070_v54  ;;  %v629_v57 = vstv %s2407_s9  ;;  %s2416_s12 = sld [smem:[#allocation8 + $0x2b]] }
  0x6c   : > { %v631_v58 = vmul.f32 %v629_v57, %v3017_v17  ;;  %v630_v59 = vmul.f32 %v629_v57, %v3020_v19  ;;  %v745_v60 = vstv %s2415_s10  ;;  %s2424_s15 = sld [smem:[#allocation8 + $0x24]] }
  0x6d   : > { %588 = vrot.lane.b32.xlu1 %v583_v15, %s2829_s8  ;;  %586 = vrot.lane.b32.xlu0 %v582_v16, %s2829_s8  ;;  %v747_v61 = vmul.f32 %v745_v60, %v3017_v17  ;;  %v746_v62 = vmul.f32 %v745_v60, %v3020_v19  ;;  %v985_v63 = vstv %s2431_s11  ;;  %s2440_s16 = sld [smem:[#allocation8 + $0x16]] }
  0x6e   : > { %v987_v0 = vmul.f32 %v985_v63, %v2996_v2  ;;  %v986_v3 = vmul.f32 %v985_v63, %v2993_v1  ;;  %v1101_v4 = vstv %s2439_s13  ;;  %s2448_s17 = sld [smem:[#allocation8 + $0xf]] }
  0x6f   : > { %v1103_v5 = vmul.f32 %v1101_v4, %v2996_v2  ;;  %v1102_v6 = vmul.f32 %v1101_v4, %v2993_v1  ;;  %v402_v7 = vstv %s2391_s14  ;;  %s2401_s23 = sld [smem:[#allocation8 + $0x41]] }
  0x70   : > { %v404_v8 = vmul.f32 %v402_v7, %v3067_v52  ;;  %v403_v9 = vmul.f32 %v402_v7, %v3070_v54  ;;  %v519_v10 = vstv %s2400_s30  ;;  %s2409_s25 = sld [smem:[#allocation8 + $0x3a]] }
  0x71   : > { %361 = vrot.lane.b32.xlu1 %v356_v20, %s2829_s8  ;;  %359 = vrot.lane.b32.xlu0 %v355_v21, %s2829_s8  ;;  %v521_v11 = vmul.f32 %v519_v10, %v3067_v52  ;;  %v520_v12 = vmul.f32 %v519_v10, %v3070_v54  ;;  %v759_v13 = vstv %s2416_s12  ;;  %s2425_s6 = sld [smem:[#allocation8 + $0x2c]] }
  0x72   : > { %v761_v14 = vmul.f32 %v759_v13, %v3017_v17  ;;  %v760_v15 = vmul.f32 %v759_v13, %v3020_v19  ;;  %v875_v16 = vstv %s2424_s15  ;;  %s2433_s9 = sld [smem:[#allocation8 + $0x25]] }
  0x73   : > { %v877_v18 = vmul.f32 %v875_v16, %v3017_v17  ;;  %v876_v20 = vmul.f32 %v875_v16, %v3020_v19  ;;  %v1115_v21 = vstv %s2440_s16  ;;  %s2449_s10 = sld [smem:[#allocation8 + $0x17]] }
  0x74   : > { %v1117_v22 = vmul.f32 %v1115_v21, %v2996_v2  ;;  %s2410_s11 = sld [smem:[#allocation8 + $0x42]] }
  0x75   : > { %602 = vrot.lane.b32.xlu1 %v597_v23, %s2828_s7  ;;  %600 = vrot.lane.b32.xlu0 %v596_v24, %s2828_s7  ;;  %v1116_v23 = vmul.f32 %v1115_v21, %v2993_v1  ;;  %v1231_v24 = vstv %s2448_s17  ;;  %s2418_s13 = sld [smem:[#allocation8 + $0x3b]] }
  0x76   : > { %v1233_v25 = vmul.f32 %v1231_v24, %v2996_v2  ;;  %s2434_s14 = sld [smem:[#allocation8 + $0x2d]] }
  0x77   : > { %s2442_s30 = sld [smem:[#allocation8 + $0x26]] }
  0x78   : > { %s2419_s12 = sld [smem:[#allocation8 + $0x43]] }
  0x79   : > { %718 = vrot.lane.b32.xlu1 %v713_v26, %s2829_s8  ;;  %716 = vrot.lane.b32.xlu0 %v712_v27, %s2829_s8  ;;  %v1232_v26 = vmul.f32 %v1231_v24, %v2993_v1  ;;  %v533_v27 = vstv %s2401_s23  ;;  %s2427_s15 = sld [smem:[#allocation8 + $0x3c]] }
  0x7a   : > { %v535_v28 = vmul.f32 %v533_v27, %v3067_v52  ;;  %v663_v46 = vstv %s2410_s11  ;;  %s2443_s16 = sld [smem:[#allocation8 + $0x2e]] }
  0x7b   : > { %v665_v49 = vmul.f32 %v663_v46, %v3067_v52  ;;  %s2451_s17 = sld [smem:[#allocation8 + $0x27]] }
  0x7c   : > { %s2428_s23 = sld [smem:[#allocation8 + $0x44]] }
  0x7d   : > { %375 = vrot.lane.b32.xlu1 %v370_v29, %s2828_s7  ;;  %373 = vrot.lane.b32.xlu0 %v369_v30, %s2828_s7  ;;  %v534_v29 = vmul.f32 %v533_v27, %v3070_v54  ;;  %v649_v30 = vstv %s2409_s25  ;;  %v1135_v63 = vstv %s2442_s30  ;;  %s2436_s25 = sld [smem:[#allocation8 + $0x3d]] }
  0x7e   : > { %v651_v31 = vmul.f32 %v649_v30, %v3067_v52  ;;  %v1137_v4 = vmul.f32 %v1135_v63, %v3017_v17  ;;  %s315_s11 = sld [smem:[#allocation8]] }
  0x7f   : > { %s3244_s30 = sld [smem:[#allocation8 + $0x18]] }
  0x80   : > { %v1149_v16 = vstv %s2443_s16  ;;  %s3286_s16 = sshll.u32 %s2886_s22, 2 }
  0x81   : > { %492 = vrot.lane.b32.xlu1 %v487_v32, %s2829_s8  ;;  %490 = vrot.lane.b32.xlu0 %v486_v33, %s2829_s8  ;;  %v650_v32 = vmul.f32 %v649_v30, %v3070_v54  ;;  %v889_v33 = vstv %s2425_s6  ;;  %v1151_v21 = vmul.f32 %v1149_v16, %v3017_v17  ;;  %s2452_s6 = sld [smem:[#allocation8 + $0x2f]] }
  0x82   : > { %v891_v34 = vmul.f32 %v889_v33, %v3017_v17 }
  0x85   : > { %732 = vrot.lane.b32.xlu1 %v727_v35, %s2828_s7  ;;  %730 = vrot.lane.b32.xlu0 %v726_v36, %s2828_s7  ;;  %v890_v35 = vmul.f32 %v889_v33, %v3020_v19  ;;  %v1005_v36 = vstv %s2433_s9  ;;  %v1039_v33 = vstv %s2436_s25  ;;  %s2437_s9 = sld [smem:[#allocation8 + $0x45]] }
  0x86   : > { %v1006_v40 = vmul.f32 %v1005_v36, %v3020_v19  ;;  %s276_s25 = sld [smem:[#allocation3 + %s3286_s16]] }
  0x89   : > { %848 = vrot.lane.b32.xlu1 %v843_v38, %s2829_s8  ;;  %846 = vrot.lane.b32.xlu0 %v842_v39, %s2829_s8  ;;  %v1007_v39 = vmul.f32 %v1005_v36, %v3017_v17  ;;  %v1041_v36 = vmul.f32 %v1039_v33, %v3067_v52 }
  0x8d   : > { %506 = vrot.lane.b32.xlu1 %v501_v41, %s2828_s7  ;;  %504 = vrot.lane.b32.xlu0 %v500_v42, %s2828_s7  ;;  %v1245_v41 = vstv %s2449_s10  ;;  %s2445_s10 = sld [smem:[#allocation8 + $0x3e]] }
  0x91   : > { %622 = vrot.lane.b32.xlu1 %v617_v44, %s2829_s8  ;;  %620 = vrot.lane.b32.xlu0 %v616_v45, %s2829_s8  ;;  %v1247_v44 = vmul.f32 %v1245_v41, %v2996_v2  ;;  %v1246_v45 = vmul.f32 %v1245_v41, %v2993_v1 }
  0x95   : > { %862 = vrot.lane.b32.xlu1 %v857_v47, %s2828_s7  ;;  %860 = vrot.lane.b32.xlu0 %v856_v48, %s2828_s7 }
  0x99   : > { %978 = vrot.lane.b32.xlu1 %v973_v50, %s2829_s8  ;;  %976 = vrot.lane.b32.xlu0 %v972_v51, %s2829_s8  ;;  %v664_v50 = vmul.f32 %v663_v46, %v3070_v54  ;;  %v779_v51 = vstv %s2418_s13  ;;  %s2446_s13 = sld [smem:[#allocation8 + $0x46]] }
  0x9a   : > { %v780_v57 = vmul.f32 %v779_v51, %v3070_v54 }
  0x9d   : > { %395 = vrot.lane.b32.xlu1 %v390_v55, %s2829_s8  ;;  %393 = vrot.lane.b32.xlu0 %v389_v56, %s2829_s8  ;;  %v781_v56 = vmul.f32 %v779_v51, %v3067_v52 }
  0xa1   : > { %636 = vrot.lane.b32.xlu1 %v631_v58, %s2828_s7  ;;  %634 = vrot.lane.b32.xlu0 %v630_v59, %s2828_s7  ;;  %v1019_v58 = vstv %s2434_s14  ;;  %s2454_s14 = sld [smem:[#allocation8 + $0x3f]] }
  0xa5   : > { %752 = vrot.lane.b32.xlu1 %v747_v61, %s2829_s8  ;;  %750 = vrot.lane.b32.xlu0 %v746_v62, %s2829_s8  ;;  %v1021_v61 = vmul.f32 %v1019_v58, %v3017_v17  ;;  %v1020_v62 = vmul.f32 %v1019_v58, %v3020_v19  ;;  %v1169_v58 = vstv %s2445_s10  ;;  %s2399_s10 = sld [smem:[#allocation8 + $0x31]] }
  0xa9   : > { %992 = vrot.lane.b32.xlu1 %v987_v0, %s2828_s7  ;;  %990 = vrot.lane.b32.xlu0 %v986_v3, %s2828_s7 }
  0xad   : > { %1108 = vrot.lane.b32.xlu1 %v1103_v5, %s2829_s8  ;;  %1106 = vrot.lane.b32.xlu0 %v1102_v6, %s2829_s8  ;;  %v1136_v5 = vmul.f32 %v1135_v63, %v3020_v19  ;;  %v793_v6 = vstv %s2419_s12  ;;  %v316_v63 = vstv %s315_s11  ;;  %s2455_s12 = sld [smem:[#allocation8 + $0x47]] }
  0xae   : > { %v794_v10 = vmul.f32 %v793_v6, %v3070_v54  ;;  %s2402_s11 = sld [smem:[#allocation8 + $0x2]] }
  0xb1   : > { %409 = vrot.lane.b32.xlu1 %v404_v8, %s2828_s7  ;;  %407 = vrot.lane.b32.xlu0 %v403_v9, %s2828_s7  ;;  %v795_v9 = vmul.f32 %v793_v6, %v3067_v52  ;;  %v1183_v6 = vstv %s2446_s13 }
  0xb5   : > { %526 = vrot.lane.b32.xlu1 %v521_v11, %s2829_s8  ;;  %524 = vrot.lane.b32.xlu0 %v520_v12, %s2829_s8  ;;  %v909_v11 = vstv %s2427_s15  ;;  %s3263_s15 = sld [smem:[#allocation8 + $0x30]] }
  0xb9   : > { %766 = vrot.lane.b32.xlu1 %v761_v14, %s2828_s7  ;;  %764 = vrot.lane.b32.xlu0 %v760_v15, %s2828_s7  ;;  %v911_v14 = vmul.f32 %v909_v11, %v3067_v52  ;;  %v910_v15 = vmul.f32 %v909_v11, %v3070_v54  ;;  %v317_v11 = vmul.f32 %v316_v63, %v2993_v1 }
  0xbd   : > { %882 = vrot.lane.b32.xlu1 %v877_v18, %s2829_s8  ;;  %880 = vrot.lane.b32.xlu0 %v876_v20, %s2829_s8 }
  0xc1   : > { %1122 = vrot.lane.b32.xlu1 %v1117_v22, %s2828_s7  ;;  %1120 = vrot.lane.b32.xlu0 %v1116_v23, %s2828_s7  ;;  %v1150_v22 = vmul.f32 %v1149_v16, %v3020_v19  ;;  %v1265_v23 = vstv %s2451_s17  ;;  %v1184_v16 = vmul.f32 %v1183_v6, %v3070_v54  ;;  %s2393_s17 = sld [smem:[#allocation8 + $0x1]] }
  0xc2   : > { %v1266_v27 = vmul.f32 %v1265_v23, %v3020_v19 }
  0xc5   : > { %1238 = vrot.lane.b32.xlu1 %v1233_v25, %s2829_s8  ;;  %1236 = vrot.lane.b32.xlu0 %v1232_v26, %s2829_s8  ;;  %v1267_v26 = vmul.f32 %v1265_v23, %v3017_v17 }
  0xc9   : > { %540 = vrot.lane.b32.xlu1 %v535_v28, %s2828_s7  ;;  %538 = vrot.lane.b32.xlu0 %v534_v29, %s2828_s7  ;;  %v923_v28 = vstv %s2428_s23  ;;  %s3294_s23 = sshll.u32 %s2886_s22, 3 }
  0xca   : > { %s548_s13 = sadd.s32 1, %s3294_s23 }
  0xcd   : > { %656 = vrot.lane.b32.xlu1 %v651_v31, %s2829_s8  ;;  %654 = vrot.lane.b32.xlu0 %v650_v32, %s2829_s8  ;;  %v925_v31 = vmul.f32 %v923_v28, %v3067_v52  ;;  %v924_v32 = vmul.f32 %v923_v28, %v3070_v54  ;;  %v348_v28 = vstv %s3244_s30  ;;  %s3349_s30 = sld [smem:[#allocation6 + %s548_s13]] }
  0xce   : > { %s3447_s13 = sld [smem:[#allocation8 + $0x1c]] }
  0xcf   : > { %v3128_v37 = vpop.permute.xlu1 %339  ;;  %v3130_v38 = vpop.permute.xlu0 %325 }
  0xd1   : > { %896 = vrot.lane.b32.xlu1 %v891_v34, %s2828_s7  ;;  %894 = vrot.lane.b32.xlu0 %v890_v35, %s2828_s7 }
  0xd3   : > { %v3136_v42 = vpop.permute.xlu1 %341  ;;  %v3138_v43 = vpop.permute.xlu0 %327 }
  0xd5   : > { %1012 = vrot.lane.b32.xlu1 %v1007_v39, %s2829_s8  ;;  %1010 = vrot.lane.b32.xlu0 %v1006_v40, %s2829_s8  ;;  %v1040_v39 = vmul.f32 %v1039_v33, %v3070_v54  ;;  %v1279_v40 = vstv %s2452_s6  ;;  %v1313_v33 = vstv %s2455_s12  ;;  %s419_s6 = sld [smem:[#allocation6 + %s3294_s23]] }
  0xd6   : > { %v1280_v46 = vmul.f32 %v1279_v40, %v3020_v19  ;;  %s3384_s12 = sld [smem:[#allocation8 + $0x32]] }
  0xd7   : > { %v3144_v47 = vpop.permute.xlu1 %458  ;;  %v3146_v48 = vpop.permute.xlu0 %456 }
  0xd9   : > { %1252 = vrot.lane.b32.xlu1 %v1247_v44, %s2828_s7  ;;  %1250 = vrot.lane.b32.xlu0 %v1246_v45, %s2828_s7  ;;  %v1281_v45 = vmul.f32 %v1279_v40, %v3017_v17  ;;  %v350_v40 = vmul.f32 %v348_v28, %v3017_v17 }
  0xdb   : > { %v3152_v53 = vpop.permute.xlu1 %472  ;;  %v3154_v55 = vpop.permute.xlu0 %470 }
  0xdd   : > { %670 = vrot.lane.b32.xlu1 %v665_v49, %s2828_s7  ;;  %668 = vrot.lane.b32.xlu0 %v664_v50, %s2828_s7  ;;  %v1053_v49 = vstv %s2437_s9  ;;  %s2396_s9 = sld [smem:[#allocation8 + $0x19]] }
  0xdf   : > { %v3160_v59 = vpop.permute.xlu1 %588  ;;  %v3162_v60 = vpop.permute.xlu0 %586 }
  0xe1   : > { %786 = vrot.lane.b32.xlu1 %v781_v56, %s2829_s8  ;;  %784 = vrot.lane.b32.xlu0 %v780_v57, %s2829_s8  ;;  %v1055_v56 = vmul.f32 %v1053_v49, %v3067_v52  ;;  %v1054_v57 = vmul.f32 %v1053_v49, %v3070_v54  ;;  %v1314_v49 = vmul.f32 %v1313_v33, %v3070_v54 }
  0xe3   : > { %v3168_v0 = vpop.permute.xlu1 %361  ;;  %v3170_v3 = vpop.permute.xlu0 %359 }
  0xe5   : > { %1026 = vrot.lane.b32.xlu1 %v1021_v61, %s2828_s7  ;;  %1024 = vrot.lane.b32.xlu0 %v1020_v62, %s2828_s7 }
  0xe7   : > { %v3176_v7 = vpop.permute.xlu1 %602  ;;  %v3178_v8 = vpop.permute.xlu0 %600 }
  0xe9   : > { %1142 = vrot.lane.b32.xlu1 %v1137_v4, %s2829_s8  ;;  %1140 = vrot.lane.b32.xlu0 %v1136_v5, %s2829_s8  ;;  %v1171_v4 = vmul.f32 %v1169_v58, %v3067_v52  ;;  %v1170_v5 = vmul.f32 %v1169_v58, %v3070_v54 }
  0xeb   : > { %v3184_v12 = vpop.permute.xlu1 %718  ;;  %v3186_v13 = vpop.permute.xlu0 %716 }
  0xed   : > { %800 = vrot.lane.b32.xlu1 %v795_v9, %s2828_s7  ;;  %798 = vrot.lane.b32.xlu0 %v794_v10, %s2828_s7 }
  0xef   : > { %v3192_v18 = vpop.permute.xlu1 %375  ;;  %v3194_v20 = vpop.permute.xlu0 %373 }
  0xf1   : > { %916 = vrot.lane.b32.xlu1 %v911_v14, %s2829_s8  ;;  %914 = vrot.lane.b32.xlu0 %v910_v15, %s2829_s8  ;;  %v318_v14 = vmul.f32 %v316_v63, %v2996_v2  ;;  %v1185_v15 = vmul.f32 %v1183_v6, %v3067_v52 }
  0xf3   : > { %v3200_v24 = vpop.permute.xlu1 %492  ;;  %v3202_v25 = vpop.permute.xlu0 %490 }
  0xf5   : > { %1156 = vrot.lane.b32.xlu1 %v1151_v21, %s2828_s7  ;;  %1154 = vrot.lane.b32.xlu0 %v1150_v22, %s2828_s7  ;;  %v1299_v21 = vstv %s2454_s14  ;;  %s3345_s14 = sld [smem:[#allocation8 + $0x1a]] }
  0xf7   : > { %v3208_v29 = vpop.permute.xlu1 %732  ;;  %v3210_v30 = vpop.permute.xlu0 %730 }
  0xf9   : > { %1272 = vrot.lane.b32.xlu1 %v1267_v26, %s2829_s8  ;;  %1270 = vrot.lane.b32.xlu0 %v1266_v27, %s2829_s8  ;;  %v331_v26 = vadd.f32 %v3130_v38, %v317_v11  ;;  %v332_v27 = vadd.f32 %v3138_v43, %v318_v14 }
  0xfb   : > { %v3216_v34 = vpop.permute.xlu1 %848  ;;  %v3218_v35 = vpop.permute.xlu0 %846  ;;  %v345_v38 = vadd.f32 %v3128_v37, %v331_v26  ;;  %v346_v43 = vadd.f32 %v3136_v42, %v332_v27  ;;  %v382_v42 = vstv %s3263_s15  ;;  %s3387_s15 = sld [smem:[#allocation8 + $0x3]] }
  0xfd   : > { %930 = vrot.lane.b32.xlu1 %v925_v31, %s2828_s7  ;;  %928 = vrot.lane.b32.xlu0 %v924_v32, %s2828_s7  ;;  %v1301_v31 = vmul.f32 %v1299_v21, %v3067_v52  ;;  %v1300_v32 = vmul.f32 %v1299_v21, %v3070_v54  ;;  %v352_v37 = vadd.f32 %v350_v40, %v346_v43  ;;  %v420_v43 = vstv %s419_s6 }
  0xff   : > { %v3224_v41 = vpop.permute.xlu1 %506  ;;  %v3226_v44 = vpop.permute.xlu0 %504  ;;  %v366_v63 = vadd.f32 %v3168_v0, %v352_v37 }
 0x101   : > { %1046 = vrot.lane.b32.xlu1 %v1041_v36, %s2829_s8  ;;  %1044 = vrot.lane.b32.xlu0 %v1040_v39, %s2829_s8  ;;  %v380_v11 = vadd.f32 %v3192_v18, %v366_v63 }
 0x103   : > { %v3232_v50 = vpop.permute.xlu1 %622  ;;  %v3234_v51 = vpop.permute.xlu0 %620 }
 0x105   : > { %1286 = vrot.lane.b32.xlu1 %v1281_v45, %s2828_s7  ;;  %1284 = vrot.lane.b32.xlu0 %v1280_v46, %s2828_s7  ;;  %v349_v45 = vmul.f32 %v348_v28, %v3020_v19  ;;  %v1315_v46 = vmul.f32 %v1313_v33, %v3067_v52 }
 0x107   : > { %v3240_v61 = vpop.permute.xlu1 %862  ;;  %v3242_v62 = vpop.permute.xlu0 %860  ;;  %v351_v58 = vadd.f32 %v349_v45, %v345_v38 }
 0x109   : > { %1060 = vrot.lane.b32.xlu1 %v1055_v56, %s2828_s7  ;;  %1058 = vrot.lane.b32.xlu0 %v1054_v57, %s2828_s7 }
 0x10b   : > { %v3250_v9 = vpop.permute.xlu1 %978  ;;  %v3252_v10 = vpop.permute.xlu0 %976 }
 0x10d   : > { %1176 = vrot.lane.b32.xlu1 %v1171_v4, %s2829_s8  ;;  %1174 = vrot.lane.b32.xlu0 %v1170_v5, %s2829_s8  ;;  %v365_v4 = vadd.f32 %v3170_v3, %v351_v58 }
 0x10f   : > { %v396_v22 = vpop.permute.xlu1 %395  ;;  %v394_v23 = vpop.permute.xlu0 %393  ;;  %v379_v14 = vadd.f32 %v3194_v20, %v365_v4 }
 0x111   : > { %1190 = vrot.lane.b32.xlu1 %v1185_v15, %s2828_s7  ;;  %1188 = vrot.lane.b32.xlu0 %v1184_v16, %s2828_s7  ;;  %v384_v15 = vmul.f32 %v382_v42, %v3067_v52  ;;  %v383_v16 = vmul.f32 %v382_v42, %v3070_v54 }
 0x113   : > { %v3269_v36 = vpop.permute.xlu1 %636  ;;  %v3271_v39 = vpop.permute.xlu0 %634  ;;  %v386_v21 = vadd.f32 %v384_v15, %v380_v11  ;;  %v385_v26 = vadd.f32 %v383_v16, %v379_v14 }
 0x115   : > { %1306 = vrot.lane.b32.xlu1 %v1301_v31, %s2829_s8  ;;  %1304 = vrot.lane.b32.xlu0 %v1300_v32, %s2829_s8  ;;  %v400_v27 = vadd.f32 %v396_v22, %v386_v21  ;;  %v399_v28 = vadd.f32 %v394_v23, %v385_v26  ;;  %v447_v31 = vstv %s2393_s17  ;;  %v3310_v32 = vstv %s276_s25  ;;  %s3405_s17 = sld [smem:[#allocation8 + $0x1b]]  ;;  %s678_s25 = sadd.s32 2, %s3294_s23 }
 0x116   : > { %v449_v40 = vmul.f32 %v447_v31, %v2996_v2  ;;  %v448_v45 = vmul.f32 %v447_v31, %v2993_v1  ;;  %v479_v22 = vstv %s2396_s9  ;;  %s3421_s6 = sld [smem:[#allocation6 + %s678_s25]] }
 0x117   : > { %v3281_v56 = vpop.permute.xlu1 %752  ;;  %v3283_v57 = vpop.permute.xlu0 %750  ;;  %v481_v15 = vmul.f32 %v479_v22, %v3017_v17  ;;  %v480_v16 = vmul.f32 %v479_v22, %v3020_v19  ;;  %s3428_s9 = sld [smem:[#allocation8 + $0x33]] }
 0x118   : > { %v463_v63 = vadd.f32 %v3144_v47, %v449_v40  ;;  %v462_v4 = vadd.f32 %v3146_v48, %v448_v45  ;;  %s3500_s25 = sld [smem:[#allocation8 + $0x6]] }
 0x119   : > { %1320 = vrot.lane.b32.xlu1 %v1315_v46, %s2828_s7  ;;  %1318 = vrot.lane.b32.xlu0 %v1314_v49, %s2828_s7 }
 0x11b   : > { %v3296_v5 = vpop.permute.xlu1 %992  ;;  %v3298_v6 = vpop.permute.xlu0 %990 }
 0x11f   : > { %v3306_v0 = vpop.permute.xlu1 %1108  ;;  %v3308_v3 = vpop.permute.xlu0 %1106 }
 0x123   : > { %v410_v18 = vpop.permute.xlu1 %409  ;;  %v408_v33 = vpop.permute.xlu0 %407 }
 0x124   : > { %v414_v20 = vadd.f32 %v410_v18, %v400_v27  ;;  %v413_v38 = vadd.f32 %v408_v33, %v399_v28  ;;  %v477_v27 = vadd.f32 %v3152_v53, %v463_v63  ;;  %v476_v28 = vadd.f32 %v3154_v55, %v462_v4 }
 0x126   : > { %v417_v46 = vmul.f32 %v3310_v32, %v414_v20  ;;  %v416_v49 = vmul.f32 %v3310_v32, %v413_v38  ;;  %v483_v33 = vadd.f32 %v481_v15, %v477_v27  ;;  %v482_v20 = vadd.f32 %v480_v16, %v476_v28 }
 0x127   : > { %v527_v37 = vpop.permute.xlu1 %526  ;;  %v525_v58 = vpop.permute.xlu0 %524  ;;  %v513_v38 = vstv %s2399_s10  ;;  %v2830_v16 = vmov 0.0   ;;  %s2831_s10 = smov 1  }
 0x128   : > { %v3316_v23 = vadd.f32 %v420_v43, %v417_v46  ;;  %v3318_v42 = vadd.f32 %v420_v43, %v416_v49  ;;  %v497_v43 = vadd.f32 %v3200_v24, %v483_v33  ;;  %v496_v40 = vadd.f32 %v3202_v25, %v482_v20  ;;  %291 = vst.msk [vmem:[#allocation2 + $0x8] sm:$0xff] %vm289_vm0, %v2830_v16 }
 0x129   : > { %v515_v49 = vmul.f32 %v513_v38, %v3067_v52  ;;  %v514_v22 = vmul.f32 %v513_v38, %v3070_v54  ;;  %v577_v24 = vstv %s2402_s11  ;;  %293 = vst.msk [vmem:[#allocation2 + $0x10] sm:$0x3] %vm292_vm1, %v2830_v16  ;;  %296 = vst.msk [vmem:[#allocation2 + $0x28] sm:$0x3] %vm292_vm1, %v2830_v16  ;;  %s3437_s11 = sld [smem:[#allocation8 + $0x4]] }
 0x12a   : > { %v424_v11 = vsub.f32 0.0, %v3316_v23  ;;  %v423_v14 = vsub.f32 0.0, %v3318_v42  ;;  %v511_v45 = vadd.f32 %v3224_v41, %v497_v43  ;;  %v510_v46 = vadd.f32 %v3226_v44, %v496_v40  ;;  %290 = vst.msk [vmem:[#allocation2] sm:$0xff] %vm289_vm0, %v2830_v16  ;;  %294 = vst.msk [vmem:[#allocation2 + $0x18] sm:$0xff] %vm289_vm0, %v2830_v16 }
 0x12b   : > { %v3326_v21 = vpop.permute.xlu1 %766  ;;  %v3328_v26 = vpop.permute.xlu0 %764  ;;  %v578_v41 = vmul.f32 %v577_v24, %v2993_v1  ;;  %295 = vst.msk [vmem:[#allocation2 + $0x20] sm:$0xff] %vm289_vm0, %v2830_v16  ;;  %297 = vst.msk [vmem:[#allocation2 + $0x30] sm:$0xff] %vm289_vm0, %v2830_v16  ;;  %v550_v40 = vstv %s3349_s30 }
 0x12c   : > { %v427_v47 = vmul.f32 1.442695, %v424_v11  ;;  %v425_v31 = vmul.f32 1.442695, %v423_v14  ;;  %v517_v4 = vadd.f32 %v515_v49, %v511_v45  ;;  %v516_v11 = vadd.f32 %v514_v22, %v510_v46  ;;  %298 = vst.msk [vmem:[#allocation2 + $0x38] sm:$0xff] %vm289_vm0, %v2830_v16  ;;  %300 = vst.msk [vmem:[#allocation2 + $0x48] sm:$0xff] %vm289_vm0, %v2830_v16 }
 0x12d   : > { %v579_v14 = vmul.f32 %v577_v24, %v2996_v2  ;;  %299 = vst.msk [vmem:[#allocation2 + $0x40] sm:$0x3] %vm292_vm1, %v2830_v16  ;;  %302 = vst.msk [vmem:[#allocation2 + $0x58] sm:$0x3] %vm292_vm1, %v2830_v16  ;;  %v592_v45 = vadd.f32 %v3162_v60, %v578_v41 }
 0x12e   : > { %2620 = vpow2.f32 %v427_v47  ;;  %v531_v44 = vadd.f32 %v527_v37, %v517_v4  ;;  %v530_v15 = vadd.f32 %v525_v58, %v516_v11  ;;  %301 = vst.msk [vmem:[#allocation2 + $0x50] sm:$0xff] %vm289_vm0, %v2830_v16  ;;  %303 = vst.msk [vmem:[#allocation2 + $0x60] sm:$0xff] %vm289_vm0, %v2830_v16  ;;  %v609_v47 = vstv %s3345_s14  ;;  %s808_s14 = sadd.s32 3, %s3294_s23 }
 0x12f   : > { %2622 = vpow2.f32 %v425_v31  ;;  %v3332_v48 = vpop.permute.xlu1 %882  ;;  %v3334_v18 = vpop.permute.xlu0 %880  ;;  %304 = vst.msk [vmem:[#allocation2 + $0x68] sm:$0xff] %vm289_vm0, %v2830_v16  ;;  %306 = vst.msk [vmem:[#allocation2 + $0x78] sm:$0xff] %vm289_vm0, %v2830_v16  ;;  %v593_v38 = vadd.f32 %v3160_v59, %v579_v14  ;;  %v611_v22 = vmul.f32 %v609_v47, %v3017_v17  ;;  %v610_v24 = vmul.f32 %v609_v47, %v3020_v19  ;;  %s3467_s30 = sld [smem:[#allocation6 + %s808_s14]] }
 0x130   : > { %305 = vst.msk [vmem:[#allocation2 + $0x70] sm:$0x3] %vm292_vm1, %v2830_v16  ;;  %308 = vst.msk [vmem:[#allocation2 + $0x88] sm:$0x3] %vm292_vm1, %v2830_v16  ;;  %v606_v60 = vadd.f32 %v3178_v8, %v592_v45  ;;  %v643_v8 = vstv %s3384_s12  ;;  %v707_v47 = vstv %s3387_s15  ;;  %s3477_s12 = sld [smem:[#allocation8 + $0x5]] }
 0x131   : > { %307 = vst.msk [vmem:[#allocation2 + $0x80] sm:$0xff] %vm289_vm0, %v2830_v16  ;;  %309 = vst.msk [vmem:[#allocation2 + $0x90] sm:$0xff] %vm289_vm0, %v2830_v16  ;;  %v607_v11 = vadd.f32 %v3176_v7, %v593_v38  ;;  %v645_v45 = vmul.f32 %v643_v8, %v3067_v52  ;;  %s3483_s15 = sld [smem:[#allocation8 + $0x34]] }
 0x132   : > { %310 = vst.msk [vmem:[#allocation2 + $0x98] sm:$0xff] %vm289_vm0, %v2830_v16  ;;  %312 = vst.msk [vmem:[#allocation2 + $0xa8] sm:$0xff] %vm289_vm0, %v2830_v16  ;;  %s3541_s14 = sld [smem:[#allocation8 + $0x1f]] }
 0x133   : > { %v3339_v53 = vpop.permute.xlu1 %1122  ;;  %v3341_v55 = vpop.permute.xlu0 %1120  ;;  %311 = vst.msk [vmem:[#allocation2 + $0xa0] sm:$0x3] %vm292_vm1, %v2830_v16  ;;  %314 = vst.msk [vmem:[#allocation2 + $0xb8] sm:$0x3] %vm292_vm1, %v2830_v16 }
 0x134   : > { %313 = vst.msk [vmem:[#allocation2 + $0xb0] sm:$0xff] %vm289_vm0, %v2830_v16 }
 0x137   : > { %v3351_v63 = vpop.permute.xlu1 %1238  ;;  %v3353_v25 = vpop.permute.xlu0 %1236 }
 0x13b   : > { %v2621_v37 = vpop.eup %2620  ;;  %v541_v58 = vpop.permute.xlu1 %540 }
 0x13c   : > { %v539_v27 = vpop.permute.xlu0 %538  ;;  %v2623_v28 = vpop.eup %2622  ;;  %v430_v31 = vadd.f32 1.0, %v2621_v37  ;;  %v545_v33 = vadd.f32 %v541_v58, %v531_v44  ;;  %v613_v58 = vadd.f32 %v611_v22, %v607_v11  ;;  %v739_v11 = vstv %s3405_s17  ;;  %s3496_s17 = sld [smem:[#allocation8 + $0x1d]] }
 0x13d   : > { %v544_v20 = vadd.f32 %v539_v27, %v530_v15  ;;  %v429_v43 = vadd.f32 1.0, %v2623_v28  ;;  %v612_v27 = vadd.f32 %v610_v24, %v606_v60 }
 0x13e   : > { %2624 = vrcp.f32 %v430_v31  ;;  %v547_v46 = vmul.f32 %v545_v33, %v3310_v32  ;;  %v627_v31 = vadd.f32 %v3232_v50, %v613_v58  ;;  %v709_v50 = vmul.f32 %v707_v47, %v2996_v2 }
 0x13f   : > { %v546_v49 = vmul.f32 %v544_v20, %v3310_v32  ;;  %2626 = vrcp.f32 %v429_v43  ;;  %v657_v59 = vpop.permute.xlu1 %656  ;;  %v626_v33 = vadd.f32 %v3234_v51, %v612_v27  ;;  %v708_v51 = vmul.f32 %v707_v47, %v2993_v1 }
 0x140   : > { %v655_v4 = vpop.permute.xlu0 %654  ;;  %v3395_v14 = vadd.f32 %v550_v40, %v547_v46  ;;  %v641_v43 = vadd.f32 %v3269_v36, %v627_v31  ;;  %v644_v46 = vmul.f32 %v643_v8, %v3070_v54  ;;  %v680_v8 = vstv %s3421_s6  ;;  %s3504_s6 = sld [smem:[#allocation8 + $0x1e]] }
 0x141   : > { %v3397_v41 = vadd.f32 %v550_v40, %v546_v49  ;;  %v640_v40 = vadd.f32 %v3271_v39, %v626_v33  ;;  %v722_v1 = vadd.f32 %v3186_v13, %v708_v51  ;;  %v740_v13 = vmul.f32 %v739_v11, %v3020_v19 }
 0x142   : > { %v554_v44 = vsub.f32 0.0, %v3395_v14  ;;  %v647_v39 = vadd.f32 %v645_v45, %v641_v43  ;;  %v773_v43 = vstv %s3428_s9  ;;  %s3508_s9 = sld [smem:[#allocation8 + $0x7]] }
 0x143   : > { %v553_v15 = vsub.f32 0.0, %v3397_v41  ;;  %v3401_v16 = vpop.permute.xlu1 %896  ;;  %v646_v60 = vadd.f32 %v644_v46, %v640_v40 }
 0x144   : > { %v3403_v37 = vpop.permute.xlu0 %894  ;;  %v557_v7 = vmul.f32 1.442695, %v554_v44  ;;  %v661_v58 = vadd.f32 %v657_v59, %v647_v39 }
 0x145   : > { %v555_v28 = vmul.f32 1.442695, %v553_v15  ;;  %v723_v15 = vadd.f32 %v3184_v12, %v709_v50  ;;  %v660_v27 = vadd.f32 %v655_v4, %v646_v60  ;;  %v837_v60 = vstv %s3437_s11  ;;  %s938_s11 = sadd.s32 4, %s3294_s23 }
 0x146   : > { %2628 = vpow2.f32 %v557_v7 }
 0x147   : > { %2630 = vpow2.f32 %v555_v28  ;;  %v3412_v20 = vpop.permute.xlu1 %1012  ;;  %v737_v7 = vadd.f32 %v3208_v29, %v723_v15  ;;  %v741_v28 = vmul.f32 %v739_v11, %v3017_v17  ;;  %v774_v15 = vmul.f32 %v773_v43, %v3070_v54 }
 0x148   : > { %v3414_v38 = vpop.permute.xlu0 %1010 }
 0x149   : > { %v743_v33 = vadd.f32 %v741_v28, %v737_v7  ;;  %v3470_v7 = vld [vmem:[%s2990_s26 + $0x8] sm:$0xff] }
 0x14a   : > { %v839_v28 = vmul.f32 %v3470_v7, %v837_v60 }
 0x14b   : > { %v2625_v49 = vpop.eup %2624  ;;  %v3424_v22 = vpop.permute.xlu1 %1252  ;;  %v757_v51 = vadd.f32 %v3281_v56, %v743_v33 }
 0x14c   : > { %v3426_v24 = vpop.permute.xlu0 %1250  ;;  %v2627_v36 = vpop.eup %2626  ;;  %v434_v44 = vmul.f32 %v2625_v49, %v3316_v23 }
 0x14d   : > { %v432_v2 = vmul.f32 %v2627_v36, %v3318_v42  ;;  %v736_v42 = vadd.f32 %v3210_v30, %v722_v1 }
 0x14e   : > { %439 = vrot.lane.b32.xlu1 %v434_v44, %s2831_s10  ;;  %v775_v44 = vmul.f32 %v773_v43, %v3067_v52  ;;  %v3474_v52 = vld [vmem:[%s2990_s26] sm:$0xff] }
 0x14f   : > { %437 = vrot.lane.b32.xlu0 %v432_v2, %s2831_s10  ;;  %v671_v12 = vpop.permute.xlu1 %670  ;;  %v742_v46 = vadd.f32 %v740_v13, %v736_v42  ;;  %v838_v54 = vmul.f32 %v3474_v52, %v837_v60  ;;  %v853_v13 = vadd.f32 %v3216_v34, %v839_v28 }
 0x150   : > { %v669_v23 = vpop.permute.xlu0 %668  ;;  %v675_v59 = vadd.f32 %v671_v12, %v661_v58  ;;  %v869_v12 = vstv %s3447_s13  ;;  %s3524_s13 = sld [smem:[#allocation8 + $0x35]] }
 0x151   : > { %v674_v4 = vadd.f32 %v669_v23, %v660_v27  ;;  %v756_v36 = vadd.f32 %v3283_v57, %v742_v46  ;;  %v771_v57 = vadd.f32 %v3326_v21, %v757_v51  ;;  %v867_v34 = vadd.f32 %v3240_v61, %v853_v13 }
 0x152   : > { %v677_v47 = vmul.f32 %v675_v59, %v3310_v32  ;;  %v852_v59 = vadd.f32 %v3218_v35, %v838_v54 }
 0x153   : > { %v676_v31 = vmul.f32 %v674_v4, %v3310_v32  ;;  %v2629_v29 = vpop.eup %2628  ;;  %v787_v17 = vpop.permute.xlu1 %786  ;;  %v770_v1 = vadd.f32 %v3328_v26, %v756_v36  ;;  %v777_v23 = vadd.f32 %v775_v44, %v771_v57 }
 0x154   : > { %v785_v40 = vpop.permute.xlu0 %784  ;;  %v2631_v45 = vpop.eup %2630  ;;  %v560_v30 = vadd.f32 1.0, %v2629_v29  ;;  %v3449_v19 = vadd.f32 %v680_v8, %v677_v47  ;;  %v3489_v47 = vld [vmem:[%s2990_s26 + $0x9] sm:$0xff]  ;;  %v3493_v29 = vld [vmem:[%s2990_s26 + $0x1] sm:$0xff]  ;;  %v866_v35 = vadd.f32 %v3242_v62, %v852_v59  ;;  %v999_v59 = vstv %s3496_s17 }
 0x155   : > { %v3451_v50 = vadd.f32 %v680_v8, %v676_v31  ;;  %v559_v49 = vadd.f32 1.0, %v2631_v45  ;;  %v776_v42 = vadd.f32 %v774_v15, %v770_v1  ;;  %v791_v4 = vadd.f32 %v787_v17, %v777_v23 }
 0x156   : > { %2632 = vrcp.f32 %v560_v30  ;;  %v684_v11 = vsub.f32 0.0, %v3449_v19  ;;  %v871_v31 = vmul.f32 %v3489_v47, %v869_v12  ;;  %v870_v33 = vmul.f32 %v3493_v29, %v869_v12 }
 0x157   : > { %v683_v39 = vsub.f32 0.0, %v3451_v50  ;;  %2634 = vrcp.f32 %v559_v49  ;;  %v3461_v2 = vpop.permute.xlu1 %1026  ;;  %v790_v8 = vadd.f32 %v785_v40, %v776_v42  ;;  %v810_v40 = vstv %s3467_s30  ;;  %s3547_s30 = sld [smem:[#allocation6 + %s938_s11]]  ;;  %s1328_s11 = sadd.s32 7, %s3294_s23 }
 0x158   : > { %v3463_v56 = vpop.permute.xlu0 %1024  ;;  %v687_v58 = vmul.f32 1.442695, %v684_v11  ;;  %v967_v30 = vstv %s3477_s12  ;;  %v903_v11 = vstv %s3483_s15  ;;  %v873_v60 = vadd.f32 %v871_v31, %v867_v34  ;;  %s3559_s12 = sld [smem:[#allocation8 + $0x36]]  ;;  %s1068_s15 = sadd.s32 5, %s3294_s23 }
 0x159   : > { %v685_v27 = vmul.f32 1.442695, %v683_v39  ;;  %v872_v44 = vadd.f32 %v870_v33, %v866_v35  ;;  %v969_v1 = vmul.f32 %v3470_v7, %v967_v30  ;;  %s3592_s17 = sld [smem:[#allocation6 + %s1068_s15]] }
 0x15a   : > { %2636 = vpow2.f32 %v687_v58  ;;  %v968_v58 = vmul.f32 %v3474_v52, %v967_v30  ;;  %v887_v54 = vadd.f32 %v3332_v48, %v873_v60  ;;  %s2457_s15 = sld [smem:[#allocation9 + $0x2]] }
 0x15b   : > { %2638 = vpow2.f32 %v685_v27  ;;  %v3479_v21 = vpop.permute.xlu1 %1142  ;;  %v886_v12 = vadd.f32 %v3334_v18, %v872_v44  ;;  %v983_v35 = vadd.f32 %v3250_v9, %v969_v1 }
 0x15c   : > { %v3481_v26 = vpop.permute.xlu0 %1140  ;;  %v901_v33 = vadd.f32 %v3401_v16, %v887_v54  ;;  %v982_v30 = vadd.f32 %v3252_v10, %v968_v58 }
 0x15d   : > { %v997_v16 = vadd.f32 %v3296_v5, %v983_v35 }
 0x15e   : > { %v996_v10 = vadd.f32 %v3298_v6, %v982_v30 }
 0x15f   : > { %v801_v43 = vpop.permute.xlu1 %800 }
 0x160   : > { %v799_v45 = vpop.permute.xlu0 %798  ;;  %v805_v46 = vadd.f32 %v801_v43, %v791_v4  ;;  %v3528_v4 = vld [vmem:[%s2990_s26 + $0xa] sm:$0xff]  ;;  %v900_v43 = vadd.f32 %v3403_v37, %v886_v12  ;;  %v1129_v37 = vstv %s3504_s6  ;;  %s1198_s6 = sadd.s32 6, %s3294_s23  ;;  %s2463_s23 = sld [smem:[#allocation9 + $0x8]] }
 0x161   : > { %v804_v17 = vadd.f32 %v799_v45, %v790_v8  ;;  %v3532_v8 = vld [vmem:[%s2990_s26 + $0x2] sm:$0xff]  ;;  %v1131_v1 = vmul.f32 %v3489_v47, %v1129_v37  ;;  %v1130_v6 = vmul.f32 %v3493_v29, %v1129_v37 }
 0x162   : > { %v807_v51 = vmul.f32 %v805_v46, %v3310_v32  ;;  %v904_v48 = vmul.f32 %v3532_v8, %v903_v11  ;;  %v1097_v46 = vstv %s3500_s25  ;;  %s3600_s25 = sld [smem:[#allocation8 + $0x37]] }
 0x163   : > { %v806_v49 = vmul.f32 %v804_v17, %v3310_v32  ;;  %v2633_v36 = vpop.eup %2632  ;;  %v917_v61 = vpop.permute.xlu1 %916  ;;  %v1099_v44 = vmul.f32 %v3470_v7, %v1097_v46  ;;  %v1098_v5 = vmul.f32 %v3474_v52, %v1097_v46 }
 0x164   : > { %v915_v39 = vpop.permute.xlu0 %914  ;;  %v2635_v62 = vpop.eup %2634  ;;  %v3511_v15 = vadd.f32 %v810_v40, %v807_v51  ;;  %v564_v27 = vmul.f32 %v2633_v36, %v3395_v14  ;;  %v905_v14 = vmul.f32 %v3528_v4, %v903_v11  ;;  %v1001_v51 = vmul.f32 %v3489_v47, %v999_v59 }
 0x165   : > { %v3513_v57 = vadd.f32 %v810_v40, %v806_v49  ;;  %v562_v28 = vmul.f32 %v2635_v62, %v3397_v41  ;;  %v1000_v49 = vmul.f32 %v3493_v29, %v999_v59  ;;  %v1227_v36 = vstv %s3508_s9  ;;  %s3613_s9 = sld [smem:[#allocation6 + %s1198_s6]] }
 0x166   : > { %v814_v23 = vsub.f32 0.0, %v3511_v15  ;;  %569 = vrot.lane.b32.xlu1 %v564_v27, %s2831_s10  ;;  %v907_v62 = vadd.f32 %v905_v14, %v901_v33  ;;  %v906_v60 = vadd.f32 %v904_v48, %v900_v43  ;;  %v1229_v54 = vmul.f32 %v3470_v7, %v1227_v36  ;;  %s2466_s6 = sld [smem:[#allocation9 + $0xb]] }
 0x167   : > { %v813_v42 = vsub.f32 0.0, %v3513_v57  ;;  %v2637_v13 = vpop.eup %2636  ;;  %567 = vrot.lane.b32.xlu0 %v562_v28, %s2831_s10  ;;  %v3537_v18 = vpop.permute.xlu1 %1156  ;;  %v1033_v28 = vstv %s3524_s13  ;;  %v1228_v12 = vmul.f32 %v3474_v52, %v1227_v36  ;;  %v1003_v59 = vadd.f32 %v1001_v51, %v997_v16  ;;  %s3630_s13 = sld [smem:[#allocation6 + %s1328_s11]] }
 0x168   : > { %v3539_v41 = vpop.permute.xlu0 %1154  ;;  %v2639_v31 = vpop.eup %2638  ;;  %v690_v45 = vadd.f32 1.0, %v2637_v13  ;;  %v817_v34 = vmul.f32 1.442695, %v814_v23  ;;  %v921_v58 = vadd.f32 %v917_v61, %v907_v62  ;;  %v920_v27 = vadd.f32 %v915_v39, %v906_v60  ;;  %s2467_s11 = sld [smem:[#allocation9 + $0xc]] }
 0x169   : > { %v689_v17 = vadd.f32 1.0, %v2639_v31  ;;  %v815_v40 = vmul.f32 1.442695, %v813_v42  ;;  %v1259_v23 = vstv %s3541_s14  ;;  %v1002_v14 = vadd.f32 %v1000_v49, %v996_v10  ;;  %s1356_s14 = sld [smem:[#allocation9]] }
 0x16a   : > { %2640 = vrcp.f32 %v690_v45  ;;  %v1113_v33 = vadd.f32 %v3306_v0, %v1099_v44  ;;  %v1112_v61 = vadd.f32 %v3308_v3, %v1098_v5  ;;  %v940_v39 = vstv %s3547_s30  ;;  %s2456_s30 = sld [smem:[#allocation9 + $0x1]] }
 0x16b   : > { %2642 = vrcp.f32 %v689_v17  ;;  %v3555_v11 = vpop.permute.xlu1 %1272  ;;  %v1035_v7 = vmul.f32 %v3528_v4, %v1033_v28  ;;  %v1017_v52 = vadd.f32 %v3412_v20, %v1003_v59  ;;  %v1016_v43 = vadd.f32 %v3414_v38, %v1002_v14 }
 0x16c   : > { %v3557_v9 = vpop.permute.xlu0 %1270  ;;  %2644 = vpow2.f32 %v817_v34  ;;  %v1127_v35 = vadd.f32 %v3339_v53, %v1113_v33  ;;  %v1126_v46 = vadd.f32 %v3341_v55, %v1112_v61  ;;  %v1034_v0 = vmul.f32 %v3532_v8, %v1033_v28 }
 0x16d   : > { %2646 = vpow2.f32 %v815_v40  ;;  %v1163_v40 = vstv %s3559_s12  ;;  %v1031_v30 = vadd.f32 %v3461_v2, %v1017_v52  ;;  %v1030_v20 = vadd.f32 %v3463_v56, %v1016_v43  ;;  %s2464_s12 = sld [smem:[#allocation9 + $0x9]] }
 0x16e   : > { %v1243_v49 = vadd.f32 %v3351_v63, %v1229_v54  ;;  %v1261_v16 = vmul.f32 %v3489_v47, %v1259_v23  ;;  %v1260_v53 = vmul.f32 %v3493_v29, %v1259_v23  ;;  %v1165_v2 = vmul.f32 %v3528_v4, %v1163_v40 }
 0x16f   : > { %v931_v42 = vpop.permute.xlu1 %930  ;;  %v1164_v56 = vmul.f32 %v3532_v8, %v1163_v40  ;;  %v1242_v10 = vadd.f32 %v3353_v25, %v1228_v12  ;;  %v1133_v63 = vadd.f32 %v1131_v1, %v1127_v35  ;;  %v1132_v60 = vadd.f32 %v1130_v6, %v1126_v46 }
 0x170   : > { %v929_v13 = vpop.permute.xlu0 %928  ;;  %v935_v48 = vadd.f32 %v931_v42, %v921_v58  ;;  %v1257_v62 = vadd.f32 %v3424_v22, %v1243_v49  ;;  %v1036_v28 = vadd.f32 %v1034_v0, %v1030_v20  ;;  %v1070_v33 = vstv %s3592_s17  ;;  %s2465_s17 = sld [smem:[#allocation9 + $0xa]] }
 0x171   : > { %v934_v31 = vadd.f32 %v929_v13, %v920_v27  ;;  %v1037_v27 = vadd.f32 %v1035_v7, %v1031_v30  ;;  %v1147_v23 = vadd.f32 %v3479_v21, %v1133_v63  ;;  %v1146_v42 = vadd.f32 %v3481_v26, %v1132_v60 }
 0x172   : > { %v937_v45 = vmul.f32 %v935_v48, %v3310_v32  ;;  %v1256_v59 = vadd.f32 %v3426_v24, %v1242_v10  ;;  %v1263_v61 = vadd.f32 %v1261_v16, %v1257_v62  ;;  %v1293_v43 = vstv %s3600_s25  ;;  %s2458_s25 = sld [smem:[#allocation9 + $0x3]] }
 0x173   : > { %v936_v34 = vmul.f32 %v934_v31, %v3310_v32  ;;  %v1047_v17 = vpop.permute.xlu1 %1046  ;;  %v1161_v48 = vadd.f32 %v3537_v18, %v1147_v23  ;;  %v1160_v21 = vadd.f32 %v3539_v41, %v1146_v42 }
 0x174   : > { %v1045_v3 = vpop.permute.xlu0 %1044  ;;  %v3585_v51 = vadd.f32 %v940_v39, %v937_v45  ;;  %v1051_v6 = vadd.f32 %v1047_v17, %v1037_v27  ;;  %v1277_v46 = vadd.f32 %v3555_v11, %v1263_v61 }
 0x175   : > { %v3587_v38 = vadd.f32 %v940_v39, %v936_v34  ;;  %v1050_v13 = vadd.f32 %v1045_v3, %v1036_v28  ;;  %v1262_v39 = vadd.f32 %v1260_v53, %v1256_v59  ;;  %v1167_v41 = vadd.f32 %v1165_v2, %v1161_v48 }
 0x176   : > { %v944_v55 = vsub.f32 0.0, %v3585_v51  ;;  %v1166_v35 = vadd.f32 %v1164_v56, %v1160_v21 }
 0x177   : > { %v943_v36 = vsub.f32 0.0, %v3587_v38  ;;  %v2641_v37 = vpop.eup %2640  ;;  %v1287_v47 = vpop.permute.xlu1 %1286  ;;  %v1276_v17 = vadd.f32 %v3557_v9, %v1262_v39 }
 0x178   : > { %v1285_v44 = vpop.permute.xlu0 %1284  ;;  %v2643_v29 = vpop.eup %2642  ;;  %v947_v5 = vmul.f32 1.442695, %v944_v55  ;;  %v694_v25 = vmul.f32 %v2641_v37, %v3449_v19  ;;  %v1291_v20 = vadd.f32 %v1287_v47, %v1277_v46  ;;  %v1295_v55 = vmul.f32 %v3528_v4, %v1293_v43 }
 0x179   : > { %v945_v58 = vmul.f32 1.442695, %v943_v36  ;;  %v2645_v54 = vpop.eup %2644  ;;  %v692_v22 = vmul.f32 %v2643_v29, %v3451_v50  ;;  %v1290_v49 = vadd.f32 %v1285_v44, %v1276_v17  ;;  %v1294_v36 = vmul.f32 %v3532_v8, %v1293_v43 }
 0x17a   : > { %v2647_v1 = vpop.eup %2646  ;;  %v820_v12 = vadd.f32 1.0, %v2645_v54  ;;  %2648 = vpow2.f32 %v947_v5  ;;  %699 = vrot.lane.b32.xlu1 %v694_v25, %s2831_s10  ;;  %v1200_v37 = vstv %s3613_s9  ;;  %v1297_v60 = vadd.f32 %v1295_v55, %v1291_v20  ;;  %s2459_s9 = sld [smem:[#allocation9 + $0x4]] }
 0x17b   : > { %v819_v14 = vadd.f32 1.0, %v2647_v1  ;;  %2650 = vpow2.f32 %v945_v58  ;;  %697 = vrot.lane.b32.xlu0 %v692_v22, %s2831_s10  ;;  %v1061_v19 = vpop.permute.xlu1 %1060  ;;  %v1296_v44 = vadd.f32 %v1294_v36, %v1290_v49 }
 0x17c   : > { %v1059_v50 = vpop.permute.xlu0 %1058  ;;  %2652 = vrcp.f32 %v820_v12  ;;  %v1065_v26 = vadd.f32 %v1061_v19, %v1051_v6 }
 0x17d   : > { %v1064_v31 = vadd.f32 %v1059_v50, %v1050_v13  ;;  %2654 = vrcp.f32 %v819_v14  ;;  %v1330_v50 = vstv %s3630_s13  ;;  %s2460_s13 = sld [smem:[#allocation9 + $0x5]] }
 0x17e   : > { %v1067_v24 = vmul.f32 %v1065_v26, %v3310_v32 }
 0x17f   : > { %v1066_v18 = vmul.f32 %v1064_v31, %v3310_v32  ;;  %v1177_v7 = vpop.permute.xlu1 %1176 }
 0x180   : > { %v1175_v52 = vpop.permute.xlu0 %1174  ;;  %v3618_v45 = vadd.f32 %v1070_v33, %v1067_v24  ;;  %v1181_v40 = vadd.f32 %v1177_v7, %v1167_v41 }
 0x181   : > { %v3620_v34 = vadd.f32 %v1070_v33, %v1066_v18  ;;  %v1180_v30 = vadd.f32 %v1175_v52, %v1166_v35 }
 0x182   : > { %v1074_v0 = vsub.f32 0.0, %v3618_v45 }
 0x183   : > { %v1073_v3 = vsub.f32 0.0, %v3620_v34  ;;  %v1191_v16 = vpop.permute.xlu1 %1190 }
 0x184   : > { %v1189_v53 = vpop.permute.xlu0 %1188  ;;  %v1077_v2 = vmul.f32 1.442695, %v1074_v0  ;;  %v1195_v56 = vadd.f32 %v1191_v16, %v1181_v40 }
 0x185   : > { %v1075_v11 = vmul.f32 1.442695, %v1073_v3  ;;  %v1194_v9 = vadd.f32 %v1189_v53, %v1180_v30 }
 0x186   : > { %2656 = vpow2.f32 %v1077_v2  ;;  %v1197_v10 = vmul.f32 %v1195_v56, %v3310_v32 }
 0x187   : > { %v1196_v62 = vmul.f32 %v1194_v9, %v3310_v32  ;;  %v2649_v63 = vpop.eup %2648  ;;  %2658 = vpow2.f32 %v1075_v11  ;;  %v1307_v47 = vpop.permute.xlu1 %1306 }
 0x188   : > { %v1305_v4 = vpop.permute.xlu0 %1304  ;;  %v2651_v29 = vpop.eup %2650  ;;  %v950_v8 = vadd.f32 1.0, %v2649_v63  ;;  %v3634_v5 = vadd.f32 %v1200_v37, %v1197_v10  ;;  %v1311_v54 = vadd.f32 %v1307_v47, %v1297_v60 }
 0x189   : > { %v3636_v58 = vadd.f32 %v1200_v37, %v1196_v62  ;;  %v2653_v27 = vpop.eup %2652  ;;  %v949_v28 = vadd.f32 1.0, %v2651_v29  ;;  %v1310_v23 = vadd.f32 %v1305_v4, %v1296_v44  ;;  %v1421_v62 = vstv %s2463_s23  ;;  %s2468_s23 = sld [smem:[#allocation9 + $0xd]] }
 0x18a   : > { %v2655_v42 = vpop.eup %2654  ;;  %2660 = vrcp.f32 %v950_v8  ;;  %v1204_v25 = vsub.f32 0.0, %v3634_v5  ;;  %v824_v1 = vmul.f32 %v2653_v27, %v3511_v15  ;;  %v1359_v8 = vstv %s1356_s14  ;;  %s2461_s14 = sld [smem:[#allocation9 + $0x6]] }
 0x18b   : > { %v1203_v22 = vsub.f32 0.0, %v3636_v58  ;;  %2662 = vrcp.f32 %v949_v28  ;;  %v822_v12 = vmul.f32 %v2655_v42, %v3513_v57  ;;  %v1321_v6 = vpop.permute.xlu1 %1320 }
 0x18c   : > { %v1319_v13 = vpop.permute.xlu0 %1318  ;;  %v1207_v59 = vmul.f32 1.442695, %v1204_v25  ;;  %829 = vrot.lane.b32.xlu1 %v824_v1, %s2831_s10  ;;  %v1325_v48 = vadd.f32 %v1321_v6, %v1311_v54 }
 0x18d   : > { %v1205_v14 = vmul.f32 1.442695, %v1203_v22  ;;  %v1324_v19 = vadd.f32 %v1319_v13, %v1310_v23  ;;  %827 = vrot.lane.b32.xlu0 %v822_v12, %s2831_s10 }
 0x18e   : > { %2664 = vpow2.f32 %v1207_v59  ;;  %v1327_v21 = vmul.f32 %v1325_v48, %v3310_v32  ;;  %v1449_v48 = vstv %s2465_s17  ;;  %s2471_s17 = sld [smem:[#allocation9 + $0x10]] }
 0x18f   : > { %v1326_v26 = vmul.f32 %v1324_v19, %v3310_v32  ;;  %2666 = vpow2.f32 %v1205_v14  ;;  %v1375_v14 = vstv %s2457_s15  ;;  %s2470_s15 = sld [smem:[#allocation9 + $0xf]] }
 0x190   : > { %v1332_v15 = vadd.f32 %v1330_v50, %v1327_v21 }
 0x191   : > { %v1331_v31 = vadd.f32 %v1330_v50, %v1326_v26 }
 0x192   : > { %v1334_v57 = vsub.f32 0.0, %v1332_v15 }
 0x193   : > { %v1333_v33 = vsub.f32 0.0, %v1331_v31  ;;  %v2657_v24 = vpop.eup %2656 }
 0x194   : > { %v2659_v18 = vpop.eup %2658  ;;  %v1080_v61 = vadd.f32 1.0, %v2657_v24  ;;  %v1337_v39 = vmul.f32 1.442695, %v1334_v57 }
 0x195   : > { %v1079_v7 = vadd.f32 1.0, %v2659_v18  ;;  %v1335_v52 = vmul.f32 1.442695, %v1333_v33 }
 0x196   : > { %2668 = vrcp.f32 %v1080_v61  ;;  %v1383_v61 = vstv %s2458_s25  ;;  %s2472_s25 = sld [smem:[#allocation9 + $0x11]] }
 0x197   : > { %v2661_v43 = vpop.eup %2660  ;;  %2670 = vrcp.f32 %v1079_v7 }
 0x198   : > { %v2663_v41 = vpop.eup %2662  ;;  %2672 = vpow2.f32 %v1337_v39  ;;  %v954_v35 = vmul.f32 %v2661_v43, %v3585_v51  ;;  %v1463_v39 = vstv %s2466_s6  ;;  %s2473_s6 = sld [smem:[#allocation9 + $0x12]] }
 0x199   : > { %2674 = vpow2.f32 %v1335_v52  ;;  %v952_v32 = vmul.f32 %v2663_v41, %v3587_v38 }
 0x19a   : > { %959 = vrot.lane.b32.xlu1 %v954_v35, %s2831_s10 }
 0x19b   : > { %v2665_v46 = vpop.eup %2664  ;;  %957 = vrot.lane.b32.xlu0 %v952_v32, %s2831_s10 }
 0x19c   : > { %v2667_v17 = vpop.eup %2666  ;;  %v1210_v0 = vadd.f32 1.0, %v2665_v46 }
 0x19d   : > { %v1209_v3 = vadd.f32 1.0, %v2667_v17 }
 0x19e   : > { %2676 = vrcp.f32 %v1210_v0 }
 0x19f   : > { %2678 = vrcp.f32 %v1209_v3 }
 0x1a3   : > { %v2669_v40 = vpop.eup %2668 }
 0x1a4   : > { %v2671_v30 = vpop.eup %2670  ;;  %v1084_v20 = vmul.f32 %v2669_v40, %v3618_v45  ;;  %v1391_v40 = vstv %s2459_s9  ;;  %s2474_s9 = sld [smem:[#allocation9 + $0x13]] }
 0x1a5   : > { %v2673_v49 = vpop.eup %2672  ;;  %v1082_v51 = vmul.f32 %v2671_v30, %v3620_v34  ;;  %v1477_v30 = vstv %s2467_s11  ;;  %s2475_s11 = sld [smem:[#allocation9 + $0x14]] }
 0x1a6   : > { %v2675_v16 = vpop.eup %2674  ;;  %v1340_v53 = vadd.f32 1.0, %v2673_v49  ;;  %1089 = vrot.lane.b32.xlu1 %v1084_v20, %s2831_s10 }
 0x1a7   : > { %v1339_v38 = vadd.f32 1.0, %v2675_v16  ;;  %1087 = vrot.lane.b32.xlu0 %v1082_v51, %s2831_s10 }
 0x1a8   : > { %2680 = vrcp.f32 %v1340_v53 }
 0x1a9   : > { %2682 = vrcp.f32 %v1339_v38 }
 0x1ab   : > { %v2677_v55 = vpop.eup %2676 }
 0x1ac   : > { %v2679_v36 = vpop.eup %2678  ;;  %v1214_v2 = vmul.f32 %v2677_v55, %v3634_v5  ;;  %v1367_v5 = vstv %s2456_s30  ;;  %s2469_s30 = sld [smem:[#allocation9 + $0xe]] }
 0x1ad   : > { %v1212_v11 = vmul.f32 %v2679_v36, %v3636_v58  ;;  %v1435_v58 = vstv %s2464_s12  ;;  %s2462_s12 = sld [smem:[#allocation9 + $0x7]] }
 0x1ae   : > { %1219 = vrot.lane.b32.xlu1 %v1214_v2, %s2831_s10 }
 0x1af   : > { %1217 = vrot.lane.b32.xlu0 %v1212_v11, %s2831_s10 }
 0x1b5   : > { %v2681_v45 = vpop.eup %2680 }
 0x1b6   : > { %v2683_v34 = vpop.eup %2682  ;;  %v1344_v56 = vmul.f32 %v2681_v45, %v1332_v15  ;;  %v1399_v45 = vstv %s2460_s13  ;;  %s2476_s13 = sld [smem:[#allocation9 + $0x15]] }
 0x1b7   : > { %v1342_v9 = vmul.f32 %v2683_v34, %v1331_v31  ;;  %v1491_v34 = vstv %s2468_s23  ;;  %s2477_s23 = sld [smem:[#allocation9 + $0x16]] }
 0x1b8   : > { %1349 = vrot.lane.b32.xlu1 %v1344_v56, %s2831_s10 }
 0x1b9   : > { %1347 = vrot.lane.b32.xlu0 %v1342_v9, %s2831_s10 }
 0x1c0   : > { %v440_v37 = vpop.permute.xlu1 %439 }
 0x1c1   : > { %445 = vst.msk [vmem:[#allocation2 + $0x9] sm:$0xff] %vm443_vm2, %v440_v37  ;;  %v438_v10 = vpop.permute.xlu0 %437 }
 0x1c2   : > { %444 = vst.msk [vmem:[#allocation2 + $0x1] sm:$0xff] %vm443_vm2, %v438_v10 }
 0x1c9   : > { %v3663_v63 = vld [vmem:[#allocation2] sm:$0xff]  ;;  %v3665_v60 = vld [vmem:[#allocation2 + $0x8] sm:$0xff] }
 0x1ca   : > { %v1423_v47 = vmul.f32 %v1421_v62, %v3665_v60  ;;  %v1422_v44 = vmul.f32 %v1421_v62, %v3663_v63  ;;  %v1360_v27 = vmul.f32 %v1359_v8, %v3663_v63  ;;  %v1361_v28 = vmul.f32 %v1359_v8, %v3665_v60 }
 0x1cc   : > { %1428 = vrot.lane.b32.xlu1 %v1423_v47, %s2829_s8  ;;  %1426 = vrot.lane.b32.xlu0 %v1422_v44, %s2829_s8 }
 0x1d8   : > { %v570_v4 = vpop.permute.xlu1 %569 }
 0x1d9   : > { %v568_v29 = vpop.permute.xlu0 %567  ;;  %575 = vst.msk [vmem:[#allocation2 + $0x21] sm:$0xff] %vm443_vm2, %v570_v4 }
 0x1da   : > { %574 = vst.msk [vmem:[#allocation2 + $0x19] sm:$0xff] %vm443_vm2, %v568_v29 }
 0x1e1   : > { %v3675_v54 = vld [vmem:[#allocation2 + $0x18] sm:$0xff]  ;;  %v3677_v23 = vld [vmem:[#allocation2 + $0x20] sm:$0xff] }
 0x1e2   : > { %v1368_v42 = vmul.f32 %v1367_v5, %v3675_v54  ;;  %v1369_v25 = vmul.f32 %v1367_v5, %v3677_v23  ;;  %v1437_v22 = vmul.f32 %v1435_v58, %v3677_v23  ;;  %v1436_v1 = vmul.f32 %v1435_v58, %v3675_v54 }
 0x1e3   : > { %v1407_v5 = vstv %s2461_s14  ;;  %v1505_v58 = vstv %s2469_s30  ;;  %s2478_s14 = sld [smem:[#allocation9 + $0x17]] }
 0x1e4   : > { %v1370_v12 = vadd.f32 %v1368_v42, %v1360_v27  ;;  %v1371_v6 = vadd.f32 %v1369_v25, %v1361_v28  ;;  %1442 = vrot.lane.b32.xlu1 %v1437_v22, %s2829_s8  ;;  %1440 = vrot.lane.b32.xlu0 %v1436_v1, %s2829_s8  ;;  %s2487_s30 = sld [smem:[#allocation9 + $0x20]] }
 0x1ec   : > { %v700_v13 = vpop.permute.xlu1 %699 }
 0x1ed   : > { %v698_v59 = vpop.permute.xlu0 %697  ;;  %705 = vst.msk [vmem:[#allocation2 + $0x39] sm:$0xff] %vm443_vm2, %v700_v13 }
 0x1ee   : > { %704 = vst.msk [vmem:[#allocation2 + $0x31] sm:$0xff] %vm443_vm2, %v698_v59 }
 0x1f5   : > { %v3687_v19 = vld [vmem:[#allocation2 + $0x30] sm:$0xff]  ;;  %v3689_v50 = vld [vmem:[#allocation2 + $0x38] sm:$0xff] }
 0x1f6   : > { %v1376_v21 = vmul.f32 %v1375_v14, %v3687_v19  ;;  %v1377_v26 = vmul.f32 %v1375_v14, %v3689_v50  ;;  %v1451_v15 = vmul.f32 %v1449_v48, %v3689_v50  ;;  %v1450_v31 = vmul.f32 %v1449_v48, %v3687_v19 }
 0x1f7   : > { %v1415_v14 = vstv %s2462_s12  ;;  %v1519_v48 = vstv %s2470_s15  ;;  %s2488_s12 = sld [smem:[#allocation9 + $0x21]] }
 0x1f8   : > { %v1378_v57 = vadd.f32 %v1376_v21, %v1370_v12  ;;  %v1379_v33 = vadd.f32 %v1377_v26, %v1371_v6  ;;  %1456 = vrot.lane.b32.xlu1 %v1451_v15, %s2829_s8  ;;  %1454 = vrot.lane.b32.xlu0 %v1450_v31, %s2829_s8  ;;  %s2489_s15 = sld [smem:[#allocation9 + $0x22]] }
 0x1fe   : > { %v830_v24 = vpop.permute.xlu1 %829 }
 0x1ff   : > { %835 = vst.msk [vmem:[#allocation2 + $0x51] sm:$0xff] %vm443_vm2, %v830_v24  ;;  %v828_v18 = vpop.permute.xlu0 %827  ;;  %v1533_v24 = vstv %s2471_s17  ;;  %s2490_s17 = sld [smem:[#allocation9 + $0x23]] }
 0x200   : > { %834 = vst.msk [vmem:[#allocation2 + $0x49] sm:$0xff] %vm443_vm2, %v828_v18 }
 0x207   : > { %v3699_v7 = vld [vmem:[#allocation2 + $0x48] sm:$0xff]  ;;  %v3701_v52 = vld [vmem:[#allocation2 + $0x50] sm:$0xff] }
 0x208   : > { %v1384_v43 = vmul.f32 %v1383_v61, %v3699_v7  ;;  %v1385_v41 = vmul.f32 %v1383_v61, %v3701_v52  ;;  %v1465_v35 = vmul.f32 %v1463_v39, %v3701_v52  ;;  %v1464_v32 = vmul.f32 %v1463_v39, %v3699_v7 }
 0x209   : > { %v1535_v39 = vmul.f32 %v1533_v24, %v3665_v60 }
 0x20a   : > { %v1386_v46 = vadd.f32 %v1384_v43, %v1378_v57  ;;  %v1387_v17 = vadd.f32 %v1385_v41, %v1379_v33  ;;  %1470 = vrot.lane.b32.xlu1 %v1465_v35, %s2829_s8  ;;  %1468 = vrot.lane.b32.xlu0 %v1464_v32, %s2829_s8  ;;  %v1534_v43 = vmul.f32 %v1533_v24, %v3663_v63  ;;  %v1547_v41 = vstv %s2472_s25  ;;  %s2491_s25 = sld [smem:[#allocation9 + $0x24]] }
 0x20b   : > { %v1549_v35 = vmul.f32 %v1547_v41, %v3677_v23  ;;  %v1548_v32 = vmul.f32 %v1547_v41, %v3675_v54 }
 0x20c   : > { %v960_v0 = vpop.permute.xlu1 %959 }
 0x20d   : > { %965 = vst.msk [vmem:[#allocation2 + $0x69] sm:$0xff] %vm443_vm2, %v960_v0  ;;  %v958_v3 = vpop.permute.xlu0 %957  ;;  %v1589_v0 = vstv %s2475_s11  ;;  %s2494_s11 = sld [smem:[#allocation9 + $0x27]] }
 0x20e   : > { %964 = vst.msk [vmem:[#allocation2 + $0x61] sm:$0xff] %vm443_vm2, %v958_v3  ;;  %v1603_v3 = vstv %s2476_s13  ;;  %s2495_s13 = sld [smem:[#allocation9 + $0x28]] }
 0x215   : > { %v3711_v20 = vld [vmem:[#allocation2 + $0x60] sm:$0xff]  ;;  %v3713_v49 = vld [vmem:[#allocation2 + $0x68] sm:$0xff] }
 0x216   : > { %v1392_v51 = vmul.f32 %v1391_v40, %v3711_v20  ;;  %v1393_v16 = vmul.f32 %v1391_v40, %v3713_v49  ;;  %v1479_v53 = vmul.f32 %v1477_v30, %v3713_v49  ;;  %v1478_v38 = vmul.f32 %v1477_v30, %v3711_v20 }
 0x217   : > { %v1617_v40 = vstv %s2477_s23  ;;  %s2496_s23 = sld [smem:[#allocation9 + $0x29]] }
 0x218   : > { %v1394_v55 = vadd.f32 %v1392_v51, %v1386_v46  ;;  %v1395_v36 = vadd.f32 %v1393_v16, %v1387_v17  ;;  %1484 = vrot.lane.b32.xlu1 %v1479_v53, %s2829_s8  ;;  %1482 = vrot.lane.b32.xlu0 %v1478_v38, %s2829_s8  ;;  %v1090_v2 = vpop.permute.xlu1 %1089  ;;  %v1561_v46 = vstv %s2473_s6  ;;  %v1575_v17 = vstv %s2474_s9  ;;  %v3781_v53 = vld [vmem:[#allocation2 + $0x9] sm:$0xff]  ;;  %s2492_s6 = sld [smem:[#allocation9 + $0x25]] }
 0x219   : > { %1095 = vst.msk [vmem:[#allocation2 + $0x81] sm:$0xff] %vm443_vm2, %v1090_v2  ;;  %v1088_v11 = vpop.permute.xlu0 %1087  ;;  %v1563_v60 = vmul.f32 %v1561_v46, %v3689_v50  ;;  %v1562_v63 = vmul.f32 %v1561_v46, %v3687_v19  ;;  %v1577_v23 = vmul.f32 %v1575_v17, %v3701_v52  ;;  %v1576_v54 = vmul.f32 %v1575_v17, %v3699_v7  ;;  %s2493_s9 = sld [smem:[#allocation9 + $0x26]] }
 0x21a   : > { %1094 = vst.msk [vmem:[#allocation2 + $0x79] sm:$0xff] %vm443_vm2, %v1088_v11  ;;  %v1591_v50 = vmul.f32 %v1589_v0, %v3713_v49  ;;  %v1590_v19 = vmul.f32 %v1589_v0, %v3711_v20  ;;  %v1631_v49 = vstv %s2478_s14  ;;  %v1709_v38 = vstv %s2487_s30  ;;  %v3789_v11 = vld [vmem:[#allocation2 + $0x21] sm:$0xff]  ;;  %s2497_s14 = sld [smem:[#allocation9 + $0x2a]] }
 0x21b   : > { %s2498_s30 = sld [smem:[#allocation9 + $0x2b]] }
 0x220   : > { %v1220_v56 = vpop.permute.xlu1 %1219 }
 0x221   : > { %v3723_v9 = vld [vmem:[#allocation2 + $0x78] sm:$0xff]  ;;  %v3725_v37 = vld [vmem:[#allocation2 + $0x80] sm:$0xff]  ;;  %1225 = vst.msk [vmem:[#allocation2 + $0x99] sm:$0xff] %vm443_vm2, %v1220_v56  ;;  %v1218_v10 = vpop.permute.xlu0 %1217 }
 0x222   : > { %v1400_v62 = vmul.f32 %v1399_v45, %v3723_v9  ;;  %v1401_v47 = vmul.f32 %v1399_v45, %v3725_v37  ;;  %1224 = vst.msk [vmem:[#allocation2 + $0x91] sm:$0xff] %vm443_vm2, %v1218_v10  ;;  %v1493_v44 = vmul.f32 %v1491_v34, %v3725_v37  ;;  %v1492_v4 = vmul.f32 %v1491_v34, %v3723_v9  ;;  %v3791_v34 = vld [vmem:[#allocation2 + $0x19] sm:$0xff] }
 0x223   : > { %v1605_v52 = vmul.f32 %v1603_v3, %v3725_v37  ;;  %v1604_v7 = vmul.f32 %v1603_v3, %v3723_v9  ;;  %v1723_v45 = vstv %s2488_s12  ;;  %v3797_v37 = vld [vmem:[#allocation2 + $0x39] sm:$0xff]  ;;  %v1737_v10 = vstv %s2489_s15  ;;  %s2499_s12 = sld [smem:[#allocation9 + $0x2c]] }
 0x224   : > { %v1402_v29 = vadd.f32 %v1400_v62, %v1394_v55  ;;  %v1403_v8 = vadd.f32 %v1401_v47, %v1395_v36  ;;  %1498 = vrot.lane.b32.xlu1 %v1493_v44, %s2829_s8  ;;  %1496 = vrot.lane.b32.xlu0 %v1492_v4, %s2829_s8  ;;  %v3783_v55 = vld [vmem:[#allocation2 + $0x1] sm:$0xff]  ;;  %v1711_v36 = vmul.f32 %v1709_v38, %v3781_v53  ;;  %v3799_v62 = vld [vmem:[#allocation2 + $0x31] sm:$0xff]  ;;  %s2500_s15 = sld [smem:[#allocation9 + $0x2d]] }
 0x225   : > { %v1710_v2 = vmul.f32 %v1709_v38, %v3783_v55  ;;  %v1725_v56 = vmul.f32 %v1723_v45, %v3789_v11  ;;  %v1724_v9 = vmul.f32 %v1723_v45, %v3791_v34  ;;  %v1739_v47 = vmul.f32 %v1737_v10, %v3797_v37  ;;  %v3805_v4 = vld [vmem:[#allocation2 + $0x51] sm:$0xff] }
 0x226   : > { %v1738_v44 = vmul.f32 %v1737_v10, %v3799_v62 }
 0x229   : > { %v3735_v27 = vld [vmem:[#allocation2 + $0x90] sm:$0xff]  ;;  %v3737_v28 = vld [vmem:[#allocation2 + $0x98] sm:$0xff] }
 0x22a   : > { %v1408_v42 = vmul.f32 %v1407_v5, %v3735_v27  ;;  %v1409_v25 = vmul.f32 %v1407_v5, %v3737_v28  ;;  %v1350_v22 = vpop.permute.xlu1 %1349  ;;  %v1507_v1 = vmul.f32 %v1505_v58, %v3737_v28  ;;  %v1506_v12 = vmul.f32 %v1505_v58, %v3735_v27 }
 0x22b   : > { %1355 = vst.msk [vmem:[#allocation2 + $0xb1] sm:$0xff] %vm443_vm2, %v1350_v22  ;;  %v1348_v6 = vpop.permute.xlu0 %1347  ;;  %v1619_v30 = vmul.f32 %v1617_v40, %v3737_v28  ;;  %v1618_v20 = vmul.f32 %v1617_v40, %v3735_v27  ;;  %v3813_v27 = vld [vmem:[#allocation2 + $0x69] sm:$0xff]  ;;  %v1765_v28 = vstv %s2491_s25  ;;  %s2502_s25 = sld [smem:[#allocation9 + $0x2f]] }
 0x22c   : > { %v1410_v13 = vadd.f32 %v1408_v42, %v1402_v29  ;;  %v1411_v59 = vadd.f32 %v1409_v25, %v1403_v8  ;;  %1354 = vst.msk [vmem:[#allocation2 + $0xa9] sm:$0xff] %vm443_vm2, %v1348_v6  ;;  %1512 = vrot.lane.b32.xlu1 %v1507_v1, %s2829_s8  ;;  %1510 = vrot.lane.b32.xlu0 %v1506_v12, %s2829_s8  ;;  %v1751_v29 = vstv %s2490_s17  ;;  %v3807_v8 = vld [vmem:[#allocation2 + $0x49] sm:$0xff]  ;;  %v3815_v42 = vld [vmem:[#allocation2 + $0x61] sm:$0xff]  ;;  %v1779_v12 = vstv %s2492_s6  ;;  %v3823_v6 = vld [vmem:[#allocation2 + $0x79] sm:$0xff]  ;;  %s2501_s17 = sld [smem:[#allocation9 + $0x2e]] }
 0x22d   : > { %v1753_v5 = vmul.f32 %v1751_v29, %v3805_v4  ;;  %v1752_v58 = vmul.f32 %v1751_v29, %v3807_v8  ;;  %v1767_v25 = vmul.f32 %v1765_v28, %v3813_v27  ;;  %v1766_v22 = vmul.f32 %v1765_v28, %v3815_v42  ;;  %v3821_v1 = vld [vmem:[#allocation2 + $0x81] sm:$0xff]  ;;  %s2511_s6 = sld [smem:[#allocation9 + $0x38]] }
 0x231   : > { %v1919_v45 = vstv %s2502_s25  ;;  %s3990_s25 = sld [smem:[#allocation9 + $0x42]] }
 0x233   : > { %v1413_v21 = vld [vmem:[#allocation2 + $0xa8] sm:$0xff]  ;;  %v1414_v26 = vld [vmem:[#allocation2 + $0xb0] sm:$0xff]  ;;  %v1997_v29 = vstv %s2511_s6  ;;  %s3997_s6 = sld [smem:[#allocation9 + $0x43]] }
 0x234   : > { %v1416_v15 = vmul.f32 %v1415_v14, %v1413_v21  ;;  %v1417_v31 = vmul.f32 %v1415_v14, %v1414_v26  ;;  %v1521_v57 = vmul.f32 %v1519_v48, %v1414_v26  ;;  %v1520_v33 = vmul.f32 %v1519_v48, %v1413_v21  ;;  %v3829_v14 = vld [vmem:[#allocation2 + $0x99] sm:$0xff] }
 0x235   : > { %v1633_v51 = vmul.f32 %v1631_v49, %v1414_v26  ;;  %v1632_v16 = vmul.f32 %v1631_v49, %v1413_v21  ;;  %v1793_v48 = vstv %s2493_s9  ;;  %v3831_v21 = vld [vmem:[#allocation2 + $0x91] sm:$0xff]  ;;  %s2512_s9 = sld [smem:[#allocation9 + $0x39]] }
 0x236   : > { %v3747_v18 = vadd.f32 %v1416_v15, %v1410_v13  ;;  %v3749_v61 = vadd.f32 %v1417_v31, %v1411_v59  ;;  %1526 = vrot.lane.b32.xlu1 %v1521_v57, %s2829_s8  ;;  %1524 = vrot.lane.b32.xlu0 %v1520_v33, %s2829_s8  ;;  %v1781_v13 = vmul.f32 %v1779_v12, %v3821_v1  ;;  %v3837_v31 = vld [vmem:[#allocation2 + $0xb1] sm:$0xff]  ;;  %v1807_v57 = vstv %s2494_s11  ;;  %v3839_v33 = vld [vmem:[#allocation2 + $0xa9] sm:$0xff]  ;;  %s2513_s11 = sld [smem:[#allocation9 + $0x3a]] }
 0x237   : > { %v1780_v59 = vmul.f32 %v1779_v12, %v3823_v6  ;;  %v1795_v26 = vmul.f32 %v1793_v48, %v3829_v14  ;;  %v1794_v15 = vmul.f32 %v1793_v48, %v3831_v21  ;;  %v1809_v24 = vmul.f32 %v1807_v57, %v3837_v31  ;;  %v3901_v12 = vld [vmem:[#allocation2 + $0x22] sm:$0xff] }
 0x238   : > { %v1921_v10 = vmul.f32 %v1919_v45, %v3837_v31 }
 0x23a   : > { %1540 = vrot.lane.b32.xlu1 %v1535_v39, %s2828_s7  ;;  %1538 = vrot.lane.b32.xlu0 %v1534_v43, %s2828_s7  ;;  %v1808_v39 = vmul.f32 %v1807_v57, %v3839_v33  ;;  %v1821_v43 = vstv %s2495_s13  ;;  %s2514_s13 = sld [smem:[#allocation9 + $0x3b]] }
 0x23b   : > { %v1823_v41 = vmul.f32 %v1821_v43, %v3781_v53 }
 0x23e   : > { %1554 = vrot.lane.b32.xlu1 %v1549_v35, %s2828_s7  ;;  %1552 = vrot.lane.b32.xlu0 %v1548_v32, %s2828_s7  ;;  %v1822_v35 = vmul.f32 %v1821_v43, %v3783_v55  ;;  %v1835_v32 = vstv %s2496_s23  ;;  %v3867_v40 = vpop.permute.xlu1 %1428  ;;  %v3915_v43 = vld [vmem:[#allocation2 + $0x32] sm:$0xff]  ;;  %s2515_s23 = sld [smem:[#allocation9 + $0x3c]] }
 0x23f   : > { %v1837_v46 = vmul.f32 %v1835_v32, %v3789_v11 }
 0x242   : > { %1568 = vrot.lane.b32.xlu1 %v1563_v60, %s2828_s7  ;;  %1566 = vrot.lane.b32.xlu0 %v1562_v63, %s2828_s7  ;;  %v1836_v60 = vmul.f32 %v1835_v32, %v3791_v34  ;;  %v1849_v63 = vstv %s2497_s14  ;;  %s2516_s14 = sld [smem:[#allocation9 + $0x3d]] }
 0x243   : > { %v1851_v17 = vmul.f32 %v1849_v63, %v3797_v37 }
 0x246   : > { %1582 = vrot.lane.b32.xlu1 %v1577_v23, %s2828_s7  ;;  %1580 = vrot.lane.b32.xlu0 %v1576_v54, %s2828_s7  ;;  %v1850_v23 = vmul.f32 %v1849_v63, %v3799_v62  ;;  %v1863_v54 = vstv %s2498_s30  ;;  %v2039_v63 = vstv %s2514_s13  ;;  %s3937_s30 = sld [smem:[#allocation9 + $0x3e]] }
 0x247   : > { %v1865_v0 = vmul.f32 %v1863_v54, %v3805_v4  ;;  %s4010_s13 = sld [smem:[#allocation9 + $0x19]] }
 0x24a   : > { %1596 = vrot.lane.b32.xlu1 %v1591_v50, %s2828_s7  ;;  %1594 = vrot.lane.b32.xlu0 %v1590_v19, %s2828_s7  ;;  %v1864_v50 = vmul.f32 %v1863_v54, %v3807_v8  ;;  %v1877_v19 = vstv %s2499_s12  ;;  %s3947_s12 = sld [smem:[#allocation9 + $0x3f]] }
 0x24b   : > { %v1879_v3 = vmul.f32 %v1877_v19, %v3813_v27 }
 0x24e   : > { %1610 = vrot.lane.b32.xlu1 %v1605_v52, %s2828_s7  ;;  %1608 = vrot.lane.b32.xlu0 %v1604_v7, %s2828_s7  ;;  %v1878_v52 = vmul.f32 %v1877_v19, %v3815_v42  ;;  %v1891_v7 = vstv %s2500_s15  ;;  %v3933_v19 = vld [vmem:[#allocation2 + $0x6a] sm:$0xff]  ;;  %s3964_s15 = sld [smem:[#allocation9 + $0x40]] }
 0x24f   : > { %v1892_v49 = vmul.f32 %v1891_v7, %v3823_v6 }
 0x252   : > { %1624 = vrot.lane.b32.xlu1 %v1619_v30, %s2828_s7  ;;  %1622 = vrot.lane.b32.xlu0 %v1618_v20, %s2828_s7  ;;  %v3869_v30 = vpop.permute.xlu0 %1426  ;;  %v1893_v20 = vmul.f32 %v1891_v7, %v3821_v1 }
 0x256   : > { %1638 = vrot.lane.b32.xlu1 %v1633_v51, %s2828_s7  ;;  %1636 = vrot.lane.b32.xlu0 %v1632_v16, %s2828_s7  ;;  %v1905_v51 = vstv %s2501_s17  ;;  %v3875_v16 = vpop.permute.xlu1 %1442  ;;  %v3877_v38 = vpop.permute.xlu0 %1440  ;;  %s3979_s17 = sld [smem:[#allocation9 + $0x41]] }
 0x25a   : > { %1716 = vrot.lane.b32.xlu1 %v1711_v36, %s2829_s8  ;;  %1714 = vrot.lane.b32.xlu0 %v1710_v2, %s2829_s8  ;;  %v1907_v36 = vmul.f32 %v1905_v51, %v3829_v14  ;;  %v1906_v2 = vmul.f32 %v1905_v51, %v3831_v21 }
 0x25e   : > { %1730 = vrot.lane.b32.xlu1 %v1725_v56, %s2829_s8  ;;  %1728 = vrot.lane.b32.xlu0 %v1724_v9, %s2829_s8 }
 0x262   : > { %1744 = vrot.lane.b32.xlu1 %v1739_v47, %s2829_s8  ;;  %1742 = vrot.lane.b32.xlu0 %v1738_v44, %s2829_s8  ;;  %v1920_v47 = vmul.f32 %v1919_v45, %v3839_v33  ;;  %v3889_v44 = vld [vmem:[#allocation2 + $0xa] sm:$0xff]  ;;  %v3945_v45 = vld [vmem:[#allocation2 + $0x7a] sm:$0xff] }
 0x266   : > { %1758 = vrot.lane.b32.xlu1 %v1753_v5, %s2829_s8  ;;  %1756 = vrot.lane.b32.xlu0 %v1752_v58, %s2829_s8  ;;  %v3891_v5 = vld [vmem:[#allocation2 + $0x2] sm:$0xff] }
 0x26a   : > { %1772 = vrot.lane.b32.xlu1 %v1767_v25, %s2829_s8  ;;  %1770 = vrot.lane.b32.xlu0 %v1766_v22, %s2829_s8  ;;  %v3883_v56 = vpop.permute.xlu1 %1456  ;;  %v3885_v9 = vpop.permute.xlu0 %1454  ;;  %v1999_v25 = vmul.f32 %v1997_v29, %v3889_v44  ;;  %v1998_v22 = vmul.f32 %v1997_v29, %v3891_v5 }
 0x26e   : > { %1786 = vrot.lane.b32.xlu1 %v1781_v13, %s2829_s8  ;;  %1784 = vrot.lane.b32.xlu0 %v1780_v59, %s2829_s8  ;;  %v2011_v13 = vstv %s2512_s9  ;;  %v3903_v59 = vld [vmem:[#allocation2 + $0x1a] sm:$0xff]  ;;  %s4004_s9 = sld [smem:[#allocation9 + $0x44]] }
 0x26f   : > { %v2012_v57 = vmul.f32 %v2011_v13, %v3903_v59 }
 0x272   : > { %1800 = vrot.lane.b32.xlu1 %v1795_v26, %s2829_s8  ;;  %1798 = vrot.lane.b32.xlu0 %v1794_v15, %s2829_s8  ;;  %v2013_v15 = vmul.f32 %v2011_v13, %v3901_v12 }
 0x276   : > { %1814 = vrot.lane.b32.xlu1 %v1809_v24, %s2829_s8  ;;  %1812 = vrot.lane.b32.xlu0 %v1808_v39, %s2829_s8  ;;  %v3913_v24 = vld [vmem:[#allocation2 + $0x3a] sm:$0xff]  ;;  %v2025_v39 = vstv %s2513_s11  ;;  %s4008_s11 = sld [smem:[#allocation9 + $0x18]] }
 0x277   : > { %v2027_v32 = vmul.f32 %v2025_v39, %v3913_v24 }
 0x27a   : > { %1828 = vrot.lane.b32.xlu1 %v1823_v41, %s2828_s7  ;;  %1826 = vrot.lane.b32.xlu0 %v1822_v35, %s2828_s7 }
 0x27c   : > { %v3895_v58 = vpop.permute.xlu1 %1470  ;;  %v3897_v28 = vpop.permute.xlu0 %1468 }
 0x27e   : > { %1842 = vrot.lane.b32.xlu1 %v1837_v46, %s2828_s7  ;;  %1840 = vrot.lane.b32.xlu0 %v1836_v60, %s2828_s7  ;;  %v2026_v46 = vmul.f32 %v2025_v39, %v3915_v43  ;;  %v3925_v60 = vld [vmem:[#allocation2 + $0x52] sm:$0xff]  ;;  %v3959_v39 = vld [vmem:[#allocation2 + $0x9a] sm:$0xff] }
 0x282   : > { %1856 = vrot.lane.b32.xlu1 %v1851_v17, %s2828_s7  ;;  %1854 = vrot.lane.b32.xlu0 %v1850_v23, %s2828_s7  ;;  %v3927_v17 = vld [vmem:[#allocation2 + $0x4a] sm:$0xff] }
 0x286   : > { %1870 = vrot.lane.b32.xlu1 %v1865_v0, %s2828_s7  ;;  %1868 = vrot.lane.b32.xlu0 %v1864_v50, %s2828_s7  ;;  %v2041_v0 = vmul.f32 %v2039_v63, %v3925_v60  ;;  %v2040_v50 = vmul.f32 %v2039_v63, %v3927_v17 }
 0x28a   : > { %1884 = vrot.lane.b32.xlu1 %v1879_v3, %s2828_s7  ;;  %1882 = vrot.lane.b32.xlu0 %v1878_v52, %s2828_s7  ;;  %v3907_v48 = vpop.permute.xlu1 %1484  ;;  %v3909_v26 = vpop.permute.xlu0 %1482  ;;  %v2053_v3 = vstv %s2515_s23  ;;  %v3935_v52 = vld [vmem:[#allocation2 + $0x62] sm:$0xff]  ;;  %s4014_s23 = sld [smem:[#allocation9 + $0x45]] }
 0x28b   : > { %v2054_v51 = vmul.f32 %v2053_v3, %v3935_v52 }
 0x28e   : > { %1898 = vrot.lane.b32.xlu1 %v1893_v20, %s2828_s7  ;;  %1896 = vrot.lane.b32.xlu0 %v1892_v49, %s2828_s7  ;;  %v2055_v49 = vmul.f32 %v2053_v3, %v3933_v19  ;;  %v2095_v3 = vstv %s3947_s12  ;;  %s4025_s12 = sld [smem:[#allocation9 + $0x46]] }
 0x292   : > { %1912 = vrot.lane.b32.xlu1 %v1907_v36, %s2828_s7  ;;  %1910 = vrot.lane.b32.xlu0 %v1906_v2, %s2828_s7  ;;  %v3943_v36 = vld [vmem:[#allocation2 + $0x82] sm:$0xff]  ;;  %v2067_v2 = vstv %s2516_s14  ;;  %s4019_s14 = sld [smem:[#allocation9 + $0x1a]] }
 0x293   : > { %v2068_v13 = vmul.f32 %v2067_v2, %v3945_v45 }
 0x296   : > { %1926 = vrot.lane.b32.xlu1 %v1921_v10, %s2828_s7  ;;  %1924 = vrot.lane.b32.xlu0 %v1920_v47, %s2828_s7  ;;  %v3919_v41 = vpop.permute.xlu1 %1498  ;;  %v3921_v35 = vpop.permute.xlu0 %1496  ;;  %v1433_v10 = vadd.f32 %v3867_v40, %v3749_v61  ;;  %v1432_v47 = vadd.f32 %v3869_v30, %v3747_v18 }
 0x29a   : > { %2004 = vrot.lane.b32.xlu1 %v1999_v25, %s2829_s8  ;;  %2002 = vrot.lane.b32.xlu0 %v1998_v22, %s2829_s8  ;;  %v2069_v22 = vmul.f32 %v2067_v2, %v3943_v36 }
 0x29e   : > { %2018 = vrot.lane.b32.xlu1 %v2013_v15, %s2829_s8  ;;  %2016 = vrot.lane.b32.xlu0 %v2012_v57, %s2829_s8  ;;  %v1513_v23 = vpop.permute.xlu1 %1512  ;;  %v1511_v54 = vpop.permute.xlu0 %1510  ;;  %v1447_v15 = vadd.f32 %v3875_v16, %v1433_v10  ;;  %v1446_v57 = vadd.f32 %v3877_v38, %v1432_v47 }
 0x2a0   : > { %v1461_v18 = vadd.f32 %v3883_v56, %v1447_v15  ;;  %v1460_v61 = vadd.f32 %v3885_v9, %v1446_v57 }
 0x2a2   : > { %2032 = vrot.lane.b32.xlu1 %v2027_v32, %s2829_s8  ;;  %2030 = vrot.lane.b32.xlu0 %v2026_v46, %s2829_s8  ;;  %v2081_v32 = vstv %s3937_s30  ;;  %v3962_v46 = vld [vmem:[#allocation2 + $0x92] sm:$0xff]  ;;  %v1475_v63 = vadd.f32 %v3895_v58, %v1461_v18  ;;  %s4021_s30 = sld [smem:[#allocation9 + $0x1b]] }
 0x2a3   : > { %v2083_v16 = vmul.f32 %v2081_v32, %v3959_v39  ;;  %v2082_v38 = vmul.f32 %v2081_v32, %v3962_v46 }
 0x2a4   : > { %v1489_v56 = vadd.f32 %v3907_v48, %v1475_v63 }
 0x2a6   : > { %2046 = vrot.lane.b32.xlu1 %v2041_v0, %s2829_s8  ;;  %2044 = vrot.lane.b32.xlu0 %v2040_v50, %s2829_s8  ;;  %v1474_v0 = vadd.f32 %v3897_v28, %v1460_v61  ;;  %v3974_v50 = vld [vmem:[#allocation2 + $0xb2] sm:$0xff]  ;;  %v1503_v10 = vadd.f32 %v3919_v41, %v1489_v56  ;;  %v2123_v61 = vstv %s3979_s17  ;;  %s4033_s17 = sld [smem:[#allocation9 + $0x1d]] }
 0x2a7   : > { %v2097_v2 = vmul.f32 %v2095_v3, %v3974_v50  ;;  %v2124_v63 = vmul.f32 %v2123_v61, %v3903_v59 }
 0x2a8   : > { %v1527_v7 = vpop.permute.xlu1 %1526  ;;  %v1525_v20 = vpop.permute.xlu0 %1524  ;;  %v1488_v9 = vadd.f32 %v3909_v26, %v1474_v0  ;;  %v1517_v48 = vadd.f32 %v1513_v23, %v1503_v10 }
 0x2aa   : > { %2060 = vrot.lane.b32.xlu1 %v2055_v49, %s2829_s8  ;;  %2058 = vrot.lane.b32.xlu0 %v2054_v51, %s2829_s8  ;;  %v3977_v49 = vld [vmem:[#allocation2 + $0xaa] sm:$0xff]  ;;  %v1502_v47 = vadd.f32 %v3921_v35, %v1488_v9  ;;  %v1531_v18 = vadd.f32 %v1527_v7, %v1517_v48  ;;  %v2137_v7 = vstv %s3990_s25  ;;  %s4039_s25 = sld [smem:[#allocation9 + $0x47]] }
 0x2ab   : > { %v2096_v28 = vmul.f32 %v2095_v3, %v3977_v49  ;;  %v2139_v9 = vmul.f32 %v2137_v7, %v3913_v24 }
 0x2ac   : > { %v1541_v29 = vpop.permute.xlu1 %1540  ;;  %v1539_v25 = vpop.permute.xlu0 %1538  ;;  %v1516_v26 = vadd.f32 %v1511_v54, %v1502_v47 }
 0x2ad   : > { %v1545_v35 = vadd.f32 %v1541_v29, %v1531_v18 }
 0x2ae   : > { %2074 = vrot.lane.b32.xlu1 %v2069_v22, %s2829_s8  ;;  %2072 = vrot.lane.b32.xlu0 %v2068_v13, %s2829_s8  ;;  %v2109_v22 = vstv %s3964_s15  ;;  %v1530_v41 = vadd.f32 %v1525_v20, %v1516_v26  ;;  %s4031_s15 = sld [smem:[#allocation9 + $0x1c]] }
 0x2af   : > { %v2111_v57 = vmul.f32 %v2109_v22, %v3889_v44  ;;  %v2110_v32 = vmul.f32 %v2109_v22, %v3891_v5 }
 0x2b0   : > { %v1555_v40 = vpop.permute.xlu1 %1554  ;;  %v1553_v30 = vpop.permute.xlu0 %1552 }
 0x2b1   : > { %v1559_v0 = vadd.f32 %v1555_v40, %v1545_v35  ;;  %v2138_v40 = vmul.f32 %v2137_v7, %v3915_v43  ;;  %v1663_v7 = vstv %s4019_s14  ;;  %s4087_s14 = sld [smem:[#allocation9 + $0x34]] }
 0x2b2   : > { %2088 = vrot.lane.b32.xlu1 %v2083_v16, %s2829_s8  ;;  %2086 = vrot.lane.b32.xlu0 %v2082_v38, %s2829_s8  ;;  %v1544_v16 = vadd.f32 %v1539_v25, %v1530_v41  ;;  %v2125_v38 = vmul.f32 %v2123_v61, %v3901_v12  ;;  %v1655_v41 = vstv %s4010_s13  ;;  %s4083_s13 = sld [smem:[#allocation9 + $0x32]] }
 0x2b4   : > { %v1569_v51 = vpop.permute.xlu1 %1568  ;;  %v1567_v58 = vpop.permute.xlu0 %1566  ;;  %v1558_v3 = vadd.f32 %v1553_v30, %v1544_v16 }
 0x2b5   : > { %v1573_v20 = vadd.f32 %v1569_v51, %v1559_v0 }
 0x2b6   : > { %2102 = vrot.lane.b32.xlu1 %v2097_v2, %s2829_s8  ;;  %2100 = vrot.lane.b32.xlu0 %v2096_v28, %s2829_s8  ;;  %v1572_v29 = vadd.f32 %v1567_v58, %v1558_v3  ;;  %v2151_v28 = vstv %s3997_s6  ;;  %s4046_s6 = sld [smem:[#allocation9 + $0x1e]] }
 0x2b7   : > { %v2153_v22 = vmul.f32 %v2151_v28, %v3925_v60  ;;  %v2152_v48 = vmul.f32 %v2151_v28, %v3927_v17  ;;  %v1665_v28 = vmul.f32 %v1663_v7, %v3797_v37 }
 0x2b8   : > { %v1583_v13 = vpop.permute.xlu1 %1582  ;;  %v1581_v15 = vpop.permute.xlu0 %1580 }
 0x2b9   : > { %v1587_v30 = vadd.f32 %v1583_v13, %v1573_v20  ;;  %v1586_v2 = vadd.f32 %v1581_v15, %v1572_v29  ;;  %v2165_v15 = vstv %s4004_s9  ;;  %v1657_v20 = vmul.f32 %v1655_v41, %v3789_v11  ;;  %s4051_s9 = sld [smem:[#allocation9 + $0x1f]] }
 0x2ba   : > { %2116 = vrot.lane.b32.xlu1 %v2111_v57, %s2828_s7  ;;  %2114 = vrot.lane.b32.xlu0 %v2110_v32, %s2828_s7  ;;  %v1647_v57 = vstv %s4008_s11  ;;  %v2167_v16 = vmul.f32 %v2165_v15, %v3933_v19  ;;  %v1664_v11 = vmul.f32 %v1663_v7, %v3799_v62  ;;  %s2504_s11 = sld [smem:[#allocation9 + $0x31]] }
 0x2bb   : > { %v1648_v0 = vmul.f32 %v1647_v57, %v3783_v55 }
 0x2bc   : > { %v1597_v23 = vpop.permute.xlu1 %1596  ;;  %v1595_v54 = vpop.permute.xlu0 %1594 }
 0x2bd   : > { %v1601_v51 = vadd.f32 %v1597_v23, %v1587_v30  ;;  %v1600_v58 = vadd.f32 %v1595_v54, %v1586_v2  ;;  %v2166_v23 = vmul.f32 %v2165_v15, %v3935_v52  ;;  %v2179_v54 = vstv %s4014_s23  ;;  %s4085_s23 = sld [smem:[#allocation9 + $0x33]] }
 0x2be   : > { %2130 = vrot.lane.b32.xlu1 %v2125_v38, %s2828_s7  ;;  %2128 = vrot.lane.b32.xlu0 %v2124_v63, %s2828_s7  ;;  %v1649_v38 = vmul.f32 %v1647_v57, %v3781_v53  ;;  %v1671_v53 = vstv %s4021_s30  ;;  %v2180_v30 = vmul.f32 %v2179_v54, %v3945_v45  ;;  %v2193_v2 = vstv %s4025_s12  ;;  %s4089_s30 = sld [smem:[#allocation9 + $0x35]] }
 0x2bf   : > { %v2195_v15 = vmul.f32 %v2193_v2, %v3959_v39  ;;  %v2194_v62 = vmul.f32 %v2193_v2, %v3962_v46  ;;  %v2207_v57 = vstv %s4039_s25  ;;  %s4094_s12 = sld [smem:[#allocation9 + $0x36]]  ;;  %s279_s25 = sadd.s32 2, %s3286_s16 }
 0x2c0   : > { %v1611_v25 = vpop.permute.xlu1 %1610  ;;  %v1609_v56 = vpop.permute.xlu0 %1608 }
 0x2c1   : > { %v1615_v26 = vadd.f32 %v1611_v25, %v1601_v51  ;;  %v1614_v13 = vadd.f32 %v1609_v56, %v1600_v58  ;;  %v1656_v25 = vmul.f32 %v1655_v41, %v3791_v34  ;;  %v1679_v34 = vstv %s4031_s15  ;;  %s4099_s15 = sld [smem:[#allocation9 + $0x37]] }
 0x2c2   : > { %2144 = vrot.lane.b32.xlu1 %v2139_v9, %s2828_s7  ;;  %2142 = vrot.lane.b32.xlu0 %v2138_v40, %s2828_s7  ;;  %v2181_v40 = vmul.f32 %v2179_v54, %v3943_v36  ;;  %v1680_v41 = vmul.f32 %v1679_v34, %v3815_v42  ;;  %v1703_v54 = vstv %s4051_s9  ;;  %s280_s9 = sld [smem:[#allocation3 + %s279_s25]] }
 0x2c4   : > { %v1625_v10 = vpop.permute.xlu1 %1624  ;;  %v1623_v47 = vpop.permute.xlu0 %1622 }
 0x2c5   : > { %v1629_v32 = vadd.f32 %v1625_v10, %v1615_v26  ;;  %v1628_v18 = vadd.f32 %v1623_v47, %v1614_v13  ;;  %v1673_v10 = vmul.f32 %v1671_v53, %v3805_v4  ;;  %v1687_v26 = vstv %s4033_s17  ;;  %s281_s17 = sadd.s32 3, %s3286_s16 }
 0x2c6   : > { %2158 = vrot.lane.b32.xlu1 %v2153_v22, %s2828_s7  ;;  %2156 = vrot.lane.b32.xlu0 %v2152_v48, %s2828_s7  ;;  %v1672_v22 = vmul.f32 %v1671_v53, %v3807_v8  ;;  %v1695_v4 = vstv %s4046_s6  ;;  %s282_s6 = sld [smem:[#allocation3 + %s281_s17]] }
 0x2c7   : > { %v1697_v42 = vmul.f32 %v1695_v4, %v3829_v14 }
 0x2c8   : > { %v1639_v61 = vpop.permute.xlu1 %1638  ;;  %v1637_v35 = vpop.permute.xlu0 %1636 }
 0x2c9   : > { %v1643_v63 = vadd.f32 %v1639_v61, %v1629_v32  ;;  %v1642_v3 = vadd.f32 %v1637_v35, %v1628_v18  ;;  %v1681_v32 = vmul.f32 %v1679_v34, %v3813_v27  ;;  %v2209_v27 = vmul.f32 %v2207_v57, %v3974_v50 }
 0x2ca   : > { %2172 = vrot.lane.b32.xlu1 %v2167_v16, %s2828_s7  ;;  %2170 = vrot.lane.b32.xlu0 %v2166_v23, %s2828_s7  ;;  %v1689_v16 = vmul.f32 %v1687_v26, %v3821_v1  ;;  %v1688_v23 = vmul.f32 %v1687_v26, %v3823_v6  ;;  %v1705_v1 = vmul.f32 %v1703_v54, %v3837_v31 }
 0x2cb   : > { %v1651_v29 = vadd.f32 %v1649_v38, %v1643_v63  ;;  %v1650_v56 = vadd.f32 %v1648_v0, %v1642_v3  ;;  %v2208_v0 = vmul.f32 %v2207_v57, %v3977_v49 }
 0x2cc   : > { %v1717_v55 = vpop.permute.xlu1 %1716  ;;  %v1715_v9 = vpop.permute.xlu0 %1714 }
 0x2cd   : > { %v1659_v51 = vadd.f32 %v1657_v20, %v1651_v29  ;;  %v1658_v58 = vadd.f32 %v1656_v25, %v1650_v56  ;;  %v1696_v20 = vmul.f32 %v1695_v4, %v3831_v21  ;;  %v1704_v25 = vmul.f32 %v1703_v54, %v3839_v33 }
 0x2ce   : > { %2186 = vrot.lane.b32.xlu1 %v2181_v40, %s2828_s7  ;;  %2184 = vrot.lane.b32.xlu0 %v2180_v30, %s2828_s7 }
 0x2cf   : > { %v1667_v47 = vadd.f32 %v1665_v28, %v1659_v51  ;;  %v1666_v48 = vadd.f32 %v1664_v11, %v1658_v58 }
 0x2d0   : > { %v1731_v13 = vpop.permute.xlu1 %1730  ;;  %v1729_v37 = vpop.permute.xlu0 %1728 }
 0x2d1   : > { %v1675_v18 = vadd.f32 %v1673_v10, %v1667_v47  ;;  %v1674_v61 = vadd.f32 %v1672_v22, %v1666_v48 }
 0x2d2   : > { %2200 = vrot.lane.b32.xlu1 %v2195_v15, %s2828_s7  ;;  %2198 = vrot.lane.b32.xlu0 %v2194_v62, %s2828_s7 }
 0x2d3   : > { %v1683_v8 = vadd.f32 %v1681_v32, %v1675_v18  ;;  %v1682_v35 = vadd.f32 %v1680_v41, %v1674_v61 }
 0x2d4   : > { %v1745_v38 = vpop.permute.xlu1 %1744  ;;  %v1743_v63 = vpop.permute.xlu0 %1742 }
 0x2d5   : > { %v1691_v3 = vadd.f32 %v1689_v16, %v1683_v8  ;;  %v1690_v7 = vadd.f32 %v1688_v23, %v1682_v35 }
 0x2d6   : > { %2214 = vrot.lane.b32.xlu1 %v2209_v27, %s2828_s7  ;;  %2212 = vrot.lane.b32.xlu0 %v2208_v0, %s2828_s7  ;;  %s2503_s7 = sld [smem:[#allocation9 + $0x30]] }
 0x2d7   : > { %v1699_v6 = vadd.f32 %v1697_v42, %v1691_v3  ;;  %v1698_v29 = vadd.f32 %v1696_v20, %v1690_v7 }
 0x2d8   : > { %v1759_v56 = vpop.permute.xlu1 %1758  ;;  %v1757_v53 = vpop.permute.xlu0 %1756 }
 0x2d9   : > { %v1707_v40 = vadd.f32 %v1705_v1, %v1699_v6  ;;  %v1706_v30 = vadd.f32 %v1704_v25, %v1698_v29 }
 0x2db   : > { %v1721_v28 = vadd.f32 %v1717_v55, %v1707_v40  ;;  %v1720_v51 = vadd.f32 %v1715_v9, %v1706_v30 }
 0x2dc   : > { %v1773_v2 = vpop.permute.xlu1 %1772  ;;  %v1771_v14 = vpop.permute.xlu0 %1770 }
 0x2dd   : > { %v1735_v58 = vadd.f32 %v1731_v13, %v1721_v28  ;;  %v1734_v34 = vadd.f32 %v1729_v37, %v1720_v51  ;;  %v1935_v28 = vstv %s2503_s7  ;;  %s277_s7 = sadd.s32 1, %s3286_s16 }
 0x2df   : > { %v1749_v22 = vadd.f32 %v1745_v38, %v1735_v58  ;;  %v1748_v31 = vadd.f32 %v1743_v63, %v1734_v34 }
 0x2e0   : > { %v1787_v11 = vpop.permute.xlu1 %1786  ;;  %v1785_v21 = vpop.permute.xlu0 %1784 }
 0x2e1   : > { %v1763_v15 = vadd.f32 %v1759_v56, %v1749_v22  ;;  %v1762_v33 = vadd.f32 %v1757_v53, %v1748_v31  ;;  %v1936_v22 = vmul.f32 %v1935_v28, %v3891_v5 }
 0x2e3   : > { %v1777_v32 = vadd.f32 %v1773_v2, %v1763_v15  ;;  %v1776_v18 = vadd.f32 %v1771_v14, %v1762_v33 }
 0x2e4   : > { %v1801_v10 = vpop.permute.xlu1 %1800  ;;  %v1799_v47 = vpop.permute.xlu0 %1798 }
 0x2e5   : > { %v1791_v55 = vadd.f32 %v1787_v11, %v1777_v32  ;;  %v1790_v9 = vadd.f32 %v1785_v21, %v1776_v18  ;;  %v1943_v21 = vstv %s2504_s11  ;;  %s278_s11 = sld [smem:[#allocation3 + %s277_s7]] }
 0x2e6   : > { %v1944_v33 = vmul.f32 %v1943_v21, %v3903_v59 }
 0x2e7   : > { %v1805_v13 = vadd.f32 %v1801_v10, %v1791_v55  ;;  %v1804_v37 = vadd.f32 %v1799_v47, %v1790_v9  ;;  %v1937_v10 = vmul.f32 %v1935_v28, %v3889_v44  ;;  %v1967_v55 = vstv %s4087_s14  ;;  %s2532_s14 = sshll.u32 %s2886_s22, 8  ;;  %s2832_s22 = smov [#allocation11]  }
 0x2e8   : > { %v1815_v48 = vpop.permute.xlu1 %1814  ;;  %v1813_v26 = vpop.permute.xlu0 %1812  ;;  %s2754_s17 = sshll.u32 %s2832_s22, 4  ;;  %s2755_s17 = int_to_ptr.vmem [resolvable:$false] %s2754_s17 }
 0x2e9   : > { %v1819_v23 = vadd.f32 %v1815_v48, %v1805_v13  ;;  %v1818_v54 = vadd.f32 %v1813_v26, %v1804_v37  ;;  %v1951_v48 = vstv %s4083_s13  ;;  %v1945_v26 = vmul.f32 %v1943_v21, %v3901_v12  ;;  %s267_s13 = sand.u32 1, %s2814_s19   ;;  %s2756_s25 = scalar_lea.vmem %s2755_s17, 512 }
 0x2ea   : > { %v1953_v18 = vmul.f32 %v1951_v48, %v3913_v24  ;;  %v1969_v24 = vmul.f32 %v1967_v55, %v3933_v19 }
 0x2ec   : > { %v1829_v62 = vpop.permute.xlu1 %1828  ;;  %v1827_v57 = vpop.permute.xlu0 %1826 }
 0x2ed   : > { %v1833_v38 = vadd.f32 %v1829_v62, %v1819_v23  ;;  %v1832_v63 = vadd.f32 %v1827_v57, %v1818_v54  ;;  %v1959_v57 = vstv %s4085_s23  ;;  %v1968_v23 = vmul.f32 %v1967_v55, %v3935_v52  ;;  %s2381_s23 = sshll.u32 %s267_s13, 4 }
 0x2ee   : > { %v1961_v12 = vmul.f32 %v1959_v57, %v3925_v60  ;;  %v1960_v59 = vmul.f32 %v1959_v57, %v3927_v17  ;;  %v1983_v54 = vstv %s4094_s12  ;;  %s4133_s12 = scalar_lea.hbm %s4180_s5, %s2532_s14 }
 0x2f0   : > { %v1843_v41 = vpop.permute.xlu1 %1842  ;;  %v1841_v61 = vpop.permute.xlu0 %1840 }
 0x2f1   : > { %v1847_v42 = vadd.f32 %v1843_v41, %v1833_v38  ;;  %v1846_v3 = vadd.f32 %v1841_v61, %v1832_v63  ;;  %v1952_v41 = vmul.f32 %v1951_v48, %v3915_v43 }
 0x2f4   : > { %v1857_v4 = vpop.permute.xlu1 %1856  ;;  %v1855_v8 = vpop.permute.xlu0 %1854 }
 0x2f5   : > { %v1861_v7 = vadd.f32 %v1857_v4, %v1847_v42  ;;  %v1860_v20 = vadd.f32 %v1855_v8, %v1846_v3  ;;  %v1975_v8 = vstv %s4089_s30  ;;  %v1985_v42 = vmul.f32 %v1983_v54, %v3959_v39 }
 0x2f6   : > { %v1977_v43 = vmul.f32 %v1975_v8, %v3943_v36  ;;  %v1976_v60 = vmul.f32 %v1975_v8, %v3945_v45 }
 0x2f8   : > { %v1871_v35 = vpop.permute.xlu1 %1870  ;;  %v1869_v16 = vpop.permute.xlu0 %1868 }
 0x2f9   : > { %v1875_v29 = vadd.f32 %v1871_v35, %v1861_v7  ;;  %v1874_v25 = vadd.f32 %v1869_v16, %v1860_v20  ;;  %v1984_v20 = vmul.f32 %v1983_v54, %v3962_v46 }
 0x2fc   : > { %v1885_v27 = vpop.permute.xlu1 %1884  ;;  %v1883_v0 = vpop.permute.xlu0 %1882 }
 0x2fd   : > { %v1889_v56 = vadd.f32 %v1885_v27, %v1875_v29  ;;  %v1888_v53 = vadd.f32 %v1883_v0, %v1874_v25  ;;  %v1991_v27 = vstv %s4099_s15 }
 0x2fe   : > { %v1993_v19 = vmul.f32 %v1991_v27, %v3974_v50 }
 0x300   : > { %v1899_v1 = vpop.permute.xlu1 %1898  ;;  %v1897_v6 = vpop.permute.xlu0 %1896 }
 0x301   : > { %v1903_v2 = vadd.f32 %v1899_v1, %v1889_v56  ;;  %v1902_v14 = vadd.f32 %v1897_v6, %v1888_v53  ;;  %v1992_v6 = vmul.f32 %v1991_v27, %v3977_v49 }
 0x304   : > { %v1913_v40 = vpop.permute.xlu1 %1912  ;;  %v1911_v30 = vpop.permute.xlu0 %1910 }
 0x305   : > { %v1917_v51 = vadd.f32 %v1913_v40, %v1903_v2  ;;  %v1916_v11 = vadd.f32 %v1911_v30, %v1902_v14 }
 0x308   : > { %v1927_v58 = vpop.permute.xlu1 %1926  ;;  %v1925_v34 = vpop.permute.xlu0 %1924 }
 0x309   : > { %v1931_v47 = vadd.f32 %v1927_v58, %v1917_v51  ;;  %v1930_v31 = vadd.f32 %v1925_v34, %v1916_v11 }
 0x30b   : > { %v1939_v15 = vadd.f32 %v1937_v10, %v1931_v47  ;;  %v1938_v62 = vadd.f32 %v1936_v22, %v1930_v31 }
 0x30c   : > { %v2005_v32 = vpop.permute.xlu1 %2004  ;;  %v2003_v44 = vpop.permute.xlu0 %2002 }
 0x30d   : > { %v1947_v5 = vadd.f32 %v1945_v26, %v1939_v15  ;;  %v1946_v61 = vadd.f32 %v1944_v33, %v1938_v62 }
 0x30f   : > { %v1955_v9 = vadd.f32 %v1953_v18, %v1947_v5  ;;  %v1954_v4 = vadd.f32 %v1952_v41, %v1946_v61 }
 0x310   : > { %v2019_v13 = vpop.permute.xlu1 %2018  ;;  %v2017_v37 = vpop.permute.xlu0 %2016 }
 0x311   : > { %v1963_v35 = vadd.f32 %v1961_v12, %v1955_v9  ;;  %v1962_v16 = vadd.f32 %v1960_v59, %v1954_v4 }
 0x313   : > { %v1971_v38 = vadd.f32 %v1969_v24, %v1963_v35  ;;  %v1970_v63 = vadd.f32 %v1968_v23, %v1962_v16 }
 0x314   : > { %v2033_v0 = vpop.permute.xlu1 %2032  ;;  %v2031_v17 = vpop.permute.xlu0 %2030 }
 0x315   : > { %v1979_v3 = vadd.f32 %v1977_v43, %v1971_v38  ;;  %v1978_v7 = vadd.f32 %v1976_v60, %v1970_v63 }
 0x317   : > { %v1987_v1 = vadd.f32 %v1985_v42, %v1979_v3  ;;  %v1986_v52 = vadd.f32 %v1984_v20, %v1978_v7  ;;  %v2220_v42 = vstv %s282_s6 }
 0x318   : > { %v2047_v36 = vpop.permute.xlu1 %2046  ;;  %v2045_v29 = vpop.permute.xlu0 %2044 }
 0x319   : > { %v1995_v25 = vadd.f32 %v1993_v19, %v1987_v1  ;;  %v1994_v56 = vadd.f32 %v1992_v6, %v1986_v52  ;;  %v2228_v1 = vstv %s280_s9 }
 0x31b   : > { %v2009_v40 = vadd.f32 %v2005_v32, %v1995_v25  ;;  %v2008_v30 = vadd.f32 %v2003_v44, %v1994_v56  ;;  %v2224_v25 = vld [vmem:[%s2990_s26 + $0x9] sm:$0xff]  ;;  %v2225_v56 = vstv %s278_s11 }
 0x31c   : > { %v2061_v45 = vpop.permute.xlu1 %2060  ;;  %v2059_v53 = vpop.permute.xlu0 %2058 }
 0x31d   : > { %v2023_v14 = vadd.f32 %v2019_v13, %v2009_v40  ;;  %v2022_v28 = vadd.f32 %v2017_v37, %v2008_v30 }
 0x31f   : > { %v2037_v11 = vadd.f32 %v2033_v0, %v2023_v14  ;;  %v2036_v50 = vadd.f32 %v2031_v17, %v2022_v28 }
 0x320   : > { %v2075_v2 = vpop.permute.xlu1 %2074  ;;  %v2073_v39 = vpop.permute.xlu0 %2072 }
 0x321   : > { %v2051_v34 = vadd.f32 %v2047_v36, %v2037_v11  ;;  %v2050_v49 = vadd.f32 %v2045_v29, %v2036_v50 }
 0x323   : > { %v2065_v22 = vadd.f32 %v2061_v45, %v2051_v34  ;;  %v2064_v31 = vadd.f32 %v2059_v53, %v2050_v49  ;;  %v2223_v45 = vld [vmem:[%s2990_s26 + $0x1] sm:$0xff]  ;;  %v2227_v53 = vmul.f32 %v2225_v56, %v2224_v25 }
 0x324   : > { %v2089_v51 = vpop.permute.xlu1 %2088  ;;  %v2087_v46 = vpop.permute.xlu0 %2086  ;;  %v2226_v40 = vmul.f32 %v2225_v56, %v2223_v45 }
 0x325   : > { %v2079_v15 = vadd.f32 %v2075_v2, %v2065_v22  ;;  %v2078_v33 = vadd.f32 %v2073_v39, %v2064_v31 }
 0x327   : > { %v2093_v32 = vadd.f32 %v2089_v51, %v2079_v15  ;;  %v2092_v44 = vadd.f32 %v2087_v46, %v2078_v33 }
 0x328   : > { %v2103_v21 = vpop.permute.xlu1 %2102  ;;  %v2101_v58 = vpop.permute.xlu0 %2100 }
 0x329   : > { %v2107_v41 = vadd.f32 %v2103_v21, %v2093_v32  ;;  %v2106_v61 = vadd.f32 %v2101_v58, %v2092_v44 }
 0x32c   : > { %v2117_v10 = vpop.permute.xlu1 %2116  ;;  %v2115_v47 = vpop.permute.xlu0 %2114 }
 0x32d   : > { %v2121_v55 = vadd.f32 %v2117_v10, %v2107_v41  ;;  %v2120_v12 = vadd.f32 %v2115_v47, %v2106_v61 }
 0x330   : > { %v2131_v48 = vpop.permute.xlu1 %2130  ;;  %v2129_v26 = vpop.permute.xlu0 %2128 }
 0x331   : > { %v2135_v4 = vadd.f32 %v2131_v48, %v2121_v55  ;;  %v2134_v8 = vadd.f32 %v2129_v26, %v2120_v12 }
 0x334   : > { %v2145_v62 = vpop.permute.xlu1 %2144  ;;  %v2143_v57 = vpop.permute.xlu0 %2142 }
 0x335   : > { %v2149_v13 = vadd.f32 %v2145_v62, %v2135_v4  ;;  %v2148_v37 = vadd.f32 %v2143_v57, %v2134_v8 }
 0x338   : > { %v2159_v18 = vpop.permute.xlu1 %2158  ;;  %v2157_v5 = vpop.permute.xlu0 %2156 }
 0x339   : > { %v2163_v24 = vadd.f32 %v2159_v18, %v2149_v13  ;;  %v2162_v23 = vadd.f32 %v2157_v5, %v2148_v37 }
 0x33c   : > { %v2173_v9 = vpop.permute.xlu1 %2172  ;;  %v2171_v59 = vpop.permute.xlu0 %2170 }
 0x33d   : > { %v2177_v54 = vadd.f32 %v2173_v9, %v2163_v24  ;;  %v2176_v43 = vadd.f32 %v2171_v59, %v2162_v23 }
 0x340   : > { %v2187_v35 = vpop.permute.xlu1 %2186  ;;  %v2185_v16 = vpop.permute.xlu0 %2184 }
 0x341   : > { %v2191_v60 = vadd.f32 %v2187_v35, %v2177_v54  ;;  %v2190_v27 = vadd.f32 %v2185_v16, %v2176_v43 }
 0x344   : > { %v2201_v38 = vpop.permute.xlu1 %2200  ;;  %v2199_v63 = vpop.permute.xlu0 %2198 }
 0x345   : > { %v2205_v0 = vadd.f32 %v2201_v38, %v2191_v60  ;;  %v2204_v17 = vadd.f32 %v2199_v63, %v2190_v27 }
 0x348   : > { %v2215_v3 = vpop.permute.xlu1 %2214  ;;  %v2213_v7 = vpop.permute.xlu0 %2212 }
 0x349   : > { %v2219_v20 = vadd.f32 %v2215_v3, %v2205_v0  ;;  %v2218_v19 = vadd.f32 %v2213_v7, %v2204_v17 }
 0x34b   : > { %v2222_v52 = vadd.f32 %v2220_v42, %v2219_v20  ;;  %v2221_v6 = vadd.f32 %v2220_v42, %v2218_v19 }
 0x34d   : > { %v2230_v36 = vmul.f32 %v2228_v1, %v2222_v52  ;;  %v2229_v29 = vmul.f32 %v2228_v1, %v2221_v6 }
 0x34f   : > { %2235 = vrot.lane.b32.xlu1 %v2230_v36, %s2831_s10  ;;  %2233 = vrot.lane.b32.xlu0 %v2229_v29, %s2831_s10  ;;  %s269_s10 = scalar_lea.vmem [#allocation11], %s2381_s23 }
 0x350   : > { %s2266_s16 = sshll.u32 %s269_s10, 4  ;;  %s4128_s16 = int_to_ptr.vmem [resolvable:$true] %s2266_s16 }
 0x351   : > { %s2750_s15 = scalar_lea.vmem %s4128_s16, 256  ;;  %p2757_p2 = scmp.lt.s32.totalorder %s4128_s16, %s2755_s17 }
 0x352   : > { %p2751_p8 = scmp.ne.s32.totalorder %s4128_s16, %s2750_s15  ;;  %p2758_p3 = scmp.lt.s32.totalorder %s2756_s25, %s2750_s15 }
 0x354   : > { %p2752_p13 = pnand %p2751_p8, %p4195_p11  ;;  %p2759_p4 = por %p2758_p3, %p2757_p2 }
 0x356   : > { %p2753_p1 = pneg %p2752_p13 }
 0x358   : > { %p2760_p9 = pnand %p2759_p4, %p2753_p1 }
 0x3c1   : > { %v2236_v30 = vpop.permute.xlu1 %2235  ;;  %v2234_v2 = vpop.permute.xlu0 %2233 }
 0x3c2   : > { %v2240_v39 = vadd.f32 %v2236_v30, %v2227_v53  ;;  %v2239_v14 = vadd.f32 %v2234_v2, %v2226_v40 }
 0x3c4   : > { %2245 = vrot.lane.b32.xlu1 %v2240_v39, %s2829_s8  ;;  %2243 = vrot.lane.b32.xlu0 %v2239_v14, %s2829_s8  ;;  %s4135_s8 = scalar_lea.sflag [#allocation4], %s267_s13 }
 0x436   : > { %v2246_v28 = vpop.permute.xlu1 %2245  ;;  %v2244_v51 = vpop.permute.xlu0 %2243 }
 0x437   : > { %2251 = vst.msk [vmem:[%s269_s10 + $0x8] sm:$0xff] %vm2249_vm3, %v2246_v28  ;;  %2250 = vst.msk [vmem:[%s269_s10] sm:$0xff] %vm2249_vm3, %v2244_v51 }
 0x438   : > { %2763 = shalt.err (!%p2760_p9)
}
 0x439   : > { %s2764_s6 = scalar_lea.hbm %s4133_s12, 256  ;;  %s2768_s11 = scalar_lea.hbm %s4180_s5, 512 }
 0x43a   : > { %p2765_p7 = scmp.ne.s32.totalorder %s4133_s12, %s2764_s6  ;;  %p2769_p6 = scmp.lt.s32.totalorder %s4133_s12, %s4180_s5 }
 0x43b   : > { %p2770_p12 = scmp.lt.s32.totalorder %s2768_s11, %s2764_s6 }
 0x43c   : > { %p2766_p0 = pnand %p2765_p7, %p4195_p11 }
 0x43d   : > { %p2771_p10 = por %p2770_p12, %p2769_p6 }
 0x43e   : > { %p2767_p5 = pneg %p2766_p0 }
 0x440   : > { %p2772_p8 = pnand %p2771_p10, %p2767_p5 }
 0x442   : > { %2775 = shalt.err (!%p2772_p8)
}
 0x443   : > { %s2833_s10 = smov 128   ;;  %s2834_s14 = smov 8  }
 0x444   : > { %2550 = dma.vmem_to_hbm [thread:$0]  (%p4195_p11), %s4128_s16, 256, %s4133_s12, %s4135_s8, %s2833_s10, %s2833_s10, %s2834_s14  }
 0x445 PF: > { %p2577_p13 = scmp.ge.s32.totalorder %s2822_s21, 2  ;;  %s2281_s26 = sand.u32 1, %s2810_s18  }
 0x446   : > { %p4196_p1 = scmp.ne.s32.totalorder %s4185_s29, 0  ;;  %s2282_s30 = scalar_lea.sflag [#allocation4], %s2281_s26 }
 0x448   : > { %p2566_p2 = pnand %p2577_p13, %p4196_p1 }
 0x44a   : > { %p2567_p3 = pneg %p2566_p2 }
 0x44c   : > { %2805 = dma.done.wait (%p2567_p3), %s2282_s30, 256  }
 0x44d   : > { %2807 = vsyncadd (%p2567_p3), %s2282_s30, 4294967040  ;;  %p18_p4 = scmp.ge.s32.totalorder %s2890_s24, 4   ;;  %s4197_s18 = smov %s2814_s19 }
 0x44e   : > { %s4198_s19 = smov %s2818_s20  ;;  %s4199_s20 = smov %s2901_s27 }
 0x44f   : > { %s4200_s21 = smov %s2890_s24  ;;  %20 = sbr.rel (!%p18_p4) target bundleno = 6 (0x6), region = 99 }
 0x454   :  { %2287 = vsyncpa [#allocation4], 1 }
 0x455   :  { %2289 = vsyncpa [#allocation4 + $0x1], 1 }
 0x456   :  { %2290 = vsyncpa [#allocation5], 1 }
 0x457   :  { %2292 = vsyncpa [#allocation5 + $0x1], 1 }
 0x458   :  { %2293 = vsyncpa [#allocation7], 1 }
 0x459   :  { %2294 = vsyncpa [#allocation10], 1 }

</bundles_post_ra>
